<compile_context>
chip_gen: v6e
topology: v6e:2x2x1
jax: 0.10.0
libtpu: 0.0.40
codegen_flags: <defaults>
</compile_context>

<pallas_src>
from functools import partial

import jax
import jax.numpy as jnp
from jax.experimental import pallas as pl
from jax.experimental.pallas import tpu as pltpu

# ---------------------------------------------------------------- problem sizes
B, H, W = 2, 16, 16
HW = H * W
D = 4                  # num_mpi_planes
F = 8                  # feature channels of the synthetic feature extractor
NUM_PRED_FRAMES = 1    # asserted == 1 in the torch module


# =============================================================== fused kernel
def _mpi_alpha(depth_bt, planes, num_planes):
    """MpiUtils.create_mpi_tr alpha: one-hot nearest-plane assignment,
    first-plane-wins on ties.  depth_bt: (B, TN), planes: (B, D) -> (B, D, TN)."""
    best = jnp.abs(depth_bt - planes[:, 0:1])
    idx = jnp.zeros_like(best)
    for k in range(1, num_planes):           # short static unroll (index tracking)
        dk = jnp.abs(depth_bt - planes[:, k:k + 1])
        better = dk < best                   # strict '<'  ->  first plane wins ties
        idx = jnp.where(better, float(k), idx)
        best = jnp.where(better, dk, best)
    # one-hot construction is fully parallel (no serial product chain)
    onehots = [(idx == float(k)).astype(jnp.float32) for k in range(num_planes)]
    return jnp.stack(onehots, axis=1)


def fused_kernel(in_ref, planes_ref, w_fe_ref, b_fe_ref, w_flow_ref, b_flow_ref,
                 out_ref, *, num_planes, num_feat, flow_scale):
    # ---- unpack the single input slab (B, 11, TN) ----
    f0 = in_ref[:, 0:3, :]                                                # (B, 3, TN)
    f1 = in_ref[:, 3:6, :]                                                # (B, 3, TN)
    f2 = in_ref[:, 6:9, :]                                                # (B, 3, TN)
    d0 = in_ref[:, 9, :]                                                  # (B, TN)
    d1 = in_ref[:, 10, :]                                                 # (B, TN)
    planes = planes_ref[...]                                              # (B, D) near->far

    # ---- MPI alphas (one-hot nearest plane) ----
    alpha1 = _mpi_alpha(d1, planes, num_planes)                           # (B, D, TN)
    # TODO(synk): the real Warper forward-splats frame0 geometrically (bilinear
    # scatter using transformations / intrinsics); stand-in bins depth0 into the
    # same depth1 planes at the source viewpoint (identity warp).
    alpha0 = _mpi_alpha(d0, planes, num_planes)                           # (B, D, TN)

    # ---- local flow estimator stand-in: 1x1 conv over
    #      [feat1(F), feat0(F), alpha1, alpha0] -> 3 outputs (fx, fy, z_sum).
    # The z-channel weights are pre-summed in the wrapper (exact), and the 16
    # feature maps are streamed into the accumulators instead of materialized.
    nci = 2 * num_feat
    accs = [b_flow_ref[co]
            + w_flow_ref[co, nci] * alpha1
            + w_flow_ref[co, nci + 1] * alpha0
            for co in range(3)]                                           # 3 x (B, D, TN)

    for f in range(num_feat):                                             # static unroll
        # synthetic feature extractor: 1x1 conv + ReLU; the RGB contribution is
        # plane-invariant -> computed once per pixel and broadcast over D.
        base1 = (b_fe_ref[f] + w_fe_ref[f, 0] * f1[:, 0, :]
                 + w_fe_ref[f, 1] * f1[:, 1, :] + w_fe_ref[f, 2] * f1[:, 2, :])
        feat1 = jnp.maximum(base1[:, None, :] + w_fe_ref[f, 3] * alpha1, 0.0)
        base0 = (b_fe_ref[f] + w_fe_ref[f, 0] * f0[:, 0, :]
                 + w_fe_ref[f, 1] * f0[:, 1, :] + w_fe_ref[f, 2] * f0[:, 2, :])
        feat0 = jnp.maximum(base0[:, None, :] + w_fe_ref[f, 3] * alpha0, 0.0)
        for co in range(3):
            accs[co] = (accs[co] + w_flow_ref[co, f] * feat1
                        + w_flow_ref[co, num_feat + f] * feat0)

    # ---- estimate_past_local_flow post-processing:
    #   z   = (sum of z-channels) * plane_d - plane_d = (z_sum - 1) * plane_d
    #   out = cat([fx, fy, z]) * mpi1_alpha
    plane_map = planes[:, :, None]                                        # (B, D, 1)
    fx = accs[0] * alpha1
    fy = accs[1] * alpha1
    fz = (accs[2] - 1.0) * plane_map * alpha1

    # ---- MpiUtils.alpha_compositing (front-to-back over-composite over D) ----
    # Explicit transmittance chain kept for fidelity to soft alphas (cheap, D=4).
    trans = jnp.ones(d1.shape, jnp.float32)                               # (B, TN)
    accx = jnp.zeros(d1.shape, jnp.float32)
    accy = jnp.zeros(d1.shape, jnp.float32)
    accz = jnp.zeros(d1.shape, jnp.float32)
    for k in range(num_planes):                                           # static unroll
        a = alpha1[:, k, :]
        wgt = a * trans
        accx = accx + fx[:, k, :] * wgt
        accy = accy + fy[:, k, :] * wgt
        accz = accz + fz[:, k, :] * wgt
        trans = trans * (1.0 - a)

    # local_flow_predictor stand-in: constant-velocity extrapolation.
    # TODO(synk): real predictor is a learned network; its output feeds the
    # Warper's forward-splatting step (no clean Pallas equivalent), so the
    # predicted flow is emitted as an auxiliary output instead of being warped.
    flow12 = jnp.stack([-flow_scale * accx,
                        -flow_scale * accy,
                        -flow_scale * accz], axis=1)                      # (B, 3, TN)

    # ---- predicted frame: identity-warp stand-in of frame1 into its own MPI.
    # warped_mpi2_alpha == alpha1 (same depth / same planes); compositing the
    # plane-broadcast RGB reduces exactly to frame1 * mask with mask = 1 - trans.
    # The infill formula below mirrors the torch code verbatim
    # (infilled = mask * warped_frame2 + (1 - mask) * true_frame2).
    mask3 = (1.0 - trans)[:, None, :]                                     # (B, 1, TN)
    warped2 = f1 * mask3                                                  # warped_frame2
    pred = mask3 * warped2 + (1.0 - mask3) * f2                           # infill blend

    # ---- one dense 8-sublane store: [pred:3 | mask:1 | flow12:3 | pad:1] ----
    pad = jnp.zeros_like(mask3)
    out_ref[...] = jnp.concatenate([pred, mask3, flow12, pad], axis=1)    # (B, 8, TN)


# ============================================================ kernel wrapper
def fused_forward(frame0, depth0, frame1, depth1, frame2, planes, params,
                  *, num_planes=D, num_feat=F, tile_n=None, flow_scale=1.0):
    b, _, hw = frame1.shape
    assert num_planes >= 2
    assert params["w_fe"].shape == (num_feat, 4)
    assert params["w_flow"].shape == (6, 2 * num_feat + 2)
    if tile_n is None:
        tile_n = hw            # single grid step: overhead-dominated at toy sizes
    assert hw % tile_n == 0 and tile_n % 128 == 0
    n_tiles = hw // tile_n

    # Fold the z-channel sum into the flow weights (exact: the 4 z-channels are
    # only ever summed in estimate_past_local_flow).
    w_flow = params["w_flow"]
    b_flow = params["b_flow"]
    w_flow3 = jnp.concatenate([w_flow[0:2], w_flow[2:6].sum(axis=0, keepdims=True)], axis=0)
    b_flow3 = jnp.concatenate([b_flow[0:2], b_flow[2:6].sum(keepdims=True)])

    # Pack the five tensor inputs into one sublane/lane-dense slab (B, 11, HW).
    x = jnp.concatenate([frame0, frame1, frame2,
                         depth0[:, None, :], depth1[:, None, :]], axis=1)

    kern = partial(fused_kernel, num_planes=num_planes, num_feat=num_feat,
                   flow_scale=flow_scale)
    smem = pl.BlockSpec(memory_space=pltpu.MemorySpace.SMEM)

    out = pl.pallas_call(
        kern,
        grid=(n_tiles,),
        in_specs=[
            pl.BlockSpec((b, 11, tile_n), lambda j: (0, 0, j)),   # packed input slab
            pl.BlockSpec((b, num_planes), lambda j: (0, 0)),      # depth planes (tiny)
            smem, smem, smem, smem,                               # conv weights / biases
        ],
        out_specs=pl.BlockSpec((b, 8, tile_n), lambda j: (0, 0, j)),
        out_shape=jax.ShapeDtypeStruct((b, 8, hw), jnp.float32),
        compiler_params=pltpu.CompilerParams(
            # single step today; re-enable a multi-tile "parallel" grid (v7x
            # 2-TC split) once per-tile work is a few microseconds.
            dimension_semantics=("arbitrary",),
            vmem_limit_bytes=16 * 1024 * 1024,   # modest; footprint is tens of KB
        ),
    )(x, planes, params["w_fe"], params["b_fe"], w_flow3, b_flow3)

    pred = out[:, 0:3, :]
    mask = out[:, 3:4, :]
    flow12 = out[:, 4:7, :]
    return pred, mask, flow12


def _depth_planes(depth1_flat, num_planes):
    """MpiUtils.get_depth_planes_tr stand-in: equispaced in inverse depth from
    min(depth1) to clip(max(depth1), 0, 1000).  Plain JAX (8 floats)."""
    eps = 1e-8
    dmin = jnp.maximum(jnp.min(depth1_flat, axis=1), eps)
    dmax = jnp.maximum(jnp.clip(jnp.max(depth1_flat, axis=1), 0.0, 1000.0), eps)
    dmin = jnp.minimum(dmin, dmax)   # robustness guard: keep planes monotonic
    t = jnp.linspace(0.0, 1.0, num_planes, dtype=jnp.float32)
    inv = (1.0 / dmin)[:, None] * (1.0 - t)[None, :] + (1.0 / dmax)[:, None] * t[None, :]
    return 1.0 / inv                                                      # (B, D)


# ====================================================== full forward pass glue
def frame_predictor_forward(input_batch, params):
    assert NUM_PRED_FRAMES == 1
    b, _, h, w = input_batch["frame1"].shape
    hw = h * w
    frame0 = input_batch["frame0"].reshape(b, 3, hw)
    frame1 = input_batch["frame1"].reshape(b, 3, hw)
    depth0 = input_batch["depth0"].reshape(b, hw)
    depth1 = input_batch["depth1"].reshape(b, hw)

    planes = _depth_planes(depth1, D)                                     # (B, D)

    output_batch = {"predicted_frames": [], "predicted_frames_mask": [],
                    "local_flow12": []}
    for i in range(NUM_PRED_FRAMES):   # == 1, so the flow estimation runs once
        true_frame2 = input_batch["frame2"][i].reshape(b, 3, hw)
        # local_flow_predictor: num_future_steps / (num_past_steps - 1)
        flow_scale = float(i + 1) / float((NUM_PRED_FRAMES + 1) - 1)
        pred, mask, flow12 = fused_forward(frame0, depth0, frame1, depth1,
                                           true_frame2, planes, params,
                                           flow_scale=flow_scale)
        output_batch["predicted_frames"].append(pred.reshape(b, 3, h, w))
        output_batch["predicted_frames_mask"].append(mask.reshape(b, 1, h, w))
        # Auxiliary: the real Warper would consume this for forward splatting.
        output_batch["local_flow12"].append(flow12.reshape(b, 3, h, w))
    return output_batch


# ============================================================== driver / test
if __name__ == "__main__":
    key = jax.random.PRNGKey(0)
    ks = jax.random.split(key, 8)

    input_batch = {
        "frame0": jax.random.uniform(ks[0], (B, 3, H, W), jnp.float32),
        "frame1": jax.random.uniform(ks[1], (B, 3, H, W), jnp.float32),
        "frame2": [jax.random.uniform(ks[2], (B, 3, H, W), jnp.float32)],
        "depth0": 1.0 + 9.0 * jax.random.uniform(ks[3], (B, 1, H, W), jnp.float32),
        "depth1": 1.0 + 9.0 * jax.random.uniform(ks[4], (B, 1, H, W), jnp.float32),
        # geometry inputs (consumed only by the real Warper; kept for interface parity)
        "transformation0": jnp.broadcast_to(jnp.eye(4, dtype=jnp.float32), (B, 4, 4)),
        "transformation1": jnp.broadcast_to(jnp.eye(4, dtype=jnp.float32), (B, 4, 4)),
        "transformation2": [jnp.broadcast_to(jnp.eye(4, dtype=jnp.float32), (B, 4, 4))],
        "intrinsic0": jnp.broadcast_to(jnp.eye(3, dtype=jnp.float32), (B, 3, 3)),
        "intrinsic1": jnp.broadcast_to(jnp.eye(3, dtype=jnp.float32), (B, 3, 3)),
        "intrinsic2": [jnp.broadcast_to(jnp.eye(3, dtype=jnp.float32), (B, 3, 3))],
    }

    params = {
        "w_fe": 0.1 * jax.random.normal(ks[5], (F, 4), jnp.float32),
        "b_fe": jnp.zeros((F,), jnp.float32),
        "w_flow": 0.05 * jax.random.normal(ks[6], (6, 2 * F + 2), jnp.float32),
        "b_flow": jnp.zeros((6,), jnp.float32),
    }

    out = frame_predictor_forward(input_batch, params)
    out = jax.block_until_ready(out)

    pf = out["predicted_frames"][0]
    pm = out["predicted_frames_mask"][0]
    lf = out["local_flow12"][0]
    assert pf.shape == (B, 3, H, W) and pm.shape == (B, 1, H, W) and lf.shape == (B, 3, H, W)
    assert bool(jnp.all(jnp.isfinite(pf)))
    assert bool(jnp.all(jnp.isfinite(pm)))
    assert bool(jnp.all(jnp.isfinite(lf)))
    print("KERNEL_OK")
</pallas_src>

<mosaic_0001>
module attributes {stable_mosaic.version = 11 : i64} {
  func.func @fused_kernel(%arg0: i32, %arg1: memref<2x11x256xf32, #tpu.memory_space<vmem>>, %arg2: memref<2x4xf32, #tpu.memory_space<vmem>>, %arg3: memref<8x4xf32, #tpu.memory_space<smem>>, %arg4: memref<8xf32, #tpu.memory_space<smem>>, %arg5: memref<3x18xf32, #tpu.memory_space<smem>>, %arg6: memref<3xf32, #tpu.memory_space<smem>>, %arg7: memref<2x8x256xf32, #tpu.memory_space<vmem>>) attributes {dimension_semantics = [#tpu.dimension_semantics<arbitrary>], iteration_bounds = array<i64: 1>, scalar_prefetch = 0 : i64, scratch_operands = 0 : i64, tpu.core_type = #tpu.core_type<tc>, window_params = [{transform_indices = @transform_0, window_bounds = array<i64: 2, 11, 256>}, {pipeline_mode = #tpu.pipeline_mode<synchronous>, transform_indices = @transform_1, window_bounds = array<i64: 2, 4>}, {transform_indices = @transform_2, window_bounds = array<i64: 8, 4>}, {transform_indices = @transform_3, window_bounds = array<i64: 8>}, {transform_indices = @transform_4, window_bounds = array<i64: 3, 18>}, {transform_indices = @transform_5, window_bounds = array<i64: 3>}, {transform_indices = @transform_6, window_bounds = array<i64: 2, 8, 256>}]} {
    %c0 = arith.constant 0 : index
    %c0_0 = arith.constant 0 : index
    %c0_1 = arith.constant 0 : index
    %0 = vector.load %arg1[%c0, %c0_0, %c0_1] : memref<2x11x256xf32, #tpu.memory_space<vmem>>, vector<2x3x256xf32>
    %c0_2 = arith.constant 0 : index
    %c3 = arith.constant 3 : index
    %c0_3 = arith.constant 0 : index
    %1 = vector.load %arg1[%c0_2, %c3, %c0_3] : memref<2x11x256xf32, #tpu.memory_space<vmem>>, vector<2x3x256xf32>
    %c0_4 = arith.constant 0 : index
    %c6 = arith.constant 6 : index
    %c0_5 = arith.constant 0 : index
    %2 = vector.load %arg1[%c0_4, %c6, %c0_5] : memref<2x11x256xf32, #tpu.memory_space<vmem>>, vector<2x3x256xf32>
    %c0_6 = arith.constant 0 : index
    %c9 = arith.constant 9 : index
    %c0_7 = arith.constant 0 : index
    %3 = vector.load %arg1[%c0_6, %c9, %c0_7] : memref<2x11x256xf32, #tpu.memory_space<vmem>>, vector<2x1x256xf32>
    %4 = vector.shape_cast %3 : vector<2x1x256xf32> to vector<2x256xf32>
    %c0_8 = arith.constant 0 : index
    %c10 = arith.constant 10 : index
    %c0_9 = arith.constant 0 : index
    %5 = vector.load %arg1[%c0_8, %c10, %c0_9] : memref<2x11x256xf32, #tpu.memory_space<vmem>>, vector<2x1x256xf32>
    %6 = vector.shape_cast %5 : vector<2x1x256xf32> to vector<2x256xf32>
    %c0_10 = arith.constant 0 : index
    %c0_11 = arith.constant 0 : index
    %7 = vector.load %arg2[%c0_10, %c0_11] : memref<2x4xf32, #tpu.memory_space<vmem>>, vector<2x4xf32>
    %8 = vector.extract_strided_slice %7 {offsets = [0, 0], sizes = [2, 1], strides = [1, 1]} : vector<2x4xf32> to vector<2x1xf32>
    %9 = vector.broadcast %8 : vector<2x1xf32> to vector<2x256xf32>
    %10 = arith.subf %6, %9 : vector<2x256xf32>
    %11 = math.absf %10 : vector<2x256xf32>
    %cst = arith.constant 0.000000e+00 : f32
    %12 = vector.broadcast %cst : f32 to vector<2x256xf32>
    %13 = vector.extract_strided_slice %7 {offsets = [0, 1], sizes = [2, 1], strides = [1, 1]} : vector<2x4xf32> to vector<2x1xf32>
    %14 = vector.broadcast %13 : vector<2x1xf32> to vector<2x256xf32>
    %15 = arith.subf %6, %14 : vector<2x256xf32>
    %16 = math.absf %15 : vector<2x256xf32>
    %17 = arith.cmpf olt, %16, %11 : vector<2x256xf32>
    %cst_12 = arith.constant 1.000000e+00 : f32
    %18 = vector.broadcast %cst_12 : f32 to vector<2x256xf32>
    %19 = arith.select %17, %18, %12 : vector<2x256xi1>, vector<2x256xf32>
    %20 = arith.select %17, %16, %11 : vector<2x256xi1>, vector<2x256xf32>
    %21 = vector.extract_strided_slice %7 {offsets = [0, 2], sizes = [2, 1], strides = [1, 1]} : vector<2x4xf32> to vector<2x1xf32>
    %22 = vector.broadcast %21 : vector<2x1xf32> to vector<2x256xf32>
    %23 = arith.subf %6, %22 : vector<2x256xf32>
    %24 = math.absf %23 : vector<2x256xf32>
    %25 = arith.cmpf olt, %24, %20 : vector<2x256xf32>
    %cst_13 = arith.constant 2.000000e+00 : f32
    %26 = vector.broadcast %cst_13 : f32 to vector<2x256xf32>
    %27 = arith.select %25, %26, %19 : vector<2x256xi1>, vector<2x256xf32>
    %28 = arith.select %25, %24, %20 : vector<2x256xi1>, vector<2x256xf32>
    %29 = vector.extract_strided_slice %7 {offsets = [0, 3], sizes = [2, 1], strides = [1, 1]} : vector<2x4xf32> to vector<2x1xf32>
    %30 = vector.broadcast %29 : vector<2x1xf32> to vector<2x256xf32>
    %31 = arith.subf %6, %30 : vector<2x256xf32>
    %32 = math.absf %31 : vector<2x256xf32>
    %33 = arith.cmpf olt, %32, %28 : vector<2x256xf32>
    %cst_14 = arith.constant 3.000000e+00 : f32
    %34 = vector.broadcast %cst_14 : f32 to vector<2x256xf32>
    %35 = arith.select %33, %34, %27 : vector<2x256xi1>, vector<2x256xf32>
    %cst_15 = arith.constant 0.000000e+00 : f32
    %36 = vector.broadcast %cst_15 : f32 to vector<2x256xf32>
    %37 = arith.cmpf oeq, %35, %36 : vector<2x256xf32>
    %38 = arith.extui %37 : vector<2x256xi1> to vector<2x256xi32>
    %39 = arith.sitofp %38 : vector<2x256xi32> to vector<2x256xf32>
    %cst_16 = arith.constant 1.000000e+00 : f32
    %40 = vector.broadcast %cst_16 : f32 to vector<2x256xf32>
    %41 = arith.cmpf oeq, %35, %40 : vector<2x256xf32>
    %42 = arith.extui %41 : vector<2x256xi1> to vector<2x256xi32>
    %43 = arith.sitofp %42 : vector<2x256xi32> to vector<2x256xf32>
    %cst_17 = arith.constant 2.000000e+00 : f32
    %44 = vector.broadcast %cst_17 : f32 to vector<2x256xf32>
    %45 = arith.cmpf oeq, %35, %44 : vector<2x256xf32>
    %46 = arith.extui %45 : vector<2x256xi1> to vector<2x256xi32>
    %47 = arith.sitofp %46 : vector<2x256xi32> to vector<2x256xf32>
    %cst_18 = arith.constant 3.000000e+00 : f32
    %48 = vector.broadcast %cst_18 : f32 to vector<2x256xf32>
    %49 = arith.cmpf oeq, %35, %48 : vector<2x256xf32>
    %50 = arith.extui %49 : vector<2x256xi1> to vector<2x256xi32>
    %51 = arith.sitofp %50 : vector<2x256xi32> to vector<2x256xf32>
    %52 = vector.shape_cast %39 : vector<2x256xf32> to vector<2x1x256xf32>
    %53 = vector.shape_cast %43 : vector<2x256xf32> to vector<2x1x256xf32>
    %54 = vector.shape_cast %47 : vector<2x256xf32> to vector<2x1x256xf32>
    %55 = vector.shape_cast %51 : vector<2x256xf32> to vector<2x1x256xf32>
    %56 = tpu.concatenate %52, %53, %54, %55 in 1 : vector<2x1x256xf32>, vector<2x1x256xf32>, vector<2x1x256xf32>, vector<2x1x256xf32> -> vector<2x4x256xf32>
    %57 = vector.extract_strided_slice %7 {offsets = [0, 0], sizes = [2, 1], strides = [1, 1]} : vector<2x4xf32> to vector<2x1xf32>
    %58 = vector.broadcast %57 : vector<2x1xf32> to vector<2x256xf32>
    %59 = arith.subf %4, %58 : vector<2x256xf32>
    %60 = math.absf %59 : vector<2x256xf32>
    %cst_19 = arith.constant 0.000000e+00 : f32
    %61 = vector.broadcast %cst_19 : f32 to vector<2x256xf32>
    %62 = vector.extract_strided_slice %7 {offsets = [0, 1], sizes = [2, 1], strides = [1, 1]} : vector<2x4xf32> to vector<2x1xf32>
    %63 = vector.broadcast %62 : vector<2x1xf32> to vector<2x256xf32>
    %64 = arith.subf %4, %63 : vector<2x256xf32>
    %65 = math.absf %64 : vector<2x256xf32>
    %66 = arith.cmpf olt, %65, %60 : vector<2x256xf32>
    %cst_20 = arith.constant 1.000000e+00 : f32
    %67 = vector.broadcast %cst_20 : f32 to vector<2x256xf32>
    %68 = arith.select %66, %67, %61 : vector<2x256xi1>, vector<2x256xf32>
    %69 = arith.select %66, %65, %60 : vector<2x256xi1>, vector<2x256xf32>
    %70 = vector.extract_strided_slice %7 {offsets = [0, 2], sizes = [2, 1], strides = [1, 1]} : vector<2x4xf32> to vector<2x1xf32>
    %71 = vector.broadcast %70 : vector<2x1xf32> to vector<2x256xf32>
    %72 = arith.subf %4, %71 : vector<2x256xf32>
    %73 = math.absf %72 : vector<2x256xf32>
    %74 = arith.cmpf olt, %73, %69 : vector<2x256xf32>
    %cst_21 = arith.constant 2.000000e+00 : f32
    %75 = vector.broadcast %cst_21 : f32 to vector<2x256xf32>
    %76 = arith.select %74, %75, %68 : vector<2x256xi1>, vector<2x256xf32>
    %77 = arith.select %74, %73, %69 : vector<2x256xi1>, vector<2x256xf32>
    %78 = vector.extract_strided_slice %7 {offsets = [0, 3], sizes = [2, 1], strides = [1, 1]} : vector<2x4xf32> to vector<2x1xf32>
    %79 = vector.broadcast %78 : vector<2x1xf32> to vector<2x256xf32>
    %80 = arith.subf %4, %79 : vector<2x256xf32>
    %81 = math.absf %80 : vector<2x256xf32>
    %82 = arith.cmpf olt, %81, %77 : vector<2x256xf32>
    %cst_22 = arith.constant 3.000000e+00 : f32
    %83 = vector.broadcast %cst_22 : f32 to vector<2x256xf32>
    %84 = arith.select %82, %83, %76 : vector<2x256xi1>, vector<2x256xf32>
    %cst_23 = arith.constant 0.000000e+00 : f32
    %85 = vector.broadcast %cst_23 : f32 to vector<2x256xf32>
    %86 = arith.cmpf oeq, %84, %85 : vector<2x256xf32>
    %87 = arith.extui %86 : vector<2x256xi1> to vector<2x256xi32>
    %88 = arith.sitofp %87 : vector<2x256xi32> to vector<2x256xf32>
    %cst_24 = arith.constant 1.000000e+00 : f32
    %89 = vector.broadcast %cst_24 : f32 to vector<2x256xf32>
    %90 = arith.cmpf oeq, %84, %89 : vector<2x256xf32>
    %91 = arith.extui %90 : vector<2x256xi1> to vector<2x256xi32>
    %92 = arith.sitofp %91 : vector<2x256xi32> to vector<2x256xf32>
    %cst_25 = arith.constant 2.000000e+00 : f32
    %93 = vector.broadcast %cst_25 : f32 to vector<2x256xf32>
    %94 = arith.cmpf oeq, %84, %93 : vector<2x256xf32>
    %95 = arith.extui %94 : vector<2x256xi1> to vector<2x256xi32>
    %96 = arith.sitofp %95 : vector<2x256xi32> to vector<2x256xf32>
    %cst_26 = arith.constant 3.000000e+00 : f32
    %97 = vector.broadcast %cst_26 : f32 to vector<2x256xf32>
    %98 = arith.cmpf oeq, %84, %97 : vector<2x256xf32>
    %99 = arith.extui %98 : vector<2x256xi1> to vector<2x256xi32>
    %100 = arith.sitofp %99 : vector<2x256xi32> to vector<2x256xf32>
    %101 = vector.shape_cast %88 : vector<2x256xf32> to vector<2x1x256xf32>
    %102 = vector.shape_cast %92 : vector<2x256xf32> to vector<2x1x256xf32>
    %103 = vector.shape_cast %96 : vector<2x256xf32> to vector<2x1x256xf32>
    %104 = vector.shape_cast %100 : vector<2x256xf32> to vector<2x1x256xf32>
    %105 = tpu.concatenate %101, %102, %103, %104 in 1 : vector<2x1x256xf32>, vector<2x1x256xf32>, vector<2x1x256xf32>, vector<2x1x256xf32> -> vector<2x4x256xf32>
    %c0_27 = arith.constant 0 : index
    %106 = memref.load %arg6[%c0_27] : memref<3xf32, #tpu.memory_space<smem>>
    %c0_28 = arith.constant 0 : index
    %c16 = arith.constant 16 : index
    %107 = memref.load %arg5[%c0_28, %c16] : memref<3x18xf32, #tpu.memory_space<smem>>
    %108 = vector.broadcast %107 : f32 to vector<2x4x256xf32>
    %109 = arith.mulf %108, %56 : vector<2x4x256xf32>
    %110 = vector.broadcast %106 : f32 to vector<2x4x256xf32>
    %111 = arith.addf %110, %109 : vector<2x4x256xf32>
    %c0_29 = arith.constant 0 : index
    %c17 = arith.constant 17 : index
    %112 = memref.load %arg5[%c0_29, %c17] : memref<3x18xf32, #tpu.memory_space<smem>>
    %113 = vector.broadcast %112 : f32 to vector<2x4x256xf32>
    %114 = arith.mulf %113, %105 : vector<2x4x256xf32>
    %115 = arith.addf %111, %114 : vector<2x4x256xf32>
    %c1 = arith.constant 1 : index
    %116 = memref.load %arg6[%c1] : memref<3xf32, #tpu.memory_space<smem>>
    %c1_30 = arith.constant 1 : index
    %c16_31 = arith.constant 16 : index
    %117 = memref.load %arg5[%c1_30, %c16_31] : memref<3x18xf32, #tpu.memory_space<smem>>
    %118 = vector.broadcast %117 : f32 to vector<2x4x256xf32>
    %119 = arith.mulf %118, %56 : vector<2x4x256xf32>
    %120 = vector.broadcast %116 : f32 to vector<2x4x256xf32>
    %121 = arith.addf %120, %119 : vector<2x4x256xf32>
    %c1_32 = arith.constant 1 : index
    %c17_33 = arith.constant 17 : index
    %122 = memref.load %arg5[%c1_32, %c17_33] : memref<3x18xf32, #tpu.memory_space<smem>>
    %123 = vector.broadcast %122 : f32 to vector<2x4x256xf32>
    %124 = arith.mulf %123, %105 : vector<2x4x256xf32>
    %125 = arith.addf %121, %124 : vector<2x4x256xf32>
    %c2 = arith.constant 2 : index
    %126 = memref.load %arg6[%c2] : memref<3xf32, #tpu.memory_space<smem>>
    %c2_34 = arith.constant 2 : index
    %c16_35 = arith.constant 16 : index
    %127 = memref.load %arg5[%c2_34, %c16_35] : memref<3x18xf32, #tpu.memory_space<smem>>
    %128 = vector.broadcast %127 : f32 to vector<2x4x256xf32>
    %129 = arith.mulf %128, %56 : vector<2x4x256xf32>
    %130 = vector.broadcast %126 : f32 to vector<2x4x256xf32>
    %131 = arith.addf %130, %129 : vector<2x4x256xf32>
    %c2_36 = arith.constant 2 : index
    %c17_37 = arith.constant 17 : index
    %132 = memref.load %arg5[%c2_36, %c17_37] : memref<3x18xf32, #tpu.memory_space<smem>>
    %133 = vector.broadcast %132 : f32 to vector<2x4x256xf32>
    %134 = arith.mulf %133, %105 : vector<2x4x256xf32>
    %135 = arith.addf %131, %134 : vector<2x4x256xf32>
    %c0_38 = arith.constant 0 : index
    %136 = memref.load %arg4[%c0_38] : memref<8xf32, #tpu.memory_space<smem>>
    %c0_39 = arith.constant 0 : index
    %c0_40 = arith.constant 0 : index
    %137 = memref.load %arg3[%c0_39, %c0_40] : memref<8x4xf32, #tpu.memory_space<smem>>
    %138 = vector.extract_strided_slice %1 {offsets = [0, 0, 0], sizes = [2, 1, 256], strides = [1, 1, 1]} : vector<2x3x256xf32> to vector<2x1x256xf32>
    %139 = vector.shape_cast %138 : vector<2x1x256xf32> to vector<2x256xf32>
    %140 = vector.broadcast %137 : f32 to vector<2x256xf32>
    %141 = arith.mulf %140, %139 : vector<2x256xf32>
    %142 = vector.broadcast %136 : f32 to vector<2x256xf32>
    %143 = arith.addf %142, %141 : vector<2x256xf32>
    %c0_41 = arith.constant 0 : index
    %c1_42 = arith.constant 1 : index
    %144 = memref.load %arg3[%c0_41, %c1_42] : memref<8x4xf32, #tpu.memory_space<smem>>
    %145 = vector.extract_strided_slice %1 {offsets = [0, 1, 0], sizes = [2, 1, 256], strides = [1, 1, 1]} : vector<2x3x256xf32> to vector<2x1x256xf32>
    %146 = vector.shape_cast %145 : vector<2x1x256xf32> to vector<2x256xf32>
    %147 = vector.broadcast %144 : f32 to vector<2x256xf32>
    %148 = arith.mulf %147, %146 : vector<2x256xf32>
    %149 = arith.addf %143, %148 : vector<2x256xf32>
    %c0_43 = arith.constant 0 : index
    %c2_44 = arith.constant 2 : index
    %150 = memref.load %arg3[%c0_43, %c2_44] : memref<8x4xf32, #tpu.memory_space<smem>>
    %151 = vector.extract_strided_slice %1 {offsets = [0, 2, 0], sizes = [2, 1, 256], strides = [1, 1, 1]} : vector<2x3x256xf32> to vector<2x1x256xf32>
    %152 = vector.shape_cast %151 : vector<2x1x256xf32> to vector<2x256xf32>
    %153 = vector.broadcast %150 : f32 to vector<2x256xf32>
    %154 = arith.mulf %153, %152 : vector<2x256xf32>
    %155 = arith.addf %149, %154 : vector<2x256xf32>
    %156 = vector.shape_cast %155 : vector<2x256xf32> to vector<2x1x256xf32>
    %c0_45 = arith.constant 0 : index
    %c3_46 = arith.constant 3 : index
    %157 = memref.load %arg3[%c0_45, %c3_46] : memref<8x4xf32, #tpu.memory_space<smem>>
    %158 = vector.broadcast %157 : f32 to vector<2x4x256xf32>
    %159 = arith.mulf %158, %56 : vector<2x4x256xf32>
    %160 = vector.broadcast %156 : vector<2x1x256xf32> to vector<2x4x256xf32>
    %161 = arith.addf %160, %159 : vector<2x4x256xf32>
    %cst_47 = arith.constant 0.000000e+00 : f32
    %162 = vector.broadcast %cst_47 : f32 to vector<2x4x256xf32>
    %163 = arith.maximumf %161, %162 : vector<2x4x256xf32>
    %c0_48 = arith.constant 0 : index
    %164 = memref.load %arg4[%c0_48] : memref<8xf32, #tpu.memory_space<smem>>
    %c0_49 = arith.constant 0 : index
    %c0_50 = arith.constant 0 : index
    %165 = memref.load %arg3[%c0_49, %c0_50] : memref<8x4xf32, #tpu.memory_space<smem>>
    %166 = vector.extract_strided_slice %0 {offsets = [0, 0, 0], sizes = [2, 1, 256], strides = [1, 1, 1]} : vector<2x3x256xf32> to vector<2x1x256xf32>
    %167 = vector.shape_cast %166 : vector<2x1x256xf32> to vector<2x256xf32>
    %168 = vector.broadcast %165 : f32 to vector<2x256xf32>
    %169 = arith.mulf %168, %167 : vector<2x256xf32>
    %170 = vector.broadcast %164 : f32 to vector<2x256xf32>
    %171 = arith.addf %170, %169 : vector<2x256xf32>
    %c0_51 = arith.constant 0 : index
    %c1_52 = arith.constant 1 : index
    %172 = memref.load %arg3[%c0_51, %c1_52] : memref<8x4xf32, #tpu.memory_space<smem>>
    %173 = vector.extract_strided_slice %0 {offsets = [0, 1, 0], sizes = [2, 1, 256], strides = [1, 1, 1]} : vector<2x3x256xf32> to vector<2x1x256xf32>
    %174 = vector.shape_cast %173 : vector<2x1x256xf32> to vector<2x256xf32>
    %175 = vector.broadcast %172 : f32 to vector<2x256xf32>
    %176 = arith.mulf %175, %174 : vector<2x256xf32>
    %177 = arith.addf %171, %176 : vector<2x256xf32>
    %c0_53 = arith.constant 0 : index
    %c2_54 = arith.constant 2 : index
    %178 = memref.load %arg3[%c0_53, %c2_54] : memref<8x4xf32, #tpu.memory_space<smem>>
    %179 = vector.extract_strided_slice %0 {offsets = [0, 2, 0], sizes = [2, 1, 256], strides = [1, 1, 1]} : vector<2x3x256xf32> to vector<2x1x256xf32>
    %180 = vector.shape_cast %179 : vector<2x1x256xf32> to vector<2x256xf32>
    %181 = vector.broadcast %178 : f32 to vector<2x256xf32>
    %182 = arith.mulf %181, %180 : vector<2x256xf32>
    %183 = arith.addf %177, %182 : vector<2x256xf32>
    %184 = vector.shape_cast %183 : vector<2x256xf32> to vector<2x1x256xf32>
    %c0_55 = arith.constant 0 : index
    %c3_56 = arith.constant 3 : index
    %185 = memref.load %arg3[%c0_55, %c3_56] : memref<8x4xf32, #tpu.memory_space<smem>>
    %186 = vector.broadcast %185 : f32 to vector<2x4x256xf32>
    %187 = arith.mulf %186, %105 : vector<2x4x256xf32>
    %188 = vector.broadcast %184 : vector<2x1x256xf32> to vector<2x4x256xf32>
    %189 = arith.addf %188, %187 : vector<2x4x256xf32>
    %cst_57 = arith.constant 0.000000e+00 : f32
    %190 = vector.broadcast %cst_57 : f32 to vector<2x4x256xf32>
    %191 = arith.maximumf %189, %190 : vector<2x4x256xf32>
    %c0_58 = arith.constant 0 : index
    %c0_59 = arith.constant 0 : index
    %192 = memref.load %arg5[%c0_58, %c0_59] : memref<3x18xf32, #tpu.memory_space<smem>>
    %193 = vector.broadcast %192 : f32 to vector<2x4x256xf32>
    %194 = arith.mulf %193, %163 : vector<2x4x256xf32>
    %195 = arith.addf %115, %194 : vector<2x4x256xf32>
    %c0_60 = arith.constant 0 : index
    %c8 = arith.constant 8 : index
    %196 = memref.load %arg5[%c0_60, %c8] : memref<3x18xf32, #tpu.memory_space<smem>>
    %197 = vector.broadcast %196 : f32 to vector<2x4x256xf32>
    %198 = arith.mulf %197, %191 : vector<2x4x256xf32>
    %199 = arith.addf %195, %198 : vector<2x4x256xf32>
    %c1_61 = arith.constant 1 : index
    %c0_62 = arith.constant 0 : index
    %200 = memref.load %arg5[%c1_61, %c0_62] : memref<3x18xf32, #tpu.memory_space<smem>>
    %201 = vector.broadcast %200 : f32 to vector<2x4x256xf32>
    %202 = arith.mulf %201, %163 : vector<2x4x256xf32>
    %203 = arith.addf %125, %202 : vector<2x4x256xf32>
    %c1_63 = arith.constant 1 : index
    %c8_64 = arith.constant 8 : index
    %204 = memref.load %arg5[%c1_63, %c8_64] : memref<3x18xf32, #tpu.memory_space<smem>>
    %205 = vector.broadcast %204 : f32 to vector<2x4x256xf32>
    %206 = arith.mulf %205, %191 : vector<2x4x256xf32>
    %207 = arith.addf %203, %206 : vector<2x4x256xf32>
    %c2_65 = arith.constant 2 : index
    %c0_66 = arith.constant 0 : index
    %208 = memref.load %arg5[%c2_65, %c0_66] : memref<3x18xf32, #tpu.memory_space<smem>>
    %209 = vector.broadcast %208 : f32 to vector<2x4x256xf32>
    %210 = arith.mulf %209, %163 : vector<2x4x256xf32>
    %211 = arith.addf %135, %210 : vector<2x4x256xf32>
    %c2_67 = arith.constant 2 : index
    %c8_68 = arith.constant 8 : index
    %212 = memref.load %arg5[%c2_67, %c8_68] : memref<3x18xf32, #tpu.memory_space<smem>>
    %213 = vector.broadcast %212 : f32 to vector<2x4x256xf32>
    %214 = arith.mulf %213, %191 : vector<2x4x256xf32>
    %215 = arith.addf %211, %214 : vector<2x4x256xf32>
    %c1_69 = arith.constant 1 : index
    %216 = memref.load %arg4[%c1_69] : memref<8xf32, #tpu.memory_space<smem>>
    %c1_70 = arith.constant 1 : index
    %c0_71 = arith.constant 0 : index
    %217 = memref.load %arg3[%c1_70, %c0_71] : memref<8x4xf32, #tpu.memory_space<smem>>
    %218 = vector.extract_strided_slice %1 {offsets = [0, 0, 0], sizes = [2, 1, 256], strides = [1, 1, 1]} : vector<2x3x256xf32> to vector<2x1x256xf32>
    %219 = vector.shape_cast %218 : vector<2x1x256xf32> to vector<2x256xf32>
    %220 = vector.broadcast %217 : f32 to vector<2x256xf32>
    %221 = arith.mulf %220, %219 : vector<2x256xf32>
    %222 = vector.broadcast %216 : f32 to vector<2x256xf32>
    %223 = arith.addf %222, %221 : vector<2x256xf32>
    %c1_72 = arith.constant 1 : index
    %c1_73 = arith.constant 1 : index
    %224 = memref.load %arg3[%c1_72, %c1_73] : memref<8x4xf32, #tpu.memory_space<smem>>
    %225 = vector.extract_strided_slice %1 {offsets = [0, 1, 0], sizes = [2, 1, 256], strides = [1, 1, 1]} : vector<2x3x256xf32> to vector<2x1x256xf32>
    %226 = vector.shape_cast %225 : vector<2x1x256xf32> to vector<2x256xf32>
    %227 = vector.broadcast %224 : f32 to vector<2x256xf32>
    %228 = arith.mulf %227, %226 : vector<2x256xf32>
    %229 = arith.addf %223, %228 : vector<2x256xf32>
    %c1_74 = arith.constant 1 : index
    %c2_75 = arith.constant 2 : index
    %230 = memref.load %arg3[%c1_74, %c2_75] : memref<8x4xf32, #tpu.memory_space<smem>>
    %231 = vector.extract_strided_slice %1 {offsets = [0, 2, 0], sizes = [2, 1, 256], strides = [1, 1, 1]} : vector<2x3x256xf32> to vector<2x1x256xf32>
    %232 = vector.shape_cast %231 : vector<2x1x256xf32> to vector<2x256xf32>
    %233 = vector.broadcast %230 : f32 to vector<2x256xf32>
    %234 = arith.mulf %233, %232 : vector<2x256xf32>
    %235 = arith.addf %229, %234 : vector<2x256xf32>
    %236 = vector.shape_cast %235 : vector<2x256xf32> to vector<2x1x256xf32>
    %c1_76 = arith.constant 1 : index
    %c3_77 = arith.constant 3 : index
    %237 = memref.load %arg3[%c1_76, %c3_77] : memref<8x4xf32, #tpu.memory_space<smem>>
    %238 = vector.broadcast %237 : f32 to vector<2x4x256xf32>
    %239 = arith.mulf %238, %56 : vector<2x4x256xf32>
    %240 = vector.broadcast %236 : vector<2x1x256xf32> to vector<2x4x256xf32>
    %241 = arith.addf %240, %239 : vector<2x4x256xf32>
    %cst_78 = arith.constant 0.000000e+00 : f32
    %242 = vector.broadcast %cst_78 : f32 to vector<2x4x256xf32>
    %243 = arith.maximumf %241, %242 : vector<2x4x256xf32>
    %c1_79 = arith.constant 1 : index
    %244 = memref.load %arg4[%c1_79] : memref<8xf32, #tpu.memory_space<smem>>
    %c1_80 = arith.constant 1 : index
    %c0_81 = arith.constant 0 : index
    %245 = memref.load %arg3[%c1_80, %c0_81] : memref<8x4xf32, #tpu.memory_space<smem>>
    %246 = vector.extract_strided_slice %0 {offsets = [0, 0, 0], sizes = [2, 1, 256], strides = [1, 1, 1]} : vector<2x3x256xf32> to vector<2x1x256xf32>
    %247 = vector.shape_cast %246 : vector<2x1x256xf32> to vector<2x256xf32>
    %248 = vector.broadcast %245 : f32 to vector<2x256xf32>
    %249 = arith.mulf %248, %247 : vector<2x256xf32>
    %250 = vector.broadcast %244 : f32 to vector<2x256xf32>
    %251 = arith.addf %250, %249 : vector<2x256xf32>
    %c1_82 = arith.constant 1 : index
    %c1_83 = arith.constant 1 : index
    %252 = memref.load %arg3[%c1_82, %c1_83] : memref<8x4xf32, #tpu.memory_space<smem>>
    %253 = vector.extract_strided_slice %0 {offsets = [0, 1, 0], sizes = [2, 1, 256], strides = [1, 1, 1]} : vector<2x3x256xf32> to vector<2x1x256xf32>
    %254 = vector.shape_cast %253 : vector<2x1x256xf32> to vector<2x256xf32>
    %255 = vector.broadcast %252 : f32 to vector<2x256xf32>
    %256 = arith.mulf %255, %254 : vector<2x256xf32>
    %257 = arith.addf %251, %256 : vector<2x256xf32>
    %c1_84 = arith.constant 1 : index
    %c2_85 = arith.constant 2 : index
    %258 = memref.load %arg3[%c1_84, %c2_85] : memref<8x4xf32, #tpu.memory_space<smem>>
    %259 = vector.extract_strided_slice %0 {offsets = [0, 2, 0], sizes = [2, 1, 256], strides = [1, 1, 1]} : vector<2x3x256xf32> to vector<2x1x256xf32>
    %260 = vector.shape_cast %259 : vector<2x1x256xf32> to vector<2x256xf32>
    %261 = vector.broadcast %258 : f32 to vector<2x256xf32>
    %262 = arith.mulf %261, %260 : vector<2x256xf32>
    %263 = arith.addf %257, %262 : vector<2x256xf32>
    %264 = vector.shape_cast %263 : vector<2x256xf32> to vector<2x1x256xf32>
    %c1_86 = arith.constant 1 : index
    %c3_87 = arith.constant 3 : index
    %265 = memref.load %arg3[%c1_86, %c3_87] : memref<8x4xf32, #tpu.memory_space<smem>>
    %266 = vector.broadcast %265 : f32 to vector<2x4x256xf32>
    %267 = arith.mulf %266, %105 : vector<2x4x256xf32>
    %268 = vector.broadcast %264 : vector<2x1x256xf32> to vector<2x4x256xf32>
    %269 = arith.addf %268, %267 : vector<2x4x256xf32>
    %cst_88 = arith.constant 0.000000e+00 : f32
    %270 = vector.broadcast %cst_88 : f32 to vector<2x4x256xf32>
    %271 = arith.maximumf %269, %270 : vector<2x4x256xf32>
    %c0_89 = arith.constant 0 : index
    %c1_90 = arith.constant 1 : index
    %272 = memref.load %arg5[%c0_89, %c1_90] : memref<3x18xf32, #tpu.memory_space<smem>>
    %273 = vector.broadcast %272 : f32 to vector<2x4x256xf32>
    %274 = arith.mulf %273, %243 : vector<2x4x256xf32>
    %275 = arith.addf %199, %274 : vector<2x4x256xf32>
    %c0_91 = arith.constant 0 : index
    %c9_92 = arith.constant 9 : index
    %276 = memref.load %arg5[%c0_91, %c9_92] : memref<3x18xf32, #tpu.memory_space<smem>>
    %277 = vector.broadcast %276 : f32 to vector<2x4x256xf32>
    %278 = arith.mulf %277, %271 : vector<2x4x256xf32>
    %279 = arith.addf %275, %278 : vector<2x4x256xf32>
    %c1_93 = arith.constant 1 : index
    %c1_94 = arith.constant 1 : index
    %280 = memref.load %arg5[%c1_93, %c1_94] : memref<3x18xf32, #tpu.memory_space<smem>>
    %281 = vector.broadcast %280 : f32 to vector<2x4x256xf32>
    %282 = arith.mulf %281, %243 : vector<2x4x256xf32>
    %283 = arith.addf %207, %282 : vector<2x4x256xf32>
    %c1_95 = arith.constant 1 : index
    %c9_96 = arith.constant 9 : index
    %284 = memref.load %arg5[%c1_95, %c9_96] : memref<3x18xf32, #tpu.memory_space<smem>>
    %285 = vector.broadcast %284 : f32 to vector<2x4x256xf32>
    %286 = arith.mulf %285, %271 : vector<2x4x256xf32>
    %287 = arith.addf %283, %286 : vector<2x4x256xf32>
    %c2_97 = arith.constant 2 : index
    %c1_98 = arith.constant 1 : index
    %288 = memref.load %arg5[%c2_97, %c1_98] : memref<3x18xf32, #tpu.memory_space<smem>>
    %289 = vector.broadcast %288 : f32 to vector<2x4x256xf32>
    %290 = arith.mulf %289, %243 : vector<2x4x256xf32>
    %291 = arith.addf %215, %290 : vector<2x4x256xf32>
    %c2_99 = arith.constant 2 : index
    %c9_100 = arith.constant 9 : index
    %292 = memref.load %arg5[%c2_99, %c9_100] : memref<3x18xf32, #tpu.memory_space<smem>>
    %293 = vector.broadcast %292 : f32 to vector<2x4x256xf32>
    %294 = arith.mulf %293, %271 : vector<2x4x256xf32>
    %295 = arith.addf %291, %294 : vector<2x4x256xf32>
    %c2_101 = arith.constant 2 : index
    %296 = memref.load %arg4[%c2_101] : memref<8xf32, #tpu.memory_space<smem>>
    %c2_102 = arith.constant 2 : index
    %c0_103 = arith.constant 0 : index
    %297 = memref.load %arg3[%c2_102, %c0_103] : memref<8x4xf32, #tpu.memory_space<smem>>
    %298 = vector.extract_strided_slice %1 {offsets = [0, 0, 0], sizes = [2, 1, 256], strides = [1, 1, 1]} : vector<2x3x256xf32> to vector<2x1x256xf32>
    %299 = vector.shape_cast %298 : vector<2x1x256xf32> to vector<2x256xf32>
    %300 = vector.broadcast %297 : f32 to vector<2x256xf32>
    %301 = arith.mulf %300, %299 : vector<2x256xf32>
    %302 = vector.broadcast %296 : f32 to vector<2x256xf32>
    %303 = arith.addf %302, %301 : vector<2x256xf32>
    %c2_104 = arith.constant 2 : index
    %c1_105 = arith.constant 1 : index
    %304 = memref.load %arg3[%c2_104, %c1_105] : memref<8x4xf32, #tpu.memory_space<smem>>
    %305 = vector.extract_strided_slice %1 {offsets = [0, 1, 0], sizes = [2, 1, 256], strides = [1, 1, 1]} : vector<2x3x256xf32> to vector<2x1x256xf32>
    %306 = vector.shape_cast %305 : vector<2x1x256xf32> to vector<2x256xf32>
    %307 = vector.broadcast %304 : f32 to vector<2x256xf32>
    %308 = arith.mulf %307, %306 : vector<2x256xf32>
    %309 = arith.addf %303, %308 : vector<2x256xf32>
    %c2_106 = arith.constant 2 : index
    %c2_107 = arith.constant 2 : index
    %310 = memref.load %arg3[%c2_106, %c2_107] : memref<8x4xf32, #tpu.memory_space<smem>>
    %311 = vector.extract_strided_slice %1 {offsets = [0, 2, 0], sizes = [2, 1, 256], strides = [1, 1, 1]} : vector<2x3x256xf32> to vector<2x1x256xf32>
    %312 = vector.shape_cast %311 : vector<2x1x256xf32> to vector<2x256xf32>
    %313 = vector.broadcast %310 : f32 to vector<2x256xf32>
    %314 = arith.mulf %313, %312 : vector<2x256xf32>
    %315 = arith.addf %309, %314 : vector<2x256xf32>
    %316 = vector.shape_cast %315 : vector<2x256xf32> to vector<2x1x256xf32>
    %c2_108 = arith.constant 2 : index
    %c3_109 = arith.constant 3 : index
    %317 = memref.load %arg3[%c2_108, %c3_109] : memref<8x4xf32, #tpu.memory_space<smem>>
    %318 = vector.broadcast %317 : f32 to vector<2x4x256xf32>
    %319 = arith.mulf %318, %56 : vector<2x4x256xf32>
    %320 = vector.broadcast %316 : vector<2x1x256xf32> to vector<2x4x256xf32>
    %321 = arith.addf %320, %319 : vector<2x4x256xf32>
    %cst_110 = arith.constant 0.000000e+00 : f32
    %322 = vector.broadcast %cst_110 : f32 to vector<2x4x256xf32>
    %323 = arith.maximumf %321, %322 : vector<2x4x256xf32>
    %c2_111 = arith.constant 2 : index
    %324 = memref.load %arg4[%c2_111] : memref<8xf32, #tpu.memory_space<smem>>
    %c2_112 = arith.constant 2 : index
    %c0_113 = arith.constant 0 : index
    %325 = memref.load %arg3[%c2_112, %c0_113] : memref<8x4xf32, #tpu.memory_space<smem>>
    %326 = vector.extract_strided_slice %0 {offsets = [0, 0, 0], sizes = [2, 1, 256], strides = [1, 1, 1]} : vector<2x3x256xf32> to vector<2x1x256xf32>
    %327 = vector.shape_cast %326 : vector<2x1x256xf32> to vector<2x256xf32>
    %328 = vector.broadcast %325 : f32 to vector<2x256xf32>
    %329 = arith.mulf %328, %327 : vector<2x256xf32>
    %330 = vector.broadcast %324 : f32 to vector<2x256xf32>
    %331 = arith.addf %330, %329 : vector<2x256xf32>
    %c2_114 = arith.constant 2 : index
    %c1_115 = arith.constant 1 : index
    %332 = memref.load %arg3[%c2_114, %c1_115] : memref<8x4xf32, #tpu.memory_space<smem>>
    %333 = vector.extract_strided_slice %0 {offsets = [0, 1, 0], sizes = [2, 1, 256], strides = [1, 1, 1]} : vector<2x3x256xf32> to vector<2x1x256xf32>
    %334 = vector.shape_cast %333 : vector<2x1x256xf32> to vector<2x256xf32>
    %335 = vector.broadcast %332 : f32 to vector<2x256xf32>
    %336 = arith.mulf %335, %334 : vector<2x256xf32>
    %337 = arith.addf %331, %336 : vector<2x256xf32>
    %c2_116 = arith.constant 2 : index
    %c2_117 = arith.constant 2 : index
    %338 = memref.load %arg3[%c2_116, %c2_117] : memref<8x4xf32, #tpu.memory_space<smem>>
    %339 = vector.extract_strided_slice %0 {offsets = [0, 2, 0], sizes = [2, 1, 256], strides = [1, 1, 1]} : vector<2x3x256xf32> to vector<2x1x256xf32>
    %340 = vector.shape_cast %339 : vector<2x1x256xf32> to vector<2x256xf32>
    %341 = vector.broadcast %338 : f32 to vector<2x256xf32>
    %342 = arith.mulf %341, %340 : vector<2x256xf32>
    %343 = arith.addf %337, %342 : vector<2x256xf32>
    %344 = vector.shape_cast %343 : vector<2x256xf32> to vector<2x1x256xf32>
    %c2_118 = arith.constant 2 : index
    %c3_119 = arith.constant 3 : index
    %345 = memref.load %arg3[%c2_118, %c3_119] : memref<8x4xf32, #tpu.memory_space<smem>>
    %346 = vector.broadcast %345 : f32 to vector<2x4x256xf32>
    %347 = arith.mulf %346, %105 : vector<2x4x256xf32>
    %348 = vector.broadcast %344 : vector<2x1x256xf32> to vector<2x4x256xf32>
    %349 = arith.addf %348, %347 : vector<2x4x256xf32>
    %cst_120 = arith.constant 0.000000e+00 : f32
    %350 = vector.broadcast %cst_120 : f32 to vector<2x4x256xf32>
    %351 = arith.maximumf %349, %350 : vector<2x4x256xf32>
    %c0_121 = arith.constant 0 : index
    %c2_122 = arith.constant 2 : index
    %352 = memref.load %arg5[%c0_121, %c2_122] : memref<3x18xf32, #tpu.memory_space<smem>>
    %353 = vector.broadcast %352 : f32 to vector<2x4x256xf32>
    %354 = arith.mulf %353, %323 : vector<2x4x256xf32>
    %355 = arith.addf %279, %354 : vector<2x4x256xf32>
    %c0_123 = arith.constant 0 : index
    %c10_124 = arith.constant 10 : index
    %356 = memref.load %arg5[%c0_123, %c10_124] : memref<3x18xf32, #tpu.memory_space<smem>>
    %357 = vector.broadcast %356 : f32 to vector<2x4x256xf32>
    %358 = arith.mulf %357, %351 : vector<2x4x256xf32>
    %359 = arith.addf %355, %358 : vector<2x4x256xf32>
    %c1_125 = arith.constant 1 : index
    %c2_126 = arith.constant 2 : index
    %360 = memref.load %arg5[%c1_125, %c2_126] : memref<3x18xf32, #tpu.memory_space<smem>>
    %361 = vector.broadcast %360 : f32 to vector<2x4x256xf32>
    %362 = arith.mulf %361, %323 : vector<2x4x256xf32>
    %363 = arith.addf %287, %362 : vector<2x4x256xf32>
    %c1_127 = arith.constant 1 : index
    %c10_128 = arith.constant 10 : index
    %364 = memref.load %arg5[%c1_127, %c10_128] : memref<3x18xf32, #tpu.memory_space<smem>>
    %365 = vector.broadcast %364 : f32 to vector<2x4x256xf32>
    %366 = arith.mulf %365, %351 : vector<2x4x256xf32>
    %367 = arith.addf %363, %366 : vector<2x4x256xf32>
    %c2_129 = arith.constant 2 : index
    %c2_130 = arith.constant 2 : index
    %368 = memref.load %arg5[%c2_129, %c2_130] : memref<3x18xf32, #tpu.memory_space<smem>>
    %369 = vector.broadcast %368 : f32 to vector<2x4x256xf32>
    %370 = arith.mulf %369, %323 : vector<2x4x256xf32>
    %371 = arith.addf %295, %370 : vector<2x4x256xf32>
    %c2_131 = arith.constant 2 : index
    %c10_132 = arith.constant 10 : index
    %372 = memref.load %arg5[%c2_131, %c10_132] : memref<3x18xf32, #tpu.memory_space<smem>>
    %373 = vector.broadcast %372 : f32 to vector<2x4x256xf32>
    %374 = arith.mulf %373, %351 : vector<2x4x256xf32>
    %375 = arith.addf %371, %374 : vector<2x4x256xf32>
    %c3_133 = arith.constant 3 : index
    %376 = memref.load %arg4[%c3_133] : memref<8xf32, #tpu.memory_space<smem>>
    %c3_134 = arith.constant 3 : index
    %c0_135 = arith.constant 0 : index
    %377 = memref.load %arg3[%c3_134, %c0_135] : memref<8x4xf32, #tpu.memory_space<smem>>
    %378 = vector.extract_strided_slice %1 {offsets = [0, 0, 0], sizes = [2, 1, 256], strides = [1, 1, 1]} : vector<2x3x256xf32> to vector<2x1x256xf32>
    %379 = vector.shape_cast %378 : vector<2x1x256xf32> to vector<2x256xf32>
    %380 = vector.broadcast %377 : f32 to vector<2x256xf32>
    %381 = arith.mulf %380, %379 : vector<2x256xf32>
    %382 = vector.broadcast %376 : f32 to vector<2x256xf32>
    %383 = arith.addf %382, %381 : vector<2x256xf32>
    %c3_136 = arith.constant 3 : index
    %c1_137 = arith.constant 1 : index
    %384 = memref.load %arg3[%c3_136, %c1_137] : memref<8x4xf32, #tpu.memory_space<smem>>
    %385 = vector.extract_strided_slice %1 {offsets = [0, 1, 0], sizes = [2, 1, 256], strides = [1, 1, 1]} : vector<2x3x256xf32> to vector<2x1x256xf32>
    %386 = vector.shape_cast %385 : vector<2x1x256xf32> to vector<2x256xf32>
    %387 = vector.broadcast %384 : f32 to vector<2x256xf32>
    %388 = arith.mulf %387, %386 : vector<2x256xf32>
    %389 = arith.addf %383, %388 : vector<2x256xf32>
    %c3_138 = arith.constant 3 : index
    %c2_139 = arith.constant 2 : index
    %390 = memref.load %arg3[%c3_138, %c2_139] : memref<8x4xf32, #tpu.memory_space<smem>>
    %391 = vector.extract_strided_slice %1 {offsets = [0, 2, 0], sizes = [2, 1, 256], strides = [1, 1, 1]} : vector<2x3x256xf32> to vector<2x1x256xf32>
    %392 = vector.shape_cast %391 : vector<2x1x256xf32> to vector<2x256xf32>
    %393 = vector.broadcast %390 : f32 to vector<2x256xf32>
    %394 = arith.mulf %393, %392 : vector<2x256xf32>
    %395 = arith.addf %389, %394 : vector<2x256xf32>
    %396 = vector.shape_cast %395 : vector<2x256xf32> to vector<2x1x256xf32>
    %c3_140 = arith.constant 3 : index
    %c3_141 = arith.constant 3 : index
    %397 = memref.load %arg3[%c3_140, %c3_141] : memref<8x4xf32, #tpu.memory_space<smem>>
    %398 = vector.broadcast %397 : f32 to vector<2x4x256xf32>
    %399 = arith.mulf %398, %56 : vector<2x4x256xf32>
    %400 = vector.broadcast %396 : vector<2x1x256xf32> to vector<2x4x256xf32>
    %401 = arith.addf %400, %399 : vector<2x4x256xf32>
    %cst_142 = arith.constant 0.000000e+00 : f32
    %402 = vector.broadcast %cst_142 : f32 to vector<2x4x256xf32>
    %403 = arith.maximumf %401, %402 : vector<2x4x256xf32>
    %c3_143 = arith.constant 3 : index
    %404 = memref.load %arg4[%c3_143] : memref<8xf32, #tpu.memory_space<smem>>
    %c3_144 = arith.constant 3 : index
    %c0_145 = arith.constant 0 : index
    %405 = memref.load %arg3[%c3_144, %c0_145] : memref<8x4xf32, #tpu.memory_space<smem>>
    %406 = vector.extract_strided_slice %0 {offsets = [0, 0, 0], sizes = [2, 1, 256], strides = [1, 1, 1]} : vector<2x3x256xf32> to vector<2x1x256xf32>
    %407 = vector.shape_cast %406 : vector<2x1x256xf32> to vector<2x256xf32>
    %408 = vector.broadcast %405 : f32 to vector<2x256xf32>
    %409 = arith.mulf %408, %407 : vector<2x256xf32>
    %410 = vector.broadcast %404 : f32 to vector<2x256xf32>
    %411 = arith.addf %410, %409 : vector<2x256xf32>
    %c3_146 = arith.constant 3 : index
    %c1_147 = arith.constant 1 : index
    %412 = memref.load %arg3[%c3_146, %c1_147] : memref<8x4xf32, #tpu.memory_space<smem>>
    %413 = vector.extract_strided_slice %0 {offsets = [0, 1, 0], sizes = [2, 1, 256], strides = [1, 1, 1]} : vector<2x3x256xf32> to vector<2x1x256xf32>
    %414 = vector.shape_cast %413 : vector<2x1x256xf32> to vector<2x256xf32>
    %415 = vector.broadcast %412 : f32 to vector<2x256xf32>
    %416 = arith.mulf %415, %414 : vector<2x256xf32>
    %417 = arith.addf %411, %416 : vector<2x256xf32>
    %c3_148 = arith.constant 3 : index
    %c2_149 = arith.constant 2 : index
    %418 = memref.load %arg3[%c3_148, %c2_149] : memref<8x4xf32, #tpu.memory_space<smem>>
    %419 = vector.extract_strided_slice %0 {offsets = [0, 2, 0], sizes = [2, 1, 256], strides = [1, 1, 1]} : vector<2x3x256xf32> to vector<2x1x256xf32>
    %420 = vector.shape_cast %419 : vector<2x1x256xf32> to vector<2x256xf32>
    %421 = vector.broadcast %418 : f32 to vector<2x256xf32>
    %422 = arith.mulf %421, %420 : vector<2x256xf32>
    %423 = arith.addf %417, %422 : vector<2x256xf32>
    %424 = vector.shape_cast %423 : vector<2x256xf32> to vector<2x1x256xf32>
    %c3_150 = arith.constant 3 : index
    %c3_151 = arith.constant 3 : index
    %425 = memref.load %arg3[%c3_150, %c3_151] : memref<8x4xf32, #tpu.memory_space<smem>>
    %426 = vector.broadcast %425 : f32 to vector<2x4x256xf32>
    %427 = arith.mulf %426, %105 : vector<2x4x256xf32>
    %428 = vector.broadcast %424 : vector<2x1x256xf32> to vector<2x4x256xf32>
    %429 = arith.addf %428, %427 : vector<2x4x256xf32>
    %cst_152 = arith.constant 0.000000e+00 : f32
    %430 = vector.broadcast %cst_152 : f32 to vector<2x4x256xf32>
    %431 = arith.maximumf %429, %430 : vector<2x4x256xf32>
    %c0_153 = arith.constant 0 : index
    %c3_154 = arith.constant 3 : index
    %432 = memref.load %arg5[%c0_153, %c3_154] : memref<3x18xf32, #tpu.memory_space<smem>>
    %433 = vector.broadcast %432 : f32 to vector<2x4x256xf32>
    %434 = arith.mulf %433, %403 : vector<2x4x256xf32>
    %435 = arith.addf %359, %434 : vector<2x4x256xf32>
    %c0_155 = arith.constant 0 : index
    %c11 = arith.constant 11 : index
    %436 = memref.load %arg5[%c0_155, %c11] : memref<3x18xf32, #tpu.memory_space<smem>>
    %437 = vector.broadcast %436 : f32 to vector<2x4x256xf32>
    %438 = arith.mulf %437, %431 : vector<2x4x256xf32>
    %439 = arith.addf %435, %438 : vector<2x4x256xf32>
    %c1_156 = arith.constant 1 : index
    %c3_157 = arith.constant 3 : index
    %440 = memref.load %arg5[%c1_156, %c3_157] : memref<3x18xf32, #tpu.memory_space<smem>>
    %441 = vector.broadcast %440 : f32 to vector<2x4x256xf32>
    %442 = arith.mulf %441, %403 : vector<2x4x256xf32>
    %443 = arith.addf %367, %442 : vector<2x4x256xf32>
    %c1_158 = arith.constant 1 : index
    %c11_159 = arith.constant 11 : index
    %444 = memref.load %arg5[%c1_158, %c11_159] : memref<3x18xf32, #tpu.memory_space<smem>>
    %445 = vector.broadcast %444 : f32 to vector<2x4x256xf32>
    %446 = arith.mulf %445, %431 : vector<2x4x256xf32>
    %447 = arith.addf %443, %446 : vector<2x4x256xf32>
    %c2_160 = arith.constant 2 : index
    %c3_161 = arith.constant 3 : index
    %448 = memref.load %arg5[%c2_160, %c3_161] : memref<3x18xf32, #tpu.memory_space<smem>>
    %449 = vector.broadcast %448 : f32 to vector<2x4x256xf32>
    %450 = arith.mulf %449, %403 : vector<2x4x256xf32>
    %451 = arith.addf %375, %450 : vector<2x4x256xf32>
    %c2_162 = arith.constant 2 : index
    %c11_163 = arith.constant 11 : index
    %452 = memref.load %arg5[%c2_162, %c11_163] : memref<3x18xf32, #tpu.memory_space<smem>>
    %453 = vector.broadcast %452 : f32 to vector<2x4x256xf32>
    %454 = arith.mulf %453, %431 : vector<2x4x256xf32>
    %455 = arith.addf %451, %454 : vector<2x4x256xf32>
    %c4 = arith.constant 4 : index
    %456 = memref.load %arg4[%c4] : memref<8xf32, #tpu.memory_space<smem>>
    %c4_164 = arith.constant 4 : index
    %c0_165 = arith.constant 0 : index
    %457 = memref.load %arg3[%c4_164, %c0_165] : memref<8x4xf32, #tpu.memory_space<smem>>
    %458 = vector.extract_strided_slice %1 {offsets = [0, 0, 0], sizes = [2, 1, 256], strides = [1, 1, 1]} : vector<2x3x256xf32> to vector<2x1x256xf32>
    %459 = vector.shape_cast %458 : vector<2x1x256xf32> to vector<2x256xf32>
    %460 = vector.broadcast %457 : f32 to vector<2x256xf32>
    %461 = arith.mulf %460, %459 : vector<2x256xf32>
    %462 = vector.broadcast %456 : f32 to vector<2x256xf32>
    %463 = arith.addf %462, %461 : vector<2x256xf32>
    %c4_166 = arith.constant 4 : index
    %c1_167 = arith.constant 1 : index
    %464 = memref.load %arg3[%c4_166, %c1_167] : memref<8x4xf32, #tpu.memory_space<smem>>
    %465 = vector.extract_strided_slice %1 {offsets = [0, 1, 0], sizes = [2, 1, 256], strides = [1, 1, 1]} : vector<2x3x256xf32> to vector<2x1x256xf32>
    %466 = vector.shape_cast %465 : vector<2x1x256xf32> to vector<2x256xf32>
    %467 = vector.broadcast %464 : f32 to vector<2x256xf32>
    %468 = arith.mulf %467, %466 : vector<2x256xf32>
    %469 = arith.addf %463, %468 : vector<2x256xf32>
    %c4_168 = arith.constant 4 : index
    %c2_169 = arith.constant 2 : index
    %470 = memref.load %arg3[%c4_168, %c2_169] : memref<8x4xf32, #tpu.memory_space<smem>>
    %471 = vector.extract_strided_slice %1 {offsets = [0, 2, 0], sizes = [2, 1, 256], strides = [1, 1, 1]} : vector<2x3x256xf32> to vector<2x1x256xf32>
    %472 = vector.shape_cast %471 : vector<2x1x256xf32> to vector<2x256xf32>
    %473 = vector.broadcast %470 : f32 to vector<2x256xf32>
    %474 = arith.mulf %473, %472 : vector<2x256xf32>
    %475 = arith.addf %469, %474 : vector<2x256xf32>
    %476 = vector.shape_cast %475 : vector<2x256xf32> to vector<2x1x256xf32>
    %c4_170 = arith.constant 4 : index
    %c3_171 = arith.constant 3 : index
    %477 = memref.load %arg3[%c4_170, %c3_171] : memref<8x4xf32, #tpu.memory_space<smem>>
    %478 = vector.broadcast %477 : f32 to vector<2x4x256xf32>
    %479 = arith.mulf %478, %56 : vector<2x4x256xf32>
    %480 = vector.broadcast %476 : vector<2x1x256xf32> to vector<2x4x256xf32>
    %481 = arith.addf %480, %479 : vector<2x4x256xf32>
    %cst_172 = arith.constant 0.000000e+00 : f32
    %482 = vector.broadcast %cst_172 : f32 to vector<2x4x256xf32>
    %483 = arith.maximumf %481, %482 : vector<2x4x256xf32>
    %c4_173 = arith.constant 4 : index
    %484 = memref.load %arg4[%c4_173] : memref<8xf32, #tpu.memory_space<smem>>
    %c4_174 = arith.constant 4 : index
    %c0_175 = arith.constant 0 : index
    %485 = memref.load %arg3[%c4_174, %c0_175] : memref<8x4xf32, #tpu.memory_space<smem>>
    %486 = vector.extract_strided_slice %0 {offsets = [0, 0, 0], sizes = [2, 1, 256], strides = [1, 1, 1]} : vector<2x3x256xf32> to vector<2x1x256xf32>
    %487 = vector.shape_cast %486 : vector<2x1x256xf32> to vector<2x256xf32>
    %488 = vector.broadcast %485 : f32 to vector<2x256xf32>
    %489 = arith.mulf %488, %487 : vector<2x256xf32>
    %490 = vector.broadcast %484 : f32 to vector<2x256xf32>
    %491 = arith.addf %490, %489 : vector<2x256xf32>
    %c4_176 = arith.constant 4 : index
    %c1_177 = arith.constant 1 : index
    %492 = memref.load %arg3[%c4_176, %c1_177] : memref<8x4xf32, #tpu.memory_space<smem>>
    %493 = vector.extract_strided_slice %0 {offsets = [0, 1, 0], sizes = [2, 1, 256], strides = [1, 1, 1]} : vector<2x3x256xf32> to vector<2x1x256xf32>
    %494 = vector.shape_cast %493 : vector<2x1x256xf32> to vector<2x256xf32>
    %495 = vector.broadcast %492 : f32 to vector<2x256xf32>
    %496 = arith.mulf %495, %494 : vector<2x256xf32>
    %497 = arith.addf %491, %496 : vector<2x256xf32>
    %c4_178 = arith.constant 4 : index
    %c2_179 = arith.constant 2 : index
    %498 = memref.load %arg3[%c4_178, %c2_179] : memref<8x4xf32, #tpu.memory_space<smem>>
    %499 = vector.extract_strided_slice %0 {offsets = [0, 2, 0], sizes = [2, 1, 256], strides = [1, 1, 1]} : vector<2x3x256xf32> to vector<2x1x256xf32>
    %500 = vector.shape_cast %499 : vector<2x1x256xf32> to vector<2x256xf32>
    %501 = vector.broadcast %498 : f32 to vector<2x256xf32>
    %502 = arith.mulf %501, %500 : vector<2x256xf32>
    %503 = arith.addf %497, %502 : vector<2x256xf32>
    %504 = vector.shape_cast %503 : vector<2x256xf32> to vector<2x1x256xf32>
    %c4_180 = arith.constant 4 : index
    %c3_181 = arith.constant 3 : index
    %505 = memref.load %arg3[%c4_180, %c3_181] : memref<8x4xf32, #tpu.memory_space<smem>>
    %506 = vector.broadcast %505 : f32 to vector<2x4x256xf32>
    %507 = arith.mulf %506, %105 : vector<2x4x256xf32>
    %508 = vector.broadcast %504 : vector<2x1x256xf32> to vector<2x4x256xf32>
    %509 = arith.addf %508, %507 : vector<2x4x256xf32>
    %cst_182 = arith.constant 0.000000e+00 : f32
    %510 = vector.broadcast %cst_182 : f32 to vector<2x4x256xf32>
    %511 = arith.maximumf %509, %510 : vector<2x4x256xf32>
    %c0_183 = arith.constant 0 : index
    %c4_184 = arith.constant 4 : index
    %512 = memref.load %arg5[%c0_183, %c4_184] : memref<3x18xf32, #tpu.memory_space<smem>>
    %513 = vector.broadcast %512 : f32 to vector<2x4x256xf32>
    %514 = arith.mulf %513, %483 : vector<2x4x256xf32>
    %515 = arith.addf %439, %514 : vector<2x4x256xf32>
    %c0_185 = arith.constant 0 : index
    %c12 = arith.constant 12 : index
    %516 = memref.load %arg5[%c0_185, %c12] : memref<3x18xf32, #tpu.memory_space<smem>>
    %517 = vector.broadcast %516 : f32 to vector<2x4x256xf32>
    %518 = arith.mulf %517, %511 : vector<2x4x256xf32>
    %519 = arith.addf %515, %518 : vector<2x4x256xf32>
    %c1_186 = arith.constant 1 : index
    %c4_187 = arith.constant 4 : index
    %520 = memref.load %arg5[%c1_186, %c4_187] : memref<3x18xf32, #tpu.memory_space<smem>>
    %521 = vector.broadcast %520 : f32 to vector<2x4x256xf32>
    %522 = arith.mulf %521, %483 : vector<2x4x256xf32>
    %523 = arith.addf %447, %522 : vector<2x4x256xf32>
    %c1_188 = arith.constant 1 : index
    %c12_189 = arith.constant 12 : index
    %524 = memref.load %arg5[%c1_188, %c12_189] : memref<3x18xf32, #tpu.memory_space<smem>>
    %525 = vector.broadcast %524 : f32 to vector<2x4x256xf32>
    %526 = arith.mulf %525, %511 : vector<2x4x256xf32>
    %527 = arith.addf %523, %526 : vector<2x4x256xf32>
    %c2_190 = arith.constant 2 : index
    %c4_191 = arith.constant 4 : index
    %528 = memref.load %arg5[%c2_190, %c4_191] : memref<3x18xf32, #tpu.memory_space<smem>>
    %529 = vector.broadcast %528 : f32 to vector<2x4x256xf32>
    %530 = arith.mulf %529, %483 : vector<2x4x256xf32>
    %531 = arith.addf %455, %530 : vector<2x4x256xf32>
    %c2_192 = arith.constant 2 : index
    %c12_193 = arith.constant 12 : index
    %532 = memref.load %arg5[%c2_192, %c12_193] : memref<3x18xf32, #tpu.memory_space<smem>>
    %533 = vector.broadcast %532 : f32 to vector<2x4x256xf32>
    %534 = arith.mulf %533, %511 : vector<2x4x256xf32>
    %535 = arith.addf %531, %534 : vector<2x4x256xf32>
    %c5 = arith.constant 5 : index
    %536 = memref.load %arg4[%c5] : memref<8xf32, #tpu.memory_space<smem>>
    %c5_194 = arith.constant 5 : index
    %c0_195 = arith.constant 0 : index
    %537 = memref.load %arg3[%c5_194, %c0_195] : memref<8x4xf32, #tpu.memory_space<smem>>
    %538 = vector.extract_strided_slice %1 {offsets = [0, 0, 0], sizes = [2, 1, 256], strides = [1, 1, 1]} : vector<2x3x256xf32> to vector<2x1x256xf32>
    %539 = vector.shape_cast %538 : vector<2x1x256xf32> to vector<2x256xf32>
    %540 = vector.broadcast %537 : f32 to vector<2x256xf32>
    %541 = arith.mulf %540, %539 : vector<2x256xf32>
    %542 = vector.broadcast %536 : f32 to vector<2x256xf32>
    %543 = arith.addf %542, %541 : vector<2x256xf32>
    %c5_196 = arith.constant 5 : index
    %c1_197 = arith.constant 1 : index
    %544 = memref.load %arg3[%c5_196, %c1_197] : memref<8x4xf32, #tpu.memory_space<smem>>
    %545 = vector.extract_strided_slice %1 {offsets = [0, 1, 0], sizes = [2, 1, 256], strides = [1, 1, 1]} : vector<2x3x256xf32> to vector<2x1x256xf32>
    %546 = vector.shape_cast %545 : vector<2x1x256xf32> to vector<2x256xf32>
    %547 = vector.broadcast %544 : f32 to vector<2x256xf32>
    %548 = arith.mulf %547, %546 : vector<2x256xf32>
    %549 = arith.addf %543, %548 : vector<2x256xf32>
    %c5_198 = arith.constant 5 : index
    %c2_199 = arith.constant 2 : index
    %550 = memref.load %arg3[%c5_198, %c2_199] : memref<8x4xf32, #tpu.memory_space<smem>>
    %551 = vector.extract_strided_slice %1 {offsets = [0, 2, 0], sizes = [2, 1, 256], strides = [1, 1, 1]} : vector<2x3x256xf32> to vector<2x1x256xf32>
    %552 = vector.shape_cast %551 : vector<2x1x256xf32> to vector<2x256xf32>
    %553 = vector.broadcast %550 : f32 to vector<2x256xf32>
    %554 = arith.mulf %553, %552 : vector<2x256xf32>
    %555 = arith.addf %549, %554 : vector<2x256xf32>
    %556 = vector.shape_cast %555 : vector<2x256xf32> to vector<2x1x256xf32>
    %c5_200 = arith.constant 5 : index
    %c3_201 = arith.constant 3 : index
    %557 = memref.load %arg3[%c5_200, %c3_201] : memref<8x4xf32, #tpu.memory_space<smem>>
    %558 = vector.broadcast %557 : f32 to vector<2x4x256xf32>
    %559 = arith.mulf %558, %56 : vector<2x4x256xf32>
    %560 = vector.broadcast %556 : vector<2x1x256xf32> to vector<2x4x256xf32>
    %561 = arith.addf %560, %559 : vector<2x4x256xf32>
    %cst_202 = arith.constant 0.000000e+00 : f32
    %562 = vector.broadcast %cst_202 : f32 to vector<2x4x256xf32>
    %563 = arith.maximumf %561, %562 : vector<2x4x256xf32>
    %c5_203 = arith.constant 5 : index
    %564 = memref.load %arg4[%c5_203] : memref<8xf32, #tpu.memory_space<smem>>
    %c5_204 = arith.constant 5 : index
    %c0_205 = arith.constant 0 : index
    %565 = memref.load %arg3[%c5_204, %c0_205] : memref<8x4xf32, #tpu.memory_space<smem>>
    %566 = vector.extract_strided_slice %0 {offsets = [0, 0, 0], sizes = [2, 1, 256], strides = [1, 1, 1]} : vector<2x3x256xf32> to vector<2x1x256xf32>
    %567 = vector.shape_cast %566 : vector<2x1x256xf32> to vector<2x256xf32>
    %568 = vector.broadcast %565 : f32 to vector<2x256xf32>
    %569 = arith.mulf %568, %567 : vector<2x256xf32>
    %570 = vector.broadcast %564 : f32 to vector<2x256xf32>
    %571 = arith.addf %570, %569 : vector<2x256xf32>
    %c5_206 = arith.constant 5 : index
    %c1_207 = arith.constant 1 : index
    %572 = memref.load %arg3[%c5_206, %c1_207] : memref<8x4xf32, #tpu.memory_space<smem>>
    %573 = vector.extract_strided_slice %0 {offsets = [0, 1, 0], sizes = [2, 1, 256], strides = [1, 1, 1]} : vector<2x3x256xf32> to vector<2x1x256xf32>
    %574 = vector.shape_cast %573 : vector<2x1x256xf32> to vector<2x256xf32>
    %575 = vector.broadcast %572 : f32 to vector<2x256xf32>
    %576 = arith.mulf %575, %574 : vector<2x256xf32>
    %577 = arith.addf %571, %576 : vector<2x256xf32>
    %c5_208 = arith.constant 5 : index
    %c2_209 = arith.constant 2 : index
    %578 = memref.load %arg3[%c5_208, %c2_209] : memref<8x4xf32, #tpu.memory_space<smem>>
    %579 = vector.extract_strided_slice %0 {offsets = [0, 2, 0], sizes = [2, 1, 256], strides = [1, 1, 1]} : vector<2x3x256xf32> to vector<2x1x256xf32>
    %580 = vector.shape_cast %579 : vector<2x1x256xf32> to vector<2x256xf32>
    %581 = vector.broadcast %578 : f32 to vector<2x256xf32>
    %582 = arith.mulf %581, %580 : vector<2x256xf32>
    %583 = arith.addf %577, %582 : vector<2x256xf32>
    %584 = vector.shape_cast %583 : vector<2x256xf32> to vector<2x1x256xf32>
    %c5_210 = arith.constant 5 : index
    %c3_211 = arith.constant 3 : index
    %585 = memref.load %arg3[%c5_210, %c3_211] : memref<8x4xf32, #tpu.memory_space<smem>>
    %586 = vector.broadcast %585 : f32 to vector<2x4x256xf32>
    %587 = arith.mulf %586, %105 : vector<2x4x256xf32>
    %588 = vector.broadcast %584 : vector<2x1x256xf32> to vector<2x4x256xf32>
    %589 = arith.addf %588, %587 : vector<2x4x256xf32>
    %cst_212 = arith.constant 0.000000e+00 : f32
    %590 = vector.broadcast %cst_212 : f32 to vector<2x4x256xf32>
    %591 = arith.maximumf %589, %590 : vector<2x4x256xf32>
    %c0_213 = arith.constant 0 : index
    %c5_214 = arith.constant 5 : index
    %592 = memref.load %arg5[%c0_213, %c5_214] : memref<3x18xf32, #tpu.memory_space<smem>>
    %593 = vector.broadcast %592 : f32 to vector<2x4x256xf32>
    %594 = arith.mulf %593, %563 : vector<2x4x256xf32>
    %595 = arith.addf %519, %594 : vector<2x4x256xf32>
    %c0_215 = arith.constant 0 : index
    %c13 = arith.constant 13 : index
    %596 = memref.load %arg5[%c0_215, %c13] : memref<3x18xf32, #tpu.memory_space<smem>>
    %597 = vector.broadcast %596 : f32 to vector<2x4x256xf32>
    %598 = arith.mulf %597, %591 : vector<2x4x256xf32>
    %599 = arith.addf %595, %598 : vector<2x4x256xf32>
    %c1_216 = arith.constant 1 : index
    %c5_217 = arith.constant 5 : index
    %600 = memref.load %arg5[%c1_216, %c5_217] : memref<3x18xf32, #tpu.memory_space<smem>>
    %601 = vector.broadcast %600 : f32 to vector<2x4x256xf32>
    %602 = arith.mulf %601, %563 : vector<2x4x256xf32>
    %603 = arith.addf %527, %602 : vector<2x4x256xf32>
    %c1_218 = arith.constant 1 : index
    %c13_219 = arith.constant 13 : index
    %604 = memref.load %arg5[%c1_218, %c13_219] : memref<3x18xf32, #tpu.memory_space<smem>>
    %605 = vector.broadcast %604 : f32 to vector<2x4x256xf32>
    %606 = arith.mulf %605, %591 : vector<2x4x256xf32>
    %607 = arith.addf %603, %606 : vector<2x4x256xf32>
    %c2_220 = arith.constant 2 : index
    %c5_221 = arith.constant 5 : index
    %608 = memref.load %arg5[%c2_220, %c5_221] : memref<3x18xf32, #tpu.memory_space<smem>>
    %609 = vector.broadcast %608 : f32 to vector<2x4x256xf32>
    %610 = arith.mulf %609, %563 : vector<2x4x256xf32>
    %611 = arith.addf %535, %610 : vector<2x4x256xf32>
    %c2_222 = arith.constant 2 : index
    %c13_223 = arith.constant 13 : index
    %612 = memref.load %arg5[%c2_222, %c13_223] : memref<3x18xf32, #tpu.memory_space<smem>>
    %613 = vector.broadcast %612 : f32 to vector<2x4x256xf32>
    %614 = arith.mulf %613, %591 : vector<2x4x256xf32>
    %615 = arith.addf %611, %614 : vector<2x4x256xf32>
    %c6_224 = arith.constant 6 : index
    %616 = memref.load %arg4[%c6_224] : memref<8xf32, #tpu.memory_space<smem>>
    %c6_225 = arith.constant 6 : index
    %c0_226 = arith.constant 0 : index
    %617 = memref.load %arg3[%c6_225, %c0_226] : memref<8x4xf32, #tpu.memory_space<smem>>
    %618 = vector.extract_strided_slice %1 {offsets = [0, 0, 0], sizes = [2, 1, 256], strides = [1, 1, 1]} : vector<2x3x256xf32> to vector<2x1x256xf32>
    %619 = vector.shape_cast %618 : vector<2x1x256xf32> to vector<2x256xf32>
    %620 = vector.broadcast %617 : f32 to vector<2x256xf32>
    %621 = arith.mulf %620, %619 : vector<2x256xf32>
    %622 = vector.broadcast %616 : f32 to vector<2x256xf32>
    %623 = arith.addf %622, %621 : vector<2x256xf32>
    %c6_227 = arith.constant 6 : index
    %c1_228 = arith.constant 1 : index
    %624 = memref.load %arg3[%c6_227, %c1_228] : memref<8x4xf32, #tpu.memory_space<smem>>
    %625 = vector.extract_strided_slice %1 {offsets = [0, 1, 0], sizes = [2, 1, 256], strides = [1, 1, 1]} : vector<2x3x256xf32> to vector<2x1x256xf32>
    %626 = vector.shape_cast %625 : vector<2x1x256xf32> to vector<2x256xf32>
    %627 = vector.broadcast %624 : f32 to vector<2x256xf32>
    %628 = arith.mulf %627, %626 : vector<2x256xf32>
    %629 = arith.addf %623, %628 : vector<2x256xf32>
    %c6_229 = arith.constant 6 : index
    %c2_230 = arith.constant 2 : index
    %630 = memref.load %arg3[%c6_229, %c2_230] : memref<8x4xf32, #tpu.memory_space<smem>>
    %631 = vector.extract_strided_slice %1 {offsets = [0, 2, 0], sizes = [2, 1, 256], strides = [1, 1, 1]} : vector<2x3x256xf32> to vector<2x1x256xf32>
    %632 = vector.shape_cast %631 : vector<2x1x256xf32> to vector<2x256xf32>
    %633 = vector.broadcast %630 : f32 to vector<2x256xf32>
    %634 = arith.mulf %633, %632 : vector<2x256xf32>
    %635 = arith.addf %629, %634 : vector<2x256xf32>
    %636 = vector.shape_cast %635 : vector<2x256xf32> to vector<2x1x256xf32>
    %c6_231 = arith.constant 6 : index
    %c3_232 = arith.constant 3 : index
    %637 = memref.load %arg3[%c6_231, %c3_232] : memref<8x4xf32, #tpu.memory_space<smem>>
    %638 = vector.broadcast %637 : f32 to vector<2x4x256xf32>
    %639 = arith.mulf %638, %56 : vector<2x4x256xf32>
    %640 = vector.broadcast %636 : vector<2x1x256xf32> to vector<2x4x256xf32>
    %641 = arith.addf %640, %639 : vector<2x4x256xf32>
    %cst_233 = arith.constant 0.000000e+00 : f32
    %642 = vector.broadcast %cst_233 : f32 to vector<2x4x256xf32>
    %643 = arith.maximumf %641, %642 : vector<2x4x256xf32>
    %c6_234 = arith.constant 6 : index
    %644 = memref.load %arg4[%c6_234] : memref<8xf32, #tpu.memory_space<smem>>
    %c6_235 = arith.constant 6 : index
    %c0_236 = arith.constant 0 : index
    %645 = memref.load %arg3[%c6_235, %c0_236] : memref<8x4xf32, #tpu.memory_space<smem>>
    %646 = vector.extract_strided_slice %0 {offsets = [0, 0, 0], sizes = [2, 1, 256], strides = [1, 1, 1]} : vector<2x3x256xf32> to vector<2x1x256xf32>
    %647 = vector.shape_cast %646 : vector<2x1x256xf32> to vector<2x256xf32>
    %648 = vector.broadcast %645 : f32 to vector<2x256xf32>
    %649 = arith.mulf %648, %647 : vector<2x256xf32>
    %650 = vector.broadcast %644 : f32 to vector<2x256xf32>
    %651 = arith.addf %650, %649 : vector<2x256xf32>
    %c6_237 = arith.constant 6 : index
    %c1_238 = arith.constant 1 : index
    %652 = memref.load %arg3[%c6_237, %c1_238] : memref<8x4xf32, #tpu.memory_space<smem>>
    %653 = vector.extract_strided_slice %0 {offsets = [0, 1, 0], sizes = [2, 1, 256], strides = [1, 1, 1]} : vector<2x3x256xf32> to vector<2x1x256xf32>
    %654 = vector.shape_cast %653 : vector<2x1x256xf32> to vector<2x256xf32>
    %655 = vector.broadcast %652 : f32 to vector<2x256xf32>
    %656 = arith.mulf %655, %654 : vector<2x256xf32>
    %657 = arith.addf %651, %656 : vector<2x256xf32>
    %c6_239 = arith.constant 6 : index
    %c2_240 = arith.constant 2 : index
    %658 = memref.load %arg3[%c6_239, %c2_240] : memref<8x4xf32, #tpu.memory_space<smem>>
    %659 = vector.extract_strided_slice %0 {offsets = [0, 2, 0], sizes = [2, 1, 256], strides = [1, 1, 1]} : vector<2x3x256xf32> to vector<2x1x256xf32>
    %660 = vector.shape_cast %659 : vector<2x1x256xf32> to vector<2x256xf32>
    %661 = vector.broadcast %658 : f32 to vector<2x256xf32>
    %662 = arith.mulf %661, %660 : vector<2x256xf32>
    %663 = arith.addf %657, %662 : vector<2x256xf32>
    %664 = vector.shape_cast %663 : vector<2x256xf32> to vector<2x1x256xf32>
    %c6_241 = arith.constant 6 : index
    %c3_242 = arith.constant 3 : index
    %665 = memref.load %arg3[%c6_241, %c3_242] : memref<8x4xf32, #tpu.memory_space<smem>>
    %666 = vector.broadcast %665 : f32 to vector<2x4x256xf32>
    %667 = arith.mulf %666, %105 : vector<2x4x256xf32>
    %668 = vector.broadcast %664 : vector<2x1x256xf32> to vector<2x4x256xf32>
    %669 = arith.addf %668, %667 : vector<2x4x256xf32>
    %cst_243 = arith.constant 0.000000e+00 : f32
    %670 = vector.broadcast %cst_243 : f32 to vector<2x4x256xf32>
    %671 = arith.maximumf %669, %670 : vector<2x4x256xf32>
    %c0_244 = arith.constant 0 : index
    %c6_245 = arith.constant 6 : index
    %672 = memref.load %arg5[%c0_244, %c6_245] : memref<3x18xf32, #tpu.memory_space<smem>>
    %673 = vector.broadcast %672 : f32 to vector<2x4x256xf32>
    %674 = arith.mulf %673, %643 : vector<2x4x256xf32>
    %675 = arith.addf %599, %674 : vector<2x4x256xf32>
    %c0_246 = arith.constant 0 : index
    %c14 = arith.constant 14 : index
    %676 = memref.load %arg5[%c0_246, %c14] : memref<3x18xf32, #tpu.memory_space<smem>>
    %677 = vector.broadcast %676 : f32 to vector<2x4x256xf32>
    %678 = arith.mulf %677, %671 : vector<2x4x256xf32>
    %679 = arith.addf %675, %678 : vector<2x4x256xf32>
    %c1_247 = arith.constant 1 : index
    %c6_248 = arith.constant 6 : index
    %680 = memref.load %arg5[%c1_247, %c6_248] : memref<3x18xf32, #tpu.memory_space<smem>>
    %681 = vector.broadcast %680 : f32 to vector<2x4x256xf32>
    %682 = arith.mulf %681, %643 : vector<2x4x256xf32>
    %683 = arith.addf %607, %682 : vector<2x4x256xf32>
    %c1_249 = arith.constant 1 : index
    %c14_250 = arith.constant 14 : index
    %684 = memref.load %arg5[%c1_249, %c14_250] : memref<3x18xf32, #tpu.memory_space<smem>>
    %685 = vector.broadcast %684 : f32 to vector<2x4x256xf32>
    %686 = arith.mulf %685, %671 : vector<2x4x256xf32>
    %687 = arith.addf %683, %686 : vector<2x4x256xf32>
    %c2_251 = arith.constant 2 : index
    %c6_252 = arith.constant 6 : index
    %688 = memref.load %arg5[%c2_251, %c6_252] : memref<3x18xf32, #tpu.memory_space<smem>>
    %689 = vector.broadcast %688 : f32 to vector<2x4x256xf32>
    %690 = arith.mulf %689, %643 : vector<2x4x256xf32>
    %691 = arith.addf %615, %690 : vector<2x4x256xf32>
    %c2_253 = arith.constant 2 : index
    %c14_254 = arith.constant 14 : index
    %692 = memref.load %arg5[%c2_253, %c14_254] : memref<3x18xf32, #tpu.memory_space<smem>>
    %693 = vector.broadcast %692 : f32 to vector<2x4x256xf32>
    %694 = arith.mulf %693, %671 : vector<2x4x256xf32>
    %695 = arith.addf %691, %694 : vector<2x4x256xf32>
    %c7 = arith.constant 7 : index
    %696 = memref.load %arg4[%c7] : memref<8xf32, #tpu.memory_space<smem>>
    %c7_255 = arith.constant 7 : index
    %c0_256 = arith.constant 0 : index
    %697 = memref.load %arg3[%c7_255, %c0_256] : memref<8x4xf32, #tpu.memory_space<smem>>
    %698 = vector.extract_strided_slice %1 {offsets = [0, 0, 0], sizes = [2, 1, 256], strides = [1, 1, 1]} : vector<2x3x256xf32> to vector<2x1x256xf32>
    %699 = vector.shape_cast %698 : vector<2x1x256xf32> to vector<2x256xf32>
    %700 = vector.broadcast %697 : f32 to vector<2x256xf32>
    %701 = arith.mulf %700, %699 : vector<2x256xf32>
    %702 = vector.broadcast %696 : f32 to vector<2x256xf32>
    %703 = arith.addf %702, %701 : vector<2x256xf32>
    %c7_257 = arith.constant 7 : index
    %c1_258 = arith.constant 1 : index
    %704 = memref.load %arg3[%c7_257, %c1_258] : memref<8x4xf32, #tpu.memory_space<smem>>
    %705 = vector.extract_strided_slice %1 {offsets = [0, 1, 0], sizes = [2, 1, 256], strides = [1, 1, 1]} : vector<2x3x256xf32> to vector<2x1x256xf32>
    %706 = vector.shape_cast %705 : vector<2x1x256xf32> to vector<2x256xf32>
    %707 = vector.broadcast %704 : f32 to vector<2x256xf32>
    %708 = arith.mulf %707, %706 : vector<2x256xf32>
    %709 = arith.addf %703, %708 : vector<2x256xf32>
    %c7_259 = arith.constant 7 : index
    %c2_260 = arith.constant 2 : index
    %710 = memref.load %arg3[%c7_259, %c2_260] : memref<8x4xf32, #tpu.memory_space<smem>>
    %711 = vector.extract_strided_slice %1 {offsets = [0, 2, 0], sizes = [2, 1, 256], strides = [1, 1, 1]} : vector<2x3x256xf32> to vector<2x1x256xf32>
    %712 = vector.shape_cast %711 : vector<2x1x256xf32> to vector<2x256xf32>
    %713 = vector.broadcast %710 : f32 to vector<2x256xf32>
    %714 = arith.mulf %713, %712 : vector<2x256xf32>
    %715 = arith.addf %709, %714 : vector<2x256xf32>
    %716 = vector.shape_cast %715 : vector<2x256xf32> to vector<2x1x256xf32>
    %c7_261 = arith.constant 7 : index
    %c3_262 = arith.constant 3 : index
    %717 = memref.load %arg3[%c7_261, %c3_262] : memref<8x4xf32, #tpu.memory_space<smem>>
    %718 = vector.broadcast %717 : f32 to vector<2x4x256xf32>
    %719 = arith.mulf %718, %56 : vector<2x4x256xf32>
    %720 = vector.broadcast %716 : vector<2x1x256xf32> to vector<2x4x256xf32>
    %721 = arith.addf %720, %719 : vector<2x4x256xf32>
    %cst_263 = arith.constant 0.000000e+00 : f32
    %722 = vector.broadcast %cst_263 : f32 to vector<2x4x256xf32>
    %723 = arith.maximumf %721, %722 : vector<2x4x256xf32>
    %c7_264 = arith.constant 7 : index
    %724 = memref.load %arg4[%c7_264] : memref<8xf32, #tpu.memory_space<smem>>
    %c7_265 = arith.constant 7 : index
    %c0_266 = arith.constant 0 : index
    %725 = memref.load %arg3[%c7_265, %c0_266] : memref<8x4xf32, #tpu.memory_space<smem>>
    %726 = vector.extract_strided_slice %0 {offsets = [0, 0, 0], sizes = [2, 1, 256], strides = [1, 1, 1]} : vector<2x3x256xf32> to vector<2x1x256xf32>
    %727 = vector.shape_cast %726 : vector<2x1x256xf32> to vector<2x256xf32>
    %728 = vector.broadcast %725 : f32 to vector<2x256xf32>
    %729 = arith.mulf %728, %727 : vector<2x256xf32>
    %730 = vector.broadcast %724 : f32 to vector<2x256xf32>
    %731 = arith.addf %730, %729 : vector<2x256xf32>
    %c7_267 = arith.constant 7 : index
    %c1_268 = arith.constant 1 : index
    %732 = memref.load %arg3[%c7_267, %c1_268] : memref<8x4xf32, #tpu.memory_space<smem>>
    %733 = vector.extract_strided_slice %0 {offsets = [0, 1, 0], sizes = [2, 1, 256], strides = [1, 1, 1]} : vector<2x3x256xf32> to vector<2x1x256xf32>
    %734 = vector.shape_cast %733 : vector<2x1x256xf32> to vector<2x256xf32>
    %735 = vector.broadcast %732 : f32 to vector<2x256xf32>
    %736 = arith.mulf %735, %734 : vector<2x256xf32>
    %737 = arith.addf %731, %736 : vector<2x256xf32>
    %c7_269 = arith.constant 7 : index
    %c2_270 = arith.constant 2 : index
    %738 = memref.load %arg3[%c7_269, %c2_270] : memref<8x4xf32, #tpu.memory_space<smem>>
    %739 = vector.extract_strided_slice %0 {offsets = [0, 2, 0], sizes = [2, 1, 256], strides = [1, 1, 1]} : vector<2x3x256xf32> to vector<2x1x256xf32>
    %740 = vector.shape_cast %739 : vector<2x1x256xf32> to vector<2x256xf32>
    %741 = vector.broadcast %738 : f32 to vector<2x256xf32>
    %742 = arith.mulf %741, %740 : vector<2x256xf32>
    %743 = arith.addf %737, %742 : vector<2x256xf32>
    %744 = vector.shape_cast %743 : vector<2x256xf32> to vector<2x1x256xf32>
    %c7_271 = arith.constant 7 : index
    %c3_272 = arith.constant 3 : index
    %745 = memref.load %arg3[%c7_271, %c3_272] : memref<8x4xf32, #tpu.memory_space<smem>>
    %746 = vector.broadcast %745 : f32 to vector<2x4x256xf32>
    %747 = arith.mulf %746, %105 : vector<2x4x256xf32>
    %748 = vector.broadcast %744 : vector<2x1x256xf32> to vector<2x4x256xf32>
    %749 = arith.addf %748, %747 : vector<2x4x256xf32>
    %cst_273 = arith.constant 0.000000e+00 : f32
    %750 = vector.broadcast %cst_273 : f32 to vector<2x4x256xf32>
    %751 = arith.maximumf %749, %750 : vector<2x4x256xf32>
    %c0_274 = arith.constant 0 : index
    %c7_275 = arith.constant 7 : index
    %752 = memref.load %arg5[%c0_274, %c7_275] : memref<3x18xf32, #tpu.memory_space<smem>>
    %753 = vector.broadcast %752 : f32 to vector<2x4x256xf32>
    %754 = arith.mulf %753, %723 : vector<2x4x256xf32>
    %755 = arith.addf %679, %754 : vector<2x4x256xf32>
    %c0_276 = arith.constant 0 : index
    %c15 = arith.constant 15 : index
    %756 = memref.load %arg5[%c0_276, %c15] : memref<3x18xf32, #tpu.memory_space<smem>>
    %757 = vector.broadcast %756 : f32 to vector<2x4x256xf32>
    %758 = arith.mulf %757, %751 : vector<2x4x256xf32>
    %759 = arith.addf %755, %758 : vector<2x4x256xf32>
    %c1_277 = arith.constant 1 : index
    %c7_278 = arith.constant 7 : index
    %760 = memref.load %arg5[%c1_277, %c7_278] : memref<3x18xf32, #tpu.memory_space<smem>>
    %761 = vector.broadcast %760 : f32 to vector<2x4x256xf32>
    %762 = arith.mulf %761, %723 : vector<2x4x256xf32>
    %763 = arith.addf %687, %762 : vector<2x4x256xf32>
    %c1_279 = arith.constant 1 : index
    %c15_280 = arith.constant 15 : index
    %764 = memref.load %arg5[%c1_279, %c15_280] : memref<3x18xf32, #tpu.memory_space<smem>>
    %765 = vector.broadcast %764 : f32 to vector<2x4x256xf32>
    %766 = arith.mulf %765, %751 : vector<2x4x256xf32>
    %767 = arith.addf %763, %766 : vector<2x4x256xf32>
    %c2_281 = arith.constant 2 : index
    %c7_282 = arith.constant 7 : index
    %768 = memref.load %arg5[%c2_281, %c7_282] : memref<3x18xf32, #tpu.memory_space<smem>>
    %769 = vector.broadcast %768 : f32 to vector<2x4x256xf32>
    %770 = arith.mulf %769, %723 : vector<2x4x256xf32>
    %771 = arith.addf %695, %770 : vector<2x4x256xf32>
    %c2_283 = arith.constant 2 : index
    %c15_284 = arith.constant 15 : index
    %772 = memref.load %arg5[%c2_283, %c15_284] : memref<3x18xf32, #tpu.memory_space<smem>>
    %773 = vector.broadcast %772 : f32 to vector<2x4x256xf32>
    %774 = arith.mulf %773, %751 : vector<2x4x256xf32>
    %775 = arith.addf %771, %774 : vector<2x4x256xf32>
    %776 = vector.shape_cast %7 : vector<2x4xf32> to vector<2x4x1xf32>
    %777 = arith.mulf %759, %56 : vector<2x4x256xf32>
    %778 = arith.mulf %767, %56 : vector<2x4x256xf32>
    %cst_285 = arith.constant 1.000000e+00 : f32
    %779 = vector.broadcast %cst_285 : f32 to vector<2x4x256xf32>
    %780 = arith.subf %775, %779 : vector<2x4x256xf32>
    %781 = vector.broadcast %776 : vector<2x4x1xf32> to vector<2x4x256xf32>
    %782 = arith.mulf %780, %781 : vector<2x4x256xf32>
    %783 = arith.mulf %782, %56 : vector<2x4x256xf32>
    %cst_286 = arith.constant 1.000000e+00 : f32
    %784 = vector.broadcast %cst_286 : f32 to vector<2x256xf32>
    %cst_287 = arith.constant 0.000000e+00 : f32
    %785 = vector.broadcast %cst_287 : f32 to vector<2x256xf32>
    %cst_288 = arith.constant 0.000000e+00 : f32
    %786 = vector.broadcast %cst_288 : f32 to vector<2x256xf32>
    %cst_289 = arith.constant 0.000000e+00 : f32
    %787 = vector.broadcast %cst_289 : f32 to vector<2x256xf32>
    %788 = vector.extract_strided_slice %56 {offsets = [0, 0, 0], sizes = [2, 1, 256], strides = [1, 1, 1]} : vector<2x4x256xf32> to vector<2x1x256xf32>
    %789 = vector.shape_cast %788 : vector<2x1x256xf32> to vector<2x256xf32>
    %790 = arith.mulf %789, %784 : vector<2x256xf32>
    %791 = vector.extract_strided_slice %777 {offsets = [0, 0, 0], sizes = [2, 1, 256], strides = [1, 1, 1]} : vector<2x4x256xf32> to vector<2x1x256xf32>
    %792 = vector.shape_cast %791 : vector<2x1x256xf32> to vector<2x256xf32>
    %793 = arith.mulf %792, %790 : vector<2x256xf32>
    %794 = arith.addf %785, %793 : vector<2x256xf32>
    %795 = vector.extract_strided_slice %778 {offsets = [0, 0, 0], sizes = [2, 1, 256], strides = [1, 1, 1]} : vector<2x4x256xf32> to vector<2x1x256xf32>
    %796 = vector.shape_cast %795 : vector<2x1x256xf32> to vector<2x256xf32>
    %797 = arith.mulf %796, %790 : vector<2x256xf32>
    %798 = arith.addf %786, %797 : vector<2x256xf32>
    %799 = vector.extract_strided_slice %783 {offsets = [0, 0, 0], sizes = [2, 1, 256], strides = [1, 1, 1]} : vector<2x4x256xf32> to vector<2x1x256xf32>
    %800 = vector.shape_cast %799 : vector<2x1x256xf32> to vector<2x256xf32>
    %801 = arith.mulf %800, %790 : vector<2x256xf32>
    %802 = arith.addf %787, %801 : vector<2x256xf32>
    %cst_290 = arith.constant 1.000000e+00 : f32
    %803 = vector.broadcast %cst_290 : f32 to vector<2x256xf32>
    %804 = arith.subf %803, %789 : vector<2x256xf32>
    %805 = arith.mulf %784, %804 : vector<2x256xf32>
    %806 = vector.extract_strided_slice %56 {offsets = [0, 1, 0], sizes = [2, 1, 256], strides = [1, 1, 1]} : vector<2x4x256xf32> to vector<2x1x256xf32>
    %807 = vector.shape_cast %806 : vector<2x1x256xf32> to vector<2x256xf32>
    %808 = arith.mulf %807, %805 : vector<2x256xf32>
    %809 = vector.extract_strided_slice %777 {offsets = [0, 1, 0], sizes = [2, 1, 256], strides = [1, 1, 1]} : vector<2x4x256xf32> to vector<2x1x256xf32>
    %810 = vector.shape_cast %809 : vector<2x1x256xf32> to vector<2x256xf32>
    %811 = arith.mulf %810, %808 : vector<2x256xf32>
    %812 = arith.addf %794, %811 : vector<2x256xf32>
    %813 = vector.extract_strided_slice %778 {offsets = [0, 1, 0], sizes = [2, 1, 256], strides = [1, 1, 1]} : vector<2x4x256xf32> to vector<2x1x256xf32>
    %814 = vector.shape_cast %813 : vector<2x1x256xf32> to vector<2x256xf32>
    %815 = arith.mulf %814, %808 : vector<2x256xf32>
    %816 = arith.addf %798, %815 : vector<2x256xf32>
    %817 = vector.extract_strided_slice %783 {offsets = [0, 1, 0], sizes = [2, 1, 256], strides = [1, 1, 1]} : vector<2x4x256xf32> to vector<2x1x256xf32>
    %818 = vector.shape_cast %817 : vector<2x1x256xf32> to vector<2x256xf32>
    %819 = arith.mulf %818, %808 : vector<2x256xf32>
    %820 = arith.addf %802, %819 : vector<2x256xf32>
    %cst_291 = arith.constant 1.000000e+00 : f32
    %821 = vector.broadcast %cst_291 : f32 to vector<2x256xf32>
    %822 = arith.subf %821, %807 : vector<2x256xf32>
    %823 = arith.mulf %805, %822 : vector<2x256xf32>
    %824 = vector.extract_strided_slice %56 {offsets = [0, 2, 0], sizes = [2, 1, 256], strides = [1, 1, 1]} : vector<2x4x256xf32> to vector<2x1x256xf32>
    %825 = vector.shape_cast %824 : vector<2x1x256xf32> to vector<2x256xf32>
    %826 = arith.mulf %825, %823 : vector<2x256xf32>
    %827 = vector.extract_strided_slice %777 {offsets = [0, 2, 0], sizes = [2, 1, 256], strides = [1, 1, 1]} : vector<2x4x256xf32> to vector<2x1x256xf32>
    %828 = vector.shape_cast %827 : vector<2x1x256xf32> to vector<2x256xf32>
    %829 = arith.mulf %828, %826 : vector<2x256xf32>
    %830 = arith.addf %812, %829 : vector<2x256xf32>
    %831 = vector.extract_strided_slice %778 {offsets = [0, 2, 0], sizes = [2, 1, 256], strides = [1, 1, 1]} : vector<2x4x256xf32> to vector<2x1x256xf32>
    %832 = vector.shape_cast %831 : vector<2x1x256xf32> to vector<2x256xf32>
    %833 = arith.mulf %832, %826 : vector<2x256xf32>
    %834 = arith.addf %816, %833 : vector<2x256xf32>
    %835 = vector.extract_strided_slice %783 {offsets = [0, 2, 0], sizes = [2, 1, 256], strides = [1, 1, 1]} : vector<2x4x256xf32> to vector<2x1x256xf32>
    %836 = vector.shape_cast %835 : vector<2x1x256xf32> to vector<2x256xf32>
    %837 = arith.mulf %836, %826 : vector<2x256xf32>
    %838 = arith.addf %820, %837 : vector<2x256xf32>
    %cst_292 = arith.constant 1.000000e+00 : f32
    %839 = vector.broadcast %cst_292 : f32 to vector<2x256xf32>
    %840 = arith.subf %839, %825 : vector<2x256xf32>
    %841 = arith.mulf %823, %840 : vector<2x256xf32>
    %842 = vector.extract_strided_slice %56 {offsets = [0, 3, 0], sizes = [2, 1, 256], strides = [1, 1, 1]} : vector<2x4x256xf32> to vector<2x1x256xf32>
    %843 = vector.shape_cast %842 : vector<2x1x256xf32> to vector<2x256xf32>
    %844 = arith.mulf %843, %841 : vector<2x256xf32>
    %845 = vector.extract_strided_slice %777 {offsets = [0, 3, 0], sizes = [2, 1, 256], strides = [1, 1, 1]} : vector<2x4x256xf32> to vector<2x1x256xf32>
    %846 = vector.shape_cast %845 : vector<2x1x256xf32> to vector<2x256xf32>
    %847 = arith.mulf %846, %844 : vector<2x256xf32>
    %848 = arith.addf %830, %847 : vector<2x256xf32>
    %849 = vector.extract_strided_slice %778 {offsets = [0, 3, 0], sizes = [2, 1, 256], strides = [1, 1, 1]} : vector<2x4x256xf32> to vector<2x1x256xf32>
    %850 = vector.shape_cast %849 : vector<2x1x256xf32> to vector<2x256xf32>
    %851 = arith.mulf %850, %844 : vector<2x256xf32>
    %852 = arith.addf %834, %851 : vector<2x256xf32>
    %853 = vector.extract_strided_slice %783 {offsets = [0, 3, 0], sizes = [2, 1, 256], strides = [1, 1, 1]} : vector<2x4x256xf32> to vector<2x1x256xf32>
    %854 = vector.shape_cast %853 : vector<2x1x256xf32> to vector<2x256xf32>
    %855 = arith.mulf %854, %844 : vector<2x256xf32>
    %856 = arith.addf %838, %855 : vector<2x256xf32>
    %cst_293 = arith.constant 1.000000e+00 : f32
    %857 = vector.broadcast %cst_293 : f32 to vector<2x256xf32>
    %858 = arith.subf %857, %843 : vector<2x256xf32>
    %859 = arith.mulf %841, %858 : vector<2x256xf32>
    %cst_294 = arith.constant -1.000000e+00 : f32
    %860 = vector.broadcast %cst_294 : f32 to vector<2x256xf32>
    %861 = arith.mulf %860, %848 : vector<2x256xf32>
    %cst_295 = arith.constant -1.000000e+00 : f32
    %862 = vector.broadcast %cst_295 : f32 to vector<2x256xf32>
    %863 = arith.mulf %862, %852 : vector<2x256xf32>
    %cst_296 = arith.constant -1.000000e+00 : f32
    %864 = vector.broadcast %cst_296 : f32 to vector<2x256xf32>
    %865 = arith.mulf %864, %856 : vector<2x256xf32>
    %866 = vector.shape_cast %861 : vector<2x256xf32> to vector<2x1x256xf32>
    %867 = vector.shape_cast %863 : vector<2x256xf32> to vector<2x1x256xf32>
    %868 = vector.shape_cast %865 : vector<2x256xf32> to vector<2x1x256xf32>
    %869 = tpu.concatenate %866, %867, %868 in 1 : vector<2x1x256xf32>, vector<2x1x256xf32>, vector<2x1x256xf32> -> vector<2x3x256xf32>
    %cst_297 = arith.constant 1.000000e+00 : f32
    %870 = vector.broadcast %cst_297 : f32 to vector<2x256xf32>
    %871 = arith.subf %870, %859 : vector<2x256xf32>
    %872 = vector.shape_cast %871 : vector<2x256xf32> to vector<2x1x256xf32>
    %873 = vector.broadcast %872 : vector<2x1x256xf32> to vector<2x3x256xf32>
    %874 = arith.mulf %1, %873 : vector<2x3x256xf32>
    %875 = vector.broadcast %872 : vector<2x1x256xf32> to vector<2x3x256xf32>
    %876 = arith.mulf %875, %874 : vector<2x3x256xf32>
    %cst_298 = arith.constant 1.000000e+00 : f32
    %877 = vector.broadcast %cst_298 : f32 to vector<2x1x256xf32>
    %878 = arith.subf %877, %872 : vector<2x1x256xf32>
    %879 = vector.broadcast %878 : vector<2x1x256xf32> to vector<2x3x256xf32>
    %880 = arith.mulf %879, %2 : vector<2x3x256xf32>
    %881 = arith.addf %876, %880 : vector<2x3x256xf32>
    %cst_299 = arith.constant 0.000000e+00 : f32
    %882 = vector.broadcast %cst_299 : f32 to vector<2x1x256xf32>
    %883 = tpu.concatenate %881, %872, %869, %882 in 1 : vector<2x3x256xf32>, vector<2x1x256xf32>, vector<2x3x256xf32>, vector<2x1x256xf32> -> vector<2x8x256xf32>
    %c0_300 = arith.constant 0 : index
    %c0_301 = arith.constant 0 : index
    %c0_302 = arith.constant 0 : index
    %884 = vector.load %arg7[%c0_300, %c0_301, %c0_302] : memref<2x8x256xf32, #tpu.memory_space<vmem>>, vector<2x8x256xf32>
    tpu.vector_store %arg7[%c0_300, %c0_301, %c0_302], %883 {strides = array<i32>} : memref<2x8x256xf32, #tpu.memory_space<vmem>>, vector<2x8x256xf32>,
    return
  }
  func.func @transform_0(%arg0: i32) -> (i32, i32, i32) {
    %c0_i32 = arith.constant 0 : i32
    %c0_i32_0 = arith.constant 0 : i32
    %c0_i32_1 = arith.constant 0 : i32
    return %c0_i32, %c0_i32_0, %arg0 : i32, i32, i32
  }
  func.func @transform_1(%arg0: i32) -> (i32, i32) {
    %c0_i32 = arith.constant 0 : i32
    %c0_i32_0 = arith.constant 0 : i32
    %c0_i32_1 = arith.constant 0 : i32
    return %c0_i32, %c0_i32_0 : i32, i32
  }
  func.func @transform_2(%arg0: i32) -> (i32, i32) {
    %c0_i32 = arith.constant 0 : i32
    %c0_i32_0 = arith.constant 0 : i32
    %c0_i32_1 = arith.constant 0 : i32
    return %c0_i32, %c0_i32_0 : i32, i32
  }
  func.func @transform_3(%arg0: i32) -> i32 {
    %c0_i32 = arith.constant 0 : i32
    %c0_i32_0 = arith.constant 0 : i32
    return %c0_i32 : i32
  }
  func.func @transform_4(%arg0: i32) -> (i32, i32) {
    %c0_i32 = arith.constant 0 : i32
    %c0_i32_0 = arith.constant 0 : i32
    %c0_i32_1 = arith.constant 0 : i32
    return %c0_i32, %c0_i32_0 : i32, i32
  }
  func.func @transform_5(%arg0: i32) -> i32 {
    %c0_i32 = arith.constant 0 : i32
    %c0_i32_0 = arith.constant 0 : i32
    return %c0_i32 : i32
  }
  func.func @transform_6(%arg0: i32) -> (i32, i32, i32) {
    %c0_i32 = arith.constant 0 : i32
    %c0_i32_0 = arith.constant 0 : i32
    %c0_i32_1 = arith.constant 0 : i32
    return %c0_i32, %c0_i32_0, %arg0 : i32, i32, i32
  }
}

</mosaic_0001>

<bundles_post_ra>
// kernel: tpu_custom_call.1
= control target key start
LH: loop header
LB: loop body
LE: loop exit
PB: predicated region body
PF: predicated region fallthrough
CT: control target
= control target key end

     0   :  { %11 = vsyncpa [#allocation4], 0  ;;  %s4989_s0 = inlined_call_operand.vmem [shape: f32[2,11,256], index: 0, kind: input, shape index: {}]   ;;  %s4990_s1 = inlined_call_operand.vmem [shape: f32[2,4], index: 1, kind: input, shape index: {}]   ;;  %s4991_s2 = inlined_call_operand.vmem [shape: f32[8,4], index: 2, kind: input, shape index: {}]   ;;  %s4992_s3 = inlined_call_operand.vmem [shape: f32[8], index: 3, kind: input, shape index: {}]   ;;  %s4993_s4 = inlined_call_operand.vmem [shape: f32[3,18], index: 4, kind: input, shape index: {}]   ;;  %s4994_s5 = inlined_call_operand.vmem [shape: f32[3], index: 5, kind: input, shape index: {}]   ;;  %s4995_s6 = inlined_call_operand.hbm [shape: f32[2,8,256], index: 6, kind: output, shape index: {}]  }
   0x1   :  { %12 = vsyncpa [#allocation6], 0 }
   0x2   :  { %13 = vsyncpa [#allocation9], 0  ;;  %s35_s23 = sshll.u32 %s4992_s3, 4  ;;  %s36_s23 = int_to_ptr.vmem [resolvable:$true] %s35_s23 }
   0x3   :  { %14 = vsyncpa [#allocation3], 0  ;;  %s25_s26 = sshll.u32 %s4991_s2, 4  ;;  %s2985_s27 = scalar_lea.vmem %s36_s23, 16  ;;  %s26_s26 = int_to_ptr.vmem [resolvable:$true] %s25_s26 }
   0x4   :  { %p2986_p0 = scmp.ne.s32.totalorder %s36_s23, %s2985_s27  ;;  %p2990_p1 = scmp.lt.s32.totalorder %s36_s23, %s36_s23 }
   0x5   :  { %p2991_p2 = scmp.lt.s32.totalorder %s2985_s27, %s2985_s27 }
   0x7   :  { %p2992_p3 = por %p2991_p2, %p2990_p1 }
   0x9   :  { %p2993_p4 = pnand %p2992_p3, %p2986_p0 }
   0xb   :  { %2996 = shalt.err (!%p2993_p4)
}
   0xc   :  { %s3061_s28 = smov [#allocation5]   ;;  %s2997_s29 = scalar_lea.vmem %s26_s26, 128 }
   0xd   :  { %38 = dma.vmem_to_smem %s36_s23, 16, %s3061_s28, [#allocation6]  }
   0xe   :  { %p2998_p5 = scmp.ne.s32.totalorder %s26_s26, %s2997_s29  ;;  %p3002_p6 = scmp.lt.s32.totalorder %s26_s26, %s26_s26 }
   0xf   :  { %p3003_p7 = scmp.lt.s32.totalorder %s2997_s29, %s2997_s29 }
  0x11   :  { %p3004_p8 = por %p3003_p7, %p3002_p6 }
  0x13   :  { %p3005_p9 = pnand %p3004_p8, %p2998_p5 }
  0x15   :  { %3008 = shalt.err (!%p3005_p9)
}
  0x16   :  { %s3062_s3 = smov [#allocation2]   ;;  %s45_s7 = sshll.u32 %s4993_s4, 4  ;;  %s46_s7 = int_to_ptr.vmem [resolvable:$true] %s45_s7 }
  0x17   :  { %28 = dma.vmem_to_smem %s26_s26, 128, %s3062_s3, [#allocation4]  }
  0x18   :  { %s55_s10 = sshll.u32 %s4994_s5, 4  ;;  %s3009_s11 = scalar_lea.vmem %s46_s7, 64  ;;  %s56_s10 = int_to_ptr.vmem [resolvable:$true] %s55_s10 }
  0x19   :  { %p3010_p10 = scmp.ne.s32.totalorder %s46_s7, %s3009_s11  ;;  %p3014_p11 = scmp.lt.s32.totalorder %s46_s7, %s46_s7 }
  0x1a   :  { %p3015_p12 = scmp.lt.s32.totalorder %s3009_s11, %s3009_s11 }
  0x1c   :  { %p3016_p13 = por %p3015_p12, %p3014_p11 }
  0x1e   :  { %p3017_p0 = pnand %p3016_p13, %p3010_p10 }
  0x20   :  { %3020 = shalt.err (!%p3017_p0)
}
  0x21   :  { %s3063_s12 = smov [#allocation7]   ;;  %s3021_s13 = scalar_lea.vmem %s56_s10, 16 }
  0x22   :  { %48 = dma.vmem_to_smem %s46_s7, 64, %s3063_s12, [#allocation6]  }
  0x23   :  { %p3022_p1 = scmp.ne.s32.totalorder %s56_s10, %s3021_s13  ;;  %p3026_p2 = scmp.lt.s32.totalorder %s56_s10, %s56_s10 }
  0x24   :  { %p3027_p3 = scmp.lt.s32.totalorder %s3021_s13, %s3021_s13 }
  0x26   :  { %p3028_p4 = por %p3027_p3, %p3026_p2 }
  0x28   :  { %p3029_p5 = pnand %p3028_p4, %p3022_p1 }
  0x2a   :  { %3032 = shalt.err (!%p3029_p5)
}
  0x2b   :  { %s3064_s4 = smov [#allocation8]  }
  0x2c   :  { %58 = dma.vmem_to_smem %s56_s10, 16, %s3064_s4, [#allocation9]  }
  0x2d   :  { %3053 = dma.done.wait [#allocation4], 128  }
  0x2e   :  { %3054 = vsyncadd [#allocation4], 4294967168 }
  0x2f   :  { %3055 = dma.done.wait [#allocation6], 80  }
  0x30   :  { %3056 = vsyncadd [#allocation6], 4294967216 }
  0x31   :  { %3057 = dma.done.wait [#allocation9], 16  }
  0x32   :  { %3058 = vsyncadd [#allocation9], 4294967280 }
  0x33   :  { %71 = sfence }
  0x34   :  { %v96_v0 = vld [vmem:[%s4990_s1] sm:$0x3]  ;;  %v3065_v1 = vmov 0   ;;  %v3066_v2 = vmov 2   ;;  %v101_v3 = vlaneseq  ;;  %v3067_v7 = vmov 1   ;;  %s2855_s1 = sld [smem:[#allocation7 + $0x10]] }
  0x35   :  { %2964 = vset.pattern.permute.xlu0 %v3065_v1  ;;  %2966 = vset.pattern.permute.xlu1 %v3066_v2  ;;  %v3068_v8 = vmov 3   ;;  %s2856_s15 = sld [smem:[#allocation7 + $0x11]]  ;;  %v3132_v11 = vld [vmem:[%s4989_s0] sm:$0x38]  ;;  %v3137_v12 = vld [vmem:[%s4989_s0 + $0x8] sm:$0x38] }
  0x36   :  { %99 = vperm.xlu0 %2964, %v96_v0   ;;  %139 = vperm.xlu1 %2966, %v96_v0   ;;  %v102_v4 = vshrl.u32 %v101_v3, 7  ;;  %s465_s16 = sld [smem:[#allocation8]]  ;;  %v3142_v13 = vld [vmem:[%s4989_s0] sm:$0x7]  ;;  %v3147_v14 = vld [vmem:[%s4989_s0 + $0x8] sm:$0x7] }
  0x37   :  { %s2857_s17 = sld [smem:[#allocation8 + $0x1]]  ;;  %v3152_v15 = vld [vmem:[%s4989_s0 + $0x20] sm:$0x38]  ;;  %v3157_v16 = vld [vmem:[%s4989_s0 + $0x28] sm:$0x38]  ;;  %vm294_vm6 = vcmask 1040384  }
  0x38   :  { %v3123_v5 = vsub.s32 1, %v102_v4  ;;  %v3125_v6 = vsub.s32 0, %v102_v4  ;;  %s2858_s18 = sld [smem:[#allocation7 + $0x90]]  ;;  %v3177_v28 = vsub.s32 3, %v102_v4  ;;  %v3194_v45 = vld [vmem:[%s4989_s0 + $0x20] sm:$0x7] }
  0x39   :  { %s2859_s19 = sld [smem:[#allocation7 + $0x91]]  ;;  %v3199_v46 = vld [vmem:[%s4989_s0 + $0x28] sm:$0x7]  ;;  %vm299_vm9 = vcmask 1041408   ;;  %vm304_vm10 = vcmask 1042432  }
  0x3a   :  { %5046 = vst [vmem:[#allocation15_spill] sm:$0xff] %v3125_v6  ;;  %2965 = vset.pattern.permute.xlu0 %v3067_v7  ;;  %2967 = vset.pattern.permute.xlu1 %v3068_v8  ;;  %v2317_v9 = vrot.slane %v96_v0, %v3123_v5  ;;  %v2310_v10 = vrot.slane %v96_v0, %v3125_v6  ;;  %s2860_s20 = sld [smem:[#allocation8 + $0x2]]  ;;  %v3159_v17 = vstv %s2855_s1 }
  0x3b   :  { %116 = vperm.xlu0 %2965, %v96_v0   ;;  %162 = vperm.xlu1 %2967, %v96_v0   ;;  %s2861_s21 = sld [smem:[#allocation7 + $0x110]]  ;;  %v3163_v19 = vstv %s2856_s15 }
  0x3c   :  { %s2862_s22 = sld [smem:[#allocation7 + $0x111]]  ;;  %v3161_v18 = vstv %s465_s16 }
  0x3d   :  { %s531_s23 = sld [smem:[#allocation5]]  ;;  %v3165_v20 = vstv %s2857_s17 }
  0x3e   :  { %s532_s24 = sld [smem:[#allocation2]]  ;;  %v3167_v21 = vstv %s2858_s18 }
  0x3f   :  { %2319 = vbcast.lane.b32.xlu0 %v2317_v9, 256  ;;  %2312 = vbcast.lane.b32.xlu1 %v2310_v10, 256  ;;  %s2863_s25 = sld [smem:[#allocation2 + $0x1]]  ;;  %v3169_v22 = vstv %s2859_s19 }
  0x40   :  { %2968 = vset.pattern.permute.xlu0 %v3068_v8  ;;  %s2864_s3 = sld [smem:[#allocation2 + $0x2]]  ;;  %v3173_v24 = vstv %s2860_s20 }
  0x41   :  { %v3171_v23 = vstv %s2861_s21  ;;  %s3183_s13 = sld [smem:[#allocation2 + $0x3]] }
  0x42   :  { %v3175_v25 = vstv %s2862_s22  ;;  %s3205_s15 = sld [smem:[#allocation5 + $0x1]] }
  0x43   :  { %v538_v27 = vstv %s531_s23  ;;  %s3207_s16 = sld [smem:[#allocation2 + $0x80]] }
  0x44   :  { %v533_v26 = vstv %s532_s24  ;;  %s3209_s17 = sld [smem:[#allocation7]] }
  0x45   :  { %v534_v29 = vmul.f32 %v533_v26, %v3132_v11  ;;  %v535_v30 = vmul.f32 %v533_v26, %v3137_v12  ;;  %v536_v31 = vmul.f32 %v533_v26, %v3152_v15  ;;  %v537_v32 = vmul.f32 %v533_v26, %v3157_v16  ;;  %s3211_s18 = sld [smem:[#allocation7 + $0x8]] }
  0x46   :  { %v544_v33 = vstv %s2863_s25  ;;  %v566_v34 = vstv %s2864_s3  ;;  %v617_v35 = vmul.f32 %v533_v26, %v3142_v13  ;;  %v618_v36 = vmul.f32 %v533_v26, %v3147_v14  ;;  %s3218_s19 = sld [smem:[#allocation7 + $0x80]] }
  0x47   :  { %v539_v37 = vadd.f32 %v538_v27, %v534_v29  ;;  %v540_v38 = vadd.f32 %v538_v27, %v535_v30  ;;  %v541_v39 = vadd.f32 %v538_v27, %v536_v31  ;;  %v542_v40 = vadd.f32 %v538_v27, %v537_v32  ;;  %s3228_s20 = sld [smem:[#allocation7 + $0x88]] }
  0x48   :  { %v545_v41 = vmul.f32 %v544_v33, %v3132_v11  ;;  %v546_v42 = vmul.f32 %v544_v33, %v3137_v12  ;;  %v547_v43 = vmul.f32 %v544_v33, %v3152_v15  ;;  %v548_v44 = vmul.f32 %v544_v33, %v3157_v16  ;;  %s3231_s21 = sld [smem:[#allocation7 + $0x100]] }
  0x49   :  { %v567_v47 = vmul.f32 %v566_v34, %v3132_v11  ;;  %v568_v48 = vmul.f32 %v566_v34, %v3137_v12  ;;  %v569_v49 = vmul.f32 %v566_v34, %v3152_v15  ;;  %v570_v50 = vmul.f32 %v566_v34, %v3157_v16  ;;  %s3241_s22 = sld [smem:[#allocation7 + $0x108]] }
  0x4a   :  { %v553_v51 = vrot.slane %v545_v41, 1  ;;  %v554_v52 = vrot.slane %v546_v42, 1  ;;  %v555_v53 = vrot.slane %v547_v43, 1  ;;  %v556_v54 = vrot.slane %v548_v44, 1  ;;  %s3250_s23 = sld [smem:[#allocation2 + $0x81]] }
  0x4b   :  { %v575_v55 = vrot.slane %v567_v47, 2  ;;  %v576_v56 = vrot.slane %v568_v48, 2  ;;  %v577_v57 = vrot.slane %v569_v49, 2  ;;  %v578_v58 = vrot.slane %v570_v50, 2  ;;  %s3255_s24 = sld [smem:[#allocation2 + $0x82]] }
  0x4c   :  { %v561_v59 = vadd.f32 %v553_v51, %v539_v37  ;;  %v562_v60 = vadd.f32 %v554_v52, %v540_v38  ;;  %v563_v61 = vadd.f32 %v555_v53, %v541_v39  ;;  %v564_v62 = vadd.f32 %v556_v54, %v542_v40  ;;  %s3291_s25 = sld [smem:[#allocation2 + $0x83]] }
  0x4d   :  { %v3214_v63 = vstv %s3183_s13  ;;  %v619_v0 = vmul.f32 %v533_v26, %v3194_v45  ;;  %v620_v1 = vmul.f32 %v533_v26, %v3199_v46  ;;  %v621_v2 = vadd.f32 %v617_v35, %v538_v27  ;;  %s3305_s26 = sld [smem:[#allocation2 + $0x100]] }
  0x4e   :  { %v3220_v3 = vadd.f32 %v575_v55, %v561_v59  ;;  %v3222_v4 = vadd.f32 %v576_v56, %v562_v60  ;;  %v3224_v7 = vadd.f32 %v577_v57, %v563_v61  ;;  %v3226_v8 = vadd.f32 %v578_v58, %v564_v62  ;;  %s3308_s27 = sld [smem:[#allocation7 + $0x1]] }
  0x4f   :  { %v622_v9 = vadd.f32 %v618_v36, %v538_v27  ;;  %v623_v10 = vadd.f32 %v619_v0, %v538_v27  ;;  %v624_v29 = vadd.f32 %v620_v1, %v538_v27  ;;  %v625_v30 = vmul.f32 %v544_v33, %v3142_v13  ;;  %s3310_s28 = sld [smem:[#allocation7 + $0x9]] }
  0x50   :  { %v626_v27 = vmul.f32 %v544_v33, %v3147_v14  ;;  %v627_v36 = vmul.f32 %v544_v33, %v3194_v45  ;;  %v628_v37 = vmul.f32 %v544_v33, %v3199_v46  ;;  %v645_v39 = vmul.f32 %v566_v34, %v3142_v13  ;;  %s3317_s29 = sld [smem:[#allocation7 + $0x81]] }
  0x51   :  { %v633_v38 = vrot.slane %v625_v30, 1  ;;  %v646_v40 = vmul.f32 %v566_v34, %v3147_v14  ;;  %v647_v41 = vmul.f32 %v566_v34, %v3194_v45  ;;  %v648_v42 = vmul.f32 %v566_v34, %v3199_v46  ;;  %s3326_s3 = sld [smem:[#allocation7 + $0x89]] }
  0x52   :  { %v634_v43 = vrot.slane %v626_v27, 1  ;;  %v635_v44 = vrot.slane %v627_v36, 1  ;;  %v636_v47 = vrot.slane %v628_v37, 1  ;;  %v653_v33 = vrot.slane %v645_v39, 2  ;;  %s3331_s2 = sld [smem:[#allocation7 + $0x101]] }
  0x53   :  { %v641_v48 = vadd.f32 %v633_v38, %v621_v2  ;;  %v654_v49 = vrot.slane %v646_v40, 2  ;;  %v655_v50 = vrot.slane %v647_v41, 2  ;;  %v656_v51 = vrot.slane %v648_v42, 2  ;;  %s3339_s30 = sld [smem:[#allocation7 + $0x109]] }
  0x54   :  { %v642_v52 = vadd.f32 %v634_v43, %v622_v9  ;;  %v643_v53 = vadd.f32 %v635_v44, %v623_v10  ;;  %v644_v34 = vadd.f32 %v636_v47, %v624_v29  ;;  %v3253_v54 = vstv %s3209_s17  ;;  %s3345_s7 = sld [smem:[#allocation5 + $0x2]] }
  0x55   :  { %v3257_v55 = vadd.f32 %v653_v33, %v641_v48  ;;  %v3260_v56 = vstv %s3211_s18  ;;  %v3263_v57 = vstv %s3218_s19  ;;  %v3266_v58 = vstv %s3228_s20  ;;  %s3351_s8 = sld [smem:[#allocation2 + $0x101]] }
  0x56   :  { %v3268_v59 = vadd.f32 %v654_v49, %v642_v52  ;;  %v3270_v60 = vadd.f32 %v655_v50, %v643_v53  ;;  %v3272_v61 = vadd.f32 %v656_v51, %v644_v34  ;;  %v3275_v62 = vstv %s3231_s21  ;;  %s3355_s9 = sld [smem:[#allocation2 + $0x102]] }
  0x57   :  { %v3280_v1 = vstv %s3241_s22  ;;  %v755_v2 = vstv %s3207_s16  ;;  %v760_v9 = vstv %s3205_s15  ;;  %v766_v39 = vstv %s3250_s23  ;;  %s3395_s10 = sld [smem:[#allocation2 + $0x103]] }
  0x58   :  { %v756_v27 = vmul.f32 %v755_v2, %v3132_v11  ;;  %v757_v36 = vmul.f32 %v755_v2, %v3137_v12  ;;  %v758_v37 = vmul.f32 %v755_v2, %v3152_v15  ;;  %v759_v38 = vmul.f32 %v755_v2, %v3157_v16  ;;  %s3407_s11 = sld [smem:[#allocation2 + $0x180]] }
  0x59   :  { %v767_v41 = vmul.f32 %v766_v39, %v3132_v11  ;;  %v768_v42 = vmul.f32 %v766_v39, %v3137_v12  ;;  %v769_v43 = vmul.f32 %v766_v39, %v3152_v15  ;;  %v770_v33 = vmul.f32 %v766_v39, %v3157_v16  ;;  %s3411_s12 = sld [smem:[#allocation2 + $0x181]] }
  0x5a   :  { %v761_v40 = vadd.f32 %v760_v9, %v756_v27  ;;  %v762_v44 = vadd.f32 %v760_v9, %v757_v36  ;;  %v763_v47 = vadd.f32 %v760_v9, %v758_v37  ;;  %v764_v48 = vadd.f32 %v760_v9, %v759_v38  ;;  %s3413_s13 = sld [smem:[#allocation7 + $0x2]] }
  0x5b   :  { %v775_v49 = vrot.slane %v767_v41, 1  ;;  %v776_v50 = vrot.slane %v768_v42, 1  ;;  %v777_v51 = vrot.slane %v769_v43, 1  ;;  %v788_v52 = vstv %s3255_s24  ;;  %s3415_s4 = sld [smem:[#allocation7 + $0xa]] }
  0x5c   :  { %v778_v53 = vrot.slane %v770_v33, 1  ;;  %v789_v34 = vmul.f32 %v788_v52, %v3132_v11  ;;  %v790_v27 = vmul.f32 %v788_v52, %v3137_v12  ;;  %v791_v30 = vmul.f32 %v788_v52, %v3152_v15  ;;  %s3425_s5 = sld [smem:[#allocation7 + $0x82]] }
  0x5d   :  { %v783_v29 = vadd.f32 %v775_v49, %v761_v40  ;;  %v784_v36 = vadd.f32 %v776_v50, %v762_v44  ;;  %v785_v37 = vadd.f32 %v777_v51, %v763_v47  ;;  %v792_v38 = vmul.f32 %v788_v52, %v3157_v16  ;;  %s3433_s14 = sld [smem:[#allocation7 + $0x8a]] }
  0x5e   :  { %v786_v41 = vadd.f32 %v778_v53, %v764_v48  ;;  %v797_v42 = vrot.slane %v789_v34, 2  ;;  %v798_v43 = vrot.slane %v790_v27, 2  ;;  %v799_v33 = vrot.slane %v791_v30, 2  ;;  %s3440_s1 = sld [smem:[#allocation7 + $0x102]] }
  0x5f   :  { %v800_v10 = vrot.slane %v792_v38, 2  ;;  %v3313_v0 = vstv %s3291_s25  ;;  %v839_v35 = vmul.f32 %v755_v2, %v3142_v13  ;;  %v840_v32 = vmul.f32 %v755_v2, %v3147_v14  ;;  %s3446_s15 = sld [smem:[#allocation7 + $0x10a]] }
  0x60   :  { %v3319_v40 = vadd.f32 %v797_v42, %v783_v29  ;;  %v3321_v44 = vadd.f32 %v798_v43, %v784_v36  ;;  %v3323_v47 = vadd.f32 %v799_v33, %v785_v37  ;;  %v841_v48 = vmul.f32 %v755_v2, %v3194_v45  ;;  %s3451_s16 = sld [smem:[#allocation5 + $0x3]] }
  0x61   :  { %v3328_v30 = vadd.f32 %v800_v10, %v786_v41  ;;  %v842_v49 = vmul.f32 %v755_v2, %v3199_v46  ;;  %v843_v50 = vadd.f32 %v839_v35, %v760_v9  ;;  %v844_v51 = vadd.f32 %v840_v32, %v760_v9  ;;  %s3457_s17 = sld [smem:[#allocation2 + $0x182]] }
  0x62   :  { %5047 = vst [vmem:[#allocation16_spill] sm:$0xff] %v3319_v40  ;;  %5048 = vst [vmem:[#allocation17_spill] sm:$0xff] %v3321_v44  ;;  %v845_v27 = vadd.f32 %v841_v48, %v760_v9  ;;  %v847_v32 = vmul.f32 %v766_v39, %v3142_v13  ;;  %v848_v35 = vmul.f32 %v766_v39, %v3147_v14  ;;  %v3358_v26 = vstv %s3308_s27  ;;  %s3460_s18 = sld [smem:[#allocation2 + $0x183]] }
  0x63   :  { %5049 = vst [vmem:[#allocation18_spill] sm:$0xff] %v3323_v47  ;;  %5050 = vst [vmem:[#allocation19_spill] sm:$0xff] %v3328_v30  ;;  %v846_v2 = vadd.f32 %v842_v49, %v760_v9  ;;  %v849_v36 = vmul.f32 %v766_v39, %v3194_v45  ;;  %v850_v37 = vmul.f32 %v766_v39, %v3199_v46  ;;  %v3422_v44 = vstv %s3395_s10  ;;  %s3967_s27 = sld [smem:[#allocation7 + $0x3]] }
  0x64   :  { %v867_v38 = vmul.f32 %v788_v52, %v3142_v13  ;;  %v868_v41 = vmul.f32 %v788_v52, %v3147_v14  ;;  %v855_v42 = vrot.slane %v847_v32, 1  ;;  %v856_v9 = vrot.slane %v848_v35, 1  ;;  %5051 = vst [vmem:[#allocation20_spill] sm:$0xff] %v3358_v26  ;;  %5063 = vst [vmem:[#allocation32_spill] sm:$0xff] %v3422_v44  ;;  %s4055_s10 = sld [smem:[#allocation7 + $0x10b]] }
  0x65   :  { %v869_v43 = vmul.f32 %v788_v52, %v3194_v45  ;;  %v870_v33 = vmul.f32 %v788_v52, %v3199_v46  ;;  %v857_v48 = vrot.slane %v849_v36, 1  ;;  %v858_v39 = vrot.slane %v850_v37, 1  ;;  %s4187_s25 = sld [smem:[#allocation7 + $0x4]] }
  0x66   :  { %v875_v49 = vrot.slane %v867_v38, 2  ;;  %v876_v10 = vrot.slane %v868_v41, 2  ;;  %v863_v34 = vadd.f32 %v855_v42, %v843_v50  ;;  %v864_v53 = vadd.f32 %v856_v9, %v844_v51  ;;  %s4489_s19 = sld [smem:[#allocation7 + $0xe]] }
  0x67   :  { %v877_v29 = vrot.slane %v869_v43, 2  ;;  %v878_v32 = vrot.slane %v870_v33, 2  ;;  %v865_v35 = vadd.f32 %v857_v48, %v845_v27  ;;  %v866_v31 = vadd.f32 %v858_v39, %v846_v2  ;;  %s4497_s20 = sld [smem:[#allocation7 + $0x86]] }
  0x68   :  { %v3361_v52 = vstv %s3310_s28  ;;  %v3363_v30 = vadd.f32 %v875_v49, %v863_v34  ;;  %v3365_v36 = vadd.f32 %v876_v10, %v864_v53  ;;  %v3368_v37 = vstv %s3317_s29  ;;  %s3977_s28 = sld [smem:[#allocation7 + $0xb]] }
  0x69   :  { %5052 = vst [vmem:[#allocation21_spill] sm:$0xff] %v3361_v52  ;;  %5055 = vst [vmem:[#allocation24_spill] sm:$0xff] %v3368_v37  ;;  %v3371_v38 = vstv %s3326_s3  ;;  %v3373_v50 = vadd.f32 %v877_v29, %v865_v35  ;;  %v3375_v51 = vadd.f32 %v878_v32, %v866_v31  ;;  %v3378_v27 = vstv %s3331_s2  ;;  %s4009_s29 = sld [smem:[#allocation7 + $0x83]] }
  0x6a   :  { %5053 = vst [vmem:[#allocation22_spill] sm:$0xff] %v3363_v30  ;;  %5054 = vst [vmem:[#allocation23_spill] sm:$0xff] %v3365_v36  ;;  %v3381_v2 = vstv %s3339_s30  ;;  %v977_v10 = vstv %s3305_s26  ;;  %v982_v41 = vstv %s3345_s7  ;;  %v988_v48 = vstv %s3351_s8  ;;  %s4027_s8 = sld [smem:[#allocation7 + $0x8b]] }
  0x6b   :  { %5056 = vst [vmem:[#allocation25_spill] sm:$0xff] %v3371_v38  ;;  %5057 = vst [vmem:[#allocation26_spill] sm:$0xff] %v3373_v50  ;;  %v978_v31 = vmul.f32 %v977_v10, %v3132_v11  ;;  %v979_v9 = vmul.f32 %v977_v10, %v3137_v12  ;;  %v980_v43 = vmul.f32 %v977_v10, %v3152_v15  ;;  %v1010_v39 = vstv %s3355_s9  ;;  %s4051_s9 = sld [smem:[#allocation7 + $0x103]] }
  0x6c   :  { %5058 = vst [vmem:[#allocation27_spill] sm:$0xff] %v3375_v51  ;;  %5059 = vst [vmem:[#allocation28_spill] sm:$0xff] %v3378_v27  ;;  %v981_v33 = vmul.f32 %v977_v10, %v3157_v16  ;;  %v989_v35 = vmul.f32 %v988_v48, %v3132_v11  ;;  %v990_v42 = vmul.f32 %v988_v48, %v3137_v12  ;;  %s4208_s26 = sld [smem:[#allocation7 + $0xc]] }
  0x6d   :  { %5060 = vst [vmem:[#allocation29_spill] sm:$0xff] %v3381_v2  ;;  %v983_v49 = vadd.f32 %v982_v41, %v978_v31  ;;  %v984_v32 = vadd.f32 %v982_v41, %v979_v9  ;;  %v985_v53 = vadd.f32 %v982_v41, %v980_v43  ;;  %v991_v34 = vmul.f32 %v988_v48, %v3152_v15  ;;  %s4233_s3 = sld [smem:[#allocation2 + $0x280]] }
  0x6e   :  { %v986_v29 = vadd.f32 %v982_v41, %v981_v33  ;;  %v992_v2 = vmul.f32 %v988_v48, %v3157_v16  ;;  %v997_v27 = vrot.slane %v989_v35, 1  ;;  %v998_v38 = vrot.slane %v990_v42, 1  ;;  %s4237_s2 = sld [smem:[#allocation5 + $0x5]] }
  0x6f   :  { %v1011_v37 = vmul.f32 %v1010_v39, %v3132_v11  ;;  %v1012_v52 = vmul.f32 %v1010_v39, %v3137_v12  ;;  %v999_v31 = vrot.slane %v991_v34, 1  ;;  %v1013_v26 = vmul.f32 %v1010_v39, %v3152_v15  ;;  %s4241_s30 = sld [smem:[#allocation7 + $0x10c]] }
  0x70   :  { %v1000_v9 = vrot.slane %v992_v2, 1  ;;  %v1014_v43 = vmul.f32 %v1010_v39, %v3157_v16  ;;  %v1005_v33 = vadd.f32 %v997_v27, %v983_v49  ;;  %v1006_v51 = vadd.f32 %v998_v38, %v984_v32  ;;  %s4245_s7 = sld [smem:[#allocation2 + $0x281]] }
  0x71   :  { %v1019_v50 = vrot.slane %v1011_v37, 2  ;;  %v1020_v35 = vrot.slane %v1012_v52, 2  ;;  %v1007_v42 = vadd.f32 %v999_v31, %v985_v53  ;;  %v1021_v30 = vrot.slane %v1013_v26, 2  ;;  %s4524_s21 = sld [smem:[#allocation2 + $0x380]] }
  0x72   :  { %v1008_v36 = vadd.f32 %v1000_v9, %v986_v29  ;;  %v1022_v47 = vrot.slane %v1014_v43, 2  ;;  %v1061_v40 = vmul.f32 %v977_v10, %v3142_v13  ;;  %v1062_v38 = vmul.f32 %v977_v10, %v3147_v14  ;;  %s4530_s22 = sld [smem:[#allocation7 + $0x8e]] }
  0x73   :  { %v3417_v2 = vadd.f32 %v1019_v50, %v1005_v33  ;;  %v3419_v34 = vadd.f32 %v1020_v35, %v1006_v51  ;;  %v3427_v37 = vadd.f32 %v1021_v30, %v1007_v42  ;;  %v1063_v26 = vmul.f32 %v977_v10, %v3194_v45  ;;  %s4536_s23 = sld [smem:[#allocation7 + $0x106]] }
  0x74   :  { %v3429_v52 = vadd.f32 %v1022_v47, %v1008_v36  ;;  %v1064_v27 = vmul.f32 %v977_v10, %v3199_v46  ;;  %v1065_v53 = vadd.f32 %v1061_v40, %v982_v41  ;;  %v1066_v36 = vadd.f32 %v1062_v38, %v982_v41  ;;  %s4539_s24 = sld [smem:[#allocation7 + $0x10e]] }
  0x75   :  { %5061 = vst [vmem:[#allocation30_spill] sm:$0xff] %v3417_v2  ;;  %5062 = vst [vmem:[#allocation31_spill] sm:$0xff] %v3419_v34  ;;  %v1067_v29 = vadd.f32 %v1063_v26, %v982_v41  ;;  %v1069_v32 = vmul.f32 %v988_v48, %v3142_v13  ;;  %v1070_v31 = vmul.f32 %v988_v48, %v3147_v14 }
  0x76   :  { %5064 = vst [vmem:[#allocation33_spill] sm:$0xff] %v3427_v37  ;;  %5065 = vst [vmem:[#allocation34_spill] sm:$0xff] %v3429_v52  ;;  %v1068_v49 = vadd.f32 %v1064_v27, %v982_v41  ;;  %v1071_v10 = vmul.f32 %v988_v48, %v3194_v45  ;;  %v1072_v40 = vmul.f32 %v988_v48, %v3199_v46  ;;  %v3463_v37 = vstv %s3413_s13  ;;  %s4075_s13 = sld [smem:[#allocation2 + $0x201]] }
  0x77   :  { %v1089_v9 = vmul.f32 %v1010_v39, %v3142_v13  ;;  %v1090_v43 = vmul.f32 %v1010_v39, %v3147_v14  ;;  %v1091_v33 = vmul.f32 %v1010_v39, %v3194_v45  ;;  %v1077_v41 = vrot.slane %v1069_v32, 1  ;;  %5066 = vst [vmem:[#allocation35_spill] sm:$0xff] %v3463_v37 }
  0x78   :  { %v1078_v35 = vrot.slane %v1070_v31, 1  ;;  %v1079_v42 = vrot.slane %v1071_v10, 1  ;;  %v1092_v38 = vmul.f32 %v1010_v39, %v3199_v46  ;;  %v1080_v48 = vrot.slane %v1072_v40, 1 }
  0x79   :  { %v1097_v26 = vrot.slane %v1089_v9, 2  ;;  %v1098_v27 = vrot.slane %v1090_v43, 2  ;;  %v1099_v30 = vrot.slane %v1091_v33, 2  ;;  %v1085_v47 = vadd.f32 %v1077_v41, %v1065_v53 }
  0x7a   :  { %v1086_v51 = vadd.f32 %v1078_v35, %v1066_v36  ;;  %v1087_v50 = vadd.f32 %v1079_v42, %v1067_v29  ;;  %v1100_v52 = vrot.slane %v1092_v38, 2  ;;  %v1088_v32 = vadd.f32 %v1080_v48, %v1068_v49 }
  0x7b   :  { %v3466_v31 = vstv %s3415_s4  ;;  %v3469_v39 = vstv %s3425_s5  ;;  %v3471_v10 = vadd.f32 %v1097_v26, %v1085_v47  ;;  %v3478_v53 = vstv %s3433_s14  ;;  %s4081_s4 = sld [smem:[#allocation2 + $0x202]] }
  0x7c   :  { %5067 = vst [vmem:[#allocation36_spill] sm:$0xff] %v3466_v31  ;;  %5068 = vst [vmem:[#allocation37_spill] sm:$0xff] %v3469_v39  ;;  %v3473_v40 = vadd.f32 %v1098_v27, %v1086_v51  ;;  %v3475_v9 = vadd.f32 %v1099_v30, %v1087_v50  ;;  %v3480_v36 = vadd.f32 %v1100_v52, %v1088_v32  ;;  %v3483_v29 = vstv %s3440_s1  ;;  %s4375_s5 = sld [smem:[#allocation7 + $0x10d]] }
  0x7d   :  { %5069 = vst [vmem:[#allocation38_spill] sm:$0xff] %v3471_v10  ;;  %5072 = vst [vmem:[#allocation41_spill] sm:$0xff] %v3478_v53  ;;  %v3486_v49 = vstv %s3446_s15  ;;  %v1199_v43 = vstv %s3407_s11  ;;  %v1204_v42 = vstv %s3451_s16  ;;  %v1210_v38 = vstv %s3411_s12  ;;  %s4063_s11 = sld [smem:[#allocation2 + $0x200]] }
  0x7e   :  { %5070 = vst [vmem:[#allocation39_spill] sm:$0xff] %v3473_v40  ;;  %5071 = vst [vmem:[#allocation40_spill] sm:$0xff] %v3475_v9  ;;  %v1200_v30 = vmul.f32 %v1199_v43, %v3132_v11  ;;  %v1201_v33 = vmul.f32 %v1199_v43, %v3137_v12  ;;  %v1202_v41 = vmul.f32 %v1199_v43, %v3152_v15  ;;  %v3504_v48 = vstv %s3457_s17  ;;  %s4067_s12 = sld [smem:[#allocation5 + $0x4]] }
  0x7f   :  { %5073 = vst [vmem:[#allocation42_spill] sm:$0xff] %v3480_v36  ;;  %5074 = vst [vmem:[#allocation43_spill] sm:$0xff] %v3483_v29  ;;  %v1203_v35 = vmul.f32 %v1199_v43, %v3157_v16  ;;  %v3507_v26 = vstv %s3460_s18  ;;  %v1211_v47 = vmul.f32 %v1210_v38, %v3132_v11  ;;  %v1212_v52 = vmul.f32 %v1210_v38, %v3137_v12  ;;  %s4121_s16 = sld [smem:[#allocation2 + $0x203]] }
  0x80   :  { %5075 = vst [vmem:[#allocation44_spill] sm:$0xff] %v3486_v49  ;;  %5076 = vst [vmem:[#allocation45_spill] sm:$0xff] %v3507_v26  ;;  %v1205_v27 = vadd.f32 %v1204_v42, %v1200_v30  ;;  %v1206_v32 = vadd.f32 %v1204_v42, %v1201_v33  ;;  %v1207_v50 = vadd.f32 %v1204_v42, %v1202_v41  ;;  %s4399_s14 = sld [smem:[#allocation2 + $0x300]] }
  0x81   :  { %v1208_v51 = vadd.f32 %v1204_v42, %v1203_v35  ;;  %v1213_v49 = vmul.f32 %v1210_v38, %v3152_v15  ;;  %v1214_v29 = vmul.f32 %v1210_v38, %v3157_v16  ;;  %v1233_v53 = vmul.f32 %v3504_v48, %v3132_v11  ;;  %s4401_s1 = sld [smem:[#allocation5 + $0x6]] }
  0x82   :  { %v1234_v39 = vmul.f32 %v3504_v48, %v3137_v12  ;;  %v1235_v30 = vmul.f32 %v3504_v48, %v3152_v15  ;;  %v1236_v33 = vmul.f32 %v3504_v48, %v3157_v16  ;;  %v1219_v41 = vrot.slane %v1211_v47, 1  ;;  %s4407_s15 = sld [smem:[#allocation2 + $0x301]] }
  0x83   :  { %v1220_v35 = vrot.slane %v1212_v52, 1  ;;  %v1221_v26 = vrot.slane %v1213_v49, 1  ;;  %v1222_v31 = vrot.slane %v1214_v29, 1  ;;  %v1241_v37 = vrot.slane %v1233_v53, 2  ;;  %s2930_s17 = sld [smem:[#allocation2 + $0x303]] }
  0x84   :  { %v1242_v36 = vrot.slane %v1234_v39, 2  ;;  %v1243_v9 = vrot.slane %v1235_v30, 2  ;;  %v1244_v40 = vrot.slane %v1236_v33, 2  ;;  %v1227_v10 = vadd.f32 %v1219_v41, %v1205_v27  ;;  %s4487_s18 = sld [smem:[#allocation7 + $0x6]] }
  0x85   :  { %v1228_v34 = vadd.f32 %v1220_v35, %v1206_v32  ;;  %v1229_v11 = vadd.f32 %v1221_v26, %v1207_v50  ;;  %v1230_v2 = vadd.f32 %v1222_v31, %v1208_v51  ;;  %v1283_v12 = vmul.f32 %v1199_v43, %v3142_v13 }
  0x86   :  { %v1284_v44 = vmul.f32 %v1199_v43, %v3147_v14  ;;  %v1285_v15 = vmul.f32 %v1199_v43, %v3194_v45  ;;  %v1286_v16 = vmul.f32 %v1199_v43, %v3199_v46  ;;  %v3525_v47 = vadd.f32 %v1241_v37, %v1227_v10  ;;  %v2837_v37 = vld [vmem:[%s4989_s0 + $0x12] ss:$8 sm:$0x3] }
  0x87   :  { %v3527_v49 = vadd.f32 %v1242_v36, %v1228_v34  ;;  %v3529_v53 = vadd.f32 %v1243_v9, %v1229_v11  ;;  %v3531_v39 = vadd.f32 %v1244_v40, %v1230_v2  ;;  %v3533_v29 = vadd.f32 %v1283_v12, %v1204_v42  ;;  %v2838_v34 = vld [vmem:[%s4989_s0 + $0x32] ss:$8 sm:$0x3]  ;;  %v2835_v9 = vld [vmem:[%s4989_s0 + $0x11] ss:$8 sm:$0x3] }
  0x88   :  { %5077 = vst [vmem:[#allocation46_spill] sm:$0xff] %v3525_v47  ;;  %v3535_v50 = vadd.f32 %v1284_v44, %v1204_v42  ;;  %v3537_v31 = vadd.f32 %v1285_v15, %v1204_v42  ;;  %v3539_v51 = vadd.f32 %v1286_v16, %v1204_v42  ;;  %v2836_v36 = vld [vmem:[%s4989_s0 + $0x31] ss:$8 sm:$0x3]  ;;  %v3566_v30 = vmul.f32 %v1210_v38, %v3142_v13 }
  0x89   :  { %5078 = vst [vmem:[#allocation47_spill] sm:$0xff] %v3527_v49  ;;  %5079 = vst [vmem:[#allocation48_spill] sm:$0xff] %v3529_v53  ;;  %v3569_v33 = vmul.f32 %v1210_v38, %v3147_v14  ;;  %v3572_v41 = vmul.f32 %v1210_v38, %v3194_v45  ;;  %v3575_v35 = vmul.f32 %v1210_v38, %v3199_v46 }
  0x8a   :  { %5080 = vst [vmem:[#allocation49_spill] sm:$0xff] %v3531_v39  ;;  %5081 = vst [vmem:[#allocation50_spill] sm:$0xff] %v3533_v29  ;;  %v3579_v45 = vmul.f32 %v3504_v48, %v3142_v13 }
  0x8b   :  { %5082 = vst [vmem:[#allocation51_spill] sm:$0xff] %v3535_v50  ;;  %5083 = vst [vmem:[#allocation52_spill] sm:$0xff] %v3537_v31 }
  0x8c   :  { %5084 = vst [vmem:[#allocation53_spill] sm:$0xff] %v3539_v51  ;;  %5085 = vst [vmem:[#allocation54_spill] sm:$0xff] %v3566_v30 }
  0x8d   :  { %5086 = vst [vmem:[#allocation55_spill] sm:$0xff] %v3569_v33  ;;  %5087 = vst [vmem:[#allocation56_spill] sm:$0xff] %v3572_v41 }
  0x8e   :  { %5088 = vst [vmem:[#allocation57_spill] sm:$0xff] %v3575_v35  ;;  %5089 = vst [vmem:[#allocation58_spill] sm:$0xff] %v3579_v45 }
  0xb1   :  { %v100_v52 = vpop.permute.xlu0 %99  ;;  %v140_v26 = vpop.permute.xlu1 %139 }
  0xb2   :  { %v104_v43 = vrot.slane %v100_v52, %v3125_v6  ;;  %v108_v42 = vrot.slane %v100_v52, %v3123_v5  ;;  %v144_v27 = vrot.slane %v140_v26, %v3125_v6  ;;  %v148_v32 = vrot.slane %v140_v26, %v3123_v5 }
  0xb4   :  { %v111_v11 = vsub.f32 %v2837_v37, %v104_v43  ;;  %v112_v12 = vsub.f32 %v2838_v34, %v108_v42  ;;  %v151_v15 = vsub.f32 %v2837_v37, %v144_v27  ;;  %v152_v16 = vsub.f32 %v2838_v34, %v148_v32 }
  0xb5   :  { %v309_v52 = vsub.f32 %v2835_v9, %v104_v43  ;;  %v310_v40 = vsub.f32 %v2836_v36, %v108_v42  ;;  %v323_v10 = vsub.f32 %v2835_v9, %v144_v27  ;;  %v324_v26 = vsub.f32 %v2836_v36, %v148_v32 }
  0xb6   :  { %v117_v44 = vpop.permute.xlu0 %116  ;;  %v163_v2 = vpop.permute.xlu1 %162  ;;  %v113_v51 = vand.u32 2147483647, %v111_v11  ;;  %v114_v31 = vand.u32 2147483647, %v112_v12  ;;  %v153_v50 = vand.u32 2147483647, %v151_v15 }
  0xb7   :  { %v121_v46 = vrot.slane %v117_v44, %v3125_v6  ;;  %v125_v38 = vrot.slane %v117_v44, %v3123_v5  ;;  %v154_v29 = vand.u32 2147483647, %v152_v16  ;;  %v167_v35 = vrot.slane %v163_v2, %v3125_v6 }
  0xb8   :  { %v171_v43 = vrot.slane %v163_v2, %v3123_v5  ;;  %v311_v42 = vand.u32 2147483647, %v309_v52  ;;  %v312_v27 = vand.u32 2147483647, %v310_v40  ;;  %v3585_v32 = vand.u32 2147483647, %v323_v10 }
  0xb9   :  { %v128_v11 = vsub.f32 %v2837_v37, %v121_v46  ;;  %v129_v12 = vsub.f32 %v2838_v34, %v125_v38  ;;  %v174_v15 = vsub.f32 %v2837_v37, %v167_v35  ;;  %v313_v41 = vsub.f32 %v2835_v9, %v121_v46 }
  0xba   :  { %v175_v33 = vsub.f32 %v2838_v34, %v171_v43  ;;  %v314_v13 = vsub.f32 %v2836_v36, %v125_v38  ;;  %v3587_v45 = vand.u32 2147483647, %v324_v26  ;;  %v333_v30 = vsub.f32 %v2835_v9, %v167_v35 }
  0xbb   :  { %v130_v39 = vand.u32 2147483647, %v128_v11  ;;  %v131_v44 = vand.u32 2147483647, %v129_v12  ;;  %v176_v16 = vand.u32 2147483647, %v174_v15  ;;  %v334_v53 = vsub.f32 %v2836_v36, %v171_v43 }
  0xbc   :  { %v177_v49 = vand.u32 2147483647, %v175_v33  ;;  %v315_v47 = vand.u32 2147483647, %v313_v41  ;;  %v316_v2 = vand.u32 2147483647, %v314_v13  ;;  %v3591_v10 = vmul.f32 %v3504_v48, %v3147_v14 }
  0xbd   :  { %vm132_vm0 = vcmp.lt.f32.partialorder %v130_v39, %v113_v51  ;;  %vm133_vm1 = vcmp.lt.f32.partialorder %v131_v44, %v114_v31  ;;  %v3593_v37 = vand.u32 2147483647, %v333_v30  ;;  %v3595_v34 = vand.u32 2147483647, %v334_v53 }
  0xbe   :  { %v5030_v40 = vmov 0.0   ;;  %v136_v52 = vsel %vm132_vm0, %v130_v39, %v113_v51  ;;  %v137_v36 = vsel %vm133_vm1, %v131_v44, %v114_v31  ;;  %vm317_vm4 = vcmp.lt.f32.partialorder %v315_v47, %v311_v42 }
  0xbf   :  { %v134_v9 = vsel %vm132_vm0, 1.0, %v5030_v40  ;;  %v135_v35 = vsel %vm133_vm1, 1.0, %v5030_v40  ;;  %vm155_vm2 = vcmp.lt.f32.partialorder %v153_v50, %v136_v52  ;;  %vm156_vm3 = vcmp.lt.f32.partialorder %v154_v29, %v137_v36 }
  0xc0   :  { %vm318_vm5 = vcmp.lt.f32.partialorder %v316_v2, %v312_v27  ;;  %v157_v33 = vsel %vm155_vm2, 2.0, %v134_v9  ;;  %v158_v14 = vsel %vm156_vm3, 2.0, %v135_v35  ;;  %v159_v41 = vsel %vm155_vm2, %v153_v50, %v136_v52 }
  0xc1   :  { %v160_v26 = vsel %vm156_vm3, %v154_v29, %v137_v36  ;;  %vm178_vm7 = vcmp.lt.f32.partialorder %v176_v16, %v159_v41  ;;  %v319_v53 = vsel %vm317_vm4, 1.0, %v5030_v40  ;;  %v320_v30 = vsel %vm318_vm5, 1.0, %v5030_v40 }
  0xc2   :  { %vm179_vm8 = vcmp.lt.f32.partialorder %v177_v49, %v160_v26  ;;  %v180_v46 = vsel %vm178_vm7, 3.0, %v157_v33  ;;  %v321_v39 = vsel %vm317_vm4, %v315_v47, %v311_v42  ;;  %v322_v31 = vsel %vm318_vm5, %v316_v2, %v312_v27 }
  0xc3   :  { %v181_v38 = vsel %vm179_vm8, 3.0, %v158_v14  ;;  %vm182_vm11 = vcmp.eq.f32.partialorder %v180_v46, 0.0  ;;  %vm188_vm13 = vcmp.eq.f32.partialorder %v180_v46, 1.0  ;;  %vm194_vm15 = vcmp.eq.f32.partialorder %v180_v46, 2.0 }
  0xc4   :  { %vm183_vm12 = vcmp.eq.f32.partialorder %v181_v38, 0.0  ;;  %vm189_vm14 = vcmp.eq.f32.partialorder %v181_v38, 1.0  ;;  %v2839_v50 = vsel %vm182_vm11, 1.0, %v5030_v40  ;;  %v2841_v49 = vsel %vm188_vm13, 1.0, %v5030_v40 }
  0xc5   :  { %v2840_v29 = vsel %vm183_vm12, 1.0, %v5030_v40  ;;  %v2842_v51 = vsel %vm189_vm14, 1.0, %v5030_v40  ;;  %vm195_vm0 = vcmp.eq.f32.partialorder %v181_v38, 2.0  ;;  %vm200_vm1 = vcmp.eq.f32.partialorder %v180_v46, 3.0 }
  0xc6   :  { %vm201_vm2 = vcmp.eq.f32.partialorder %v181_v38, 3.0  ;;  %v2843_v43 = vsel %vm194_vm15, 1.0, %v5030_v40  ;;  %v2844_v47 = vsel %vm195_vm0, 1.0, %v5030_v40  ;;  %v2845_v42 = vsel %vm200_vm1, 1.0, %v5030_v40 }
  0xc7   :  { %v2846_v27 = vsel %vm201_vm2, 1.0, %v5030_v40  ;;  %v211_v11 = vrot.slane %v2839_v50, %v3125_v6  ;;  %v215_v12 = vrot.slane %v2839_v50, %v3123_v5  ;;  %v219_v15 = vrot.slane %v2840_v29, %v3125_v6 }
  0xc8   :  { %v223_v13 = vrot.slane %v2840_v29, %v3123_v5  ;;  %v233_v44 = vrot.slane %v2841_v49, %v3125_v6  ;;  %v237_v16 = vrot.slane %v2841_v49, %v3123_v5  ;;  %v241_v2 = vrot.slane %v2842_v51, %v3125_v6 }
  0xc9   :  { %v245_v9 = vrot.slane %v2842_v51, %v3123_v5  ;;  %v255_v35 = vrot.slane %v2843_v43, %v3125_v6  ;;  %v259_v52 = vrot.slane %v2843_v43, %v3123_v5  ;;  %v263_v36 = vrot.slane %v2844_v47, %v3125_v6 }
  0xca   :  { %v267_v33 = vrot.slane %v2844_v47, %v3123_v5  ;;  %v277_v14 = vrot.slane %v2845_v42, %v3125_v6  ;;  %v281_v41 = vrot.slane %v2845_v42, %v3123_v5  ;;  %v285_v26 = vrot.slane %v2846_v27, %v3125_v6 }
  0xcb   :  { %v289_v46 = vrot.slane %v2846_v27, %v3123_v5  ;;  %v295_v38 = vsel %vm294_vm6, %v211_v11, %v233_v44  ;;  %v296_v50 = vsel %vm294_vm6, %v215_v12, %v237_v16  ;;  %v297_v29 = vsel %vm294_vm6, %v219_v15, %v241_v2 }
  0xcc   :  { %v298_v49 = vsel %vm294_vm6, %v223_v13, %v245_v9  ;;  %v300_v51 = vsel %vm299_vm9, %v295_v38, %v255_v35  ;;  %v301_v43 = vsel %vm299_vm9, %v296_v50, %v259_v52  ;;  %v302_v47 = vsel %vm299_vm9, %v297_v29, %v263_v36 }
  0xcd   :  { %v303_v42 = vsel %vm299_vm9, %v298_v49, %v267_v33  ;;  %v3634_v40 = vsel %vm304_vm10, %v300_v51, %v277_v14  ;;  %v3637_v27 = vsel %vm304_vm10, %v301_v43, %v281_v41  ;;  %v3640_v11 = vsel %vm304_vm10, %v302_v47, %v285_v26 }
  0xce   :  { %v3643_v12 = vsel %vm304_vm10, %v303_v42, %v289_v46  ;;  %vm327_vm3 = vcmp.lt.f32.partialorder %v3585_v32, %v321_v39  ;;  %vm328_vm4 = vcmp.lt.f32.partialorder %v3587_v45, %v322_v31  ;;  %v468_v15 = vmul.f32 %v3159_v17, %v3634_v40 }
  0xcf   :  { %v469_v13 = vmul.f32 %v3159_v17, %v3637_v27  ;;  %v329_v44 = vsel %vm327_vm3, 2.0, %v319_v53  ;;  %v330_v16 = vsel %vm328_vm4, 2.0, %v320_v30  ;;  %v331_v2 = vsel %vm327_vm3, %v3585_v32, %v321_v39 }
  0xd0   :  { %v332_v9 = vsel %vm328_vm4, %v3587_v45, %v322_v31  ;;  %vm337_vm5 = vcmp.lt.f32.partialorder %v3593_v37, %v331_v2  ;;  %v470_v35 = vmul.f32 %v3159_v17, %v3640_v11  ;;  %v471_v52 = vmul.f32 %v3159_v17, %v3643_v12 }
  0xd1   :  { %vm338_vm7 = vcmp.lt.f32.partialorder %v3595_v34, %v332_v9  ;;  %v339_v36 = vsel %vm337_vm5, 3.0, %v329_v44  ;;  %v473_v14 = vadd.f32 %v3161_v18, %v468_v15  ;;  %v474_v53 = vadd.f32 %v3161_v18, %v469_v13 }
  0xd2   :  { %v340_v33 = vsel %vm338_vm7, 3.0, %v330_v16  ;;  %vm341_vm8 = vcmp.eq.f32.partialorder %v339_v36, 0.0  ;;  %vm347_vm12 = vcmp.eq.f32.partialorder %v339_v36, 1.0  ;;  %v5090_v45 = vmov 0.0  }
  0xd3   :  { %vm342_vm11 = vcmp.eq.f32.partialorder %v340_v33, 0.0  ;;  %vm348_vm13 = vcmp.eq.f32.partialorder %v340_v33, 1.0  ;;  %v2847_v32 = vsel %vm341_vm8, 1.0, %v5090_v45  ;;  %v2849_v34 = vsel %vm347_vm12, 1.0, %v5090_v45 }
  0xd4   :  { %v2848_v37 = vsel %vm342_vm11, 1.0, %v5090_v45  ;;  %v2850_v30 = vsel %vm348_vm13, 1.0, %v5090_v45  ;;  %vm353_vm14 = vcmp.eq.f32.partialorder %v339_v36, 2.0  ;;  %vm354_vm15 = vcmp.eq.f32.partialorder %v340_v33, 2.0 }
  0xd5   :  { %vm359_vm0 = vcmp.eq.f32.partialorder %v339_v36, 3.0  ;;  %vm360_vm1 = vcmp.eq.f32.partialorder %v340_v33, 3.0  ;;  %v2851_v17 = vsel %vm353_vm14, 1.0, %v5090_v45  ;;  %v2852_v39 = vsel %vm354_vm15, 1.0, %v5090_v45 }
  0xd6   :  { %v2853_v31 = vsel %vm359_vm0, 1.0, %v5090_v45  ;;  %v2854_v41 = vsel %vm360_vm1, 1.0, %v5090_v45  ;;  %v370_v26 = vrot.slane %v2847_v32, %v3125_v6  ;;  %v374_v46 = vrot.slane %v2847_v32, %v3123_v5 }
  0xd7   :  { %v378_v38 = vrot.slane %v2848_v37, %v3125_v6  ;;  %v382_v50 = vrot.slane %v2848_v37, %v3123_v5  ;;  %v392_v29 = vrot.slane %v2849_v34, %v3125_v6  ;;  %v396_v49 = vrot.slane %v2849_v34, %v3123_v5 }
  0xd8   :  { %v400_v51 = vrot.slane %v2850_v30, %v3125_v6  ;;  %v404_v43 = vrot.slane %v2850_v30, %v3123_v5  ;;  %v414_v47 = vrot.slane %v2851_v17, %v3125_v6  ;;  %v418_v42 = vrot.slane %v2851_v17, %v3123_v5 }
  0xd9   :  { %v422_v15 = vrot.slane %v2852_v39, %v3125_v6  ;;  %v426_v13 = vrot.slane %v2852_v39, %v3123_v5  ;;  %v436_v44 = vrot.slane %v2853_v31, %v3125_v6  ;;  %v440_v16 = vrot.slane %v2853_v31, %v3123_v5 }
  0xda   :  { %v444_v2 = vrot.slane %v2854_v41, %v3125_v6  ;;  %v448_v9 = vrot.slane %v2854_v41, %v3123_v5  ;;  %v453_v36 = vsel %vm294_vm6, %v370_v26, %v392_v29  ;;  %v454_v33 = vsel %vm294_vm6, %v374_v46, %v396_v49 }
  0xdb   :  { %v455_v45 = vsel %vm294_vm6, %v378_v38, %v400_v51  ;;  %v456_v32 = vsel %vm294_vm6, %v382_v50, %v404_v43  ;;  %v457_v37 = vsel %vm299_vm9, %v453_v36, %v414_v47  ;;  %v458_v34 = vsel %vm299_vm9, %v454_v33, %v418_v42 }
  0xdc   :  { %v459_v30 = vsel %vm299_vm9, %v455_v45, %v422_v15  ;;  %v460_v17 = vsel %vm299_vm9, %v456_v32, %v426_v13  ;;  %v3694_v39 = vsel %vm304_vm10, %v457_v37, %v436_v44  ;;  %v3697_v5 = vsel %vm304_vm10, %v458_v34, %v440_v16 }
  0xdd   :  { %v3700_v31 = vsel %vm304_vm10, %v459_v30, %v444_v2  ;;  %v3703_v41 = vsel %vm304_vm10, %v460_v17, %v448_v9  ;;  %v475_v26 = vadd.f32 %v3161_v18, %v470_v35  ;;  %v476_v46 = vadd.f32 %v3161_v18, %v471_v52 }
  0xde   :  { %v479_v38 = vmul.f32 %v3163_v19, %v3694_v39  ;;  %v480_v50 = vmul.f32 %v3163_v19, %v3697_v5  ;;  %v481_v29 = vmul.f32 %v3163_v19, %v3700_v31  ;;  %v482_v49 = vmul.f32 %v3163_v19, %v3703_v41 }
  0xdf   :  { %v490_v51 = vmul.f32 %v3167_v21, %v3634_v40  ;;  %v491_v35 = vmul.f32 %v3167_v21, %v3637_v27  ;;  %v492_v52 = vmul.f32 %v3167_v21, %v3640_v11  ;;  %v493_v47 = vmul.f32 %v3167_v21, %v3643_v12 }
  0xe0   :  { %v483_v43 = vadd.f32 %v479_v38, %v473_v14  ;;  %v484_v18 = vadd.f32 %v480_v50, %v474_v53  ;;  %v485_v42 = vadd.f32 %v481_v29, %v475_v26  ;;  %v486_v15 = vadd.f32 %v482_v49, %v476_v46 }
  0xe1   :  { %v495_v13 = vadd.f32 %v3165_v20, %v490_v51  ;;  %v496_v19 = vadd.f32 %v3165_v20, %v491_v35  ;;  %v497_v44 = vadd.f32 %v3165_v20, %v492_v52  ;;  %v498_v16 = vadd.f32 %v3165_v20, %v493_v47 }
  0xe2   :  { %v501_v14 = vmul.f32 %v3169_v22, %v3694_v39  ;;  %v502_v53 = vmul.f32 %v3169_v22, %v3697_v5  ;;  %v503_v2 = vmul.f32 %v3169_v22, %v3700_v31  ;;  %v504_v21 = vmul.f32 %v3169_v22, %v3703_v41 }
  0xe3   :  { %v512_v9 = vmul.f32 %v3171_v23, %v3634_v40  ;;  %v513_v36 = vmul.f32 %v3171_v23, %v3637_v27  ;;  %v514_v45 = vmul.f32 %v3171_v23, %v3640_v11  ;;  %v515_v32 = vmul.f32 %v3171_v23, %v3643_v12 }
  0xe4   :  { %v505_v33 = vadd.f32 %v501_v14, %v495_v13  ;;  %v506_v20 = vadd.f32 %v502_v53, %v496_v19  ;;  %v507_v37 = vadd.f32 %v503_v2, %v497_v44  ;;  %v508_v34 = vadd.f32 %v504_v21, %v498_v16 }
  0xe5   :  { %v517_v30 = vadd.f32 %v3173_v24, %v512_v9  ;;  %v518_v22 = vadd.f32 %v3173_v24, %v513_v36  ;;  %v519_v17 = vadd.f32 %v3173_v24, %v514_v45  ;;  %v520_v26 = vadd.f32 %v3173_v24, %v515_v32 }
  0xe6   :  { %v523_v46 = vmul.f32 %v3175_v25, %v3694_v39  ;;  %v524_v38 = vmul.f32 %v3175_v25, %v3697_v5  ;;  %v525_v50 = vmul.f32 %v3175_v25, %v3700_v31  ;;  %v526_v23 = vmul.f32 %v3175_v25, %v3703_v41 }
  0xe7   :  { %v589_v29 = vmul.f32 %v3214_v63, %v3634_v40  ;;  %v590_v49 = vmul.f32 %v3214_v63, %v3637_v27  ;;  %v591_v35 = vmul.f32 %v3214_v63, %v3640_v11  ;;  %v592_v52 = vmul.f32 %v3214_v63, %v3643_v12 }
  0xe8   :  { %v527_v51 = vadd.f32 %v523_v46, %v517_v30  ;;  %v528_v24 = vadd.f32 %v524_v38, %v518_v22  ;;  %v529_v47 = vadd.f32 %v525_v50, %v519_v17  ;;  %v530_v13 = vadd.f32 %v526_v23, %v520_v26 }
  0xe9   :  { %v5091_v19 = vrot.slane %v3220_v3, %v3177_v28  ;;  %v5092_v44 = vrot.slane %v3222_v4, %v3177_v28  ;;  %v5093_v14 = vrot.slane %v3224_v7, %v3177_v28  ;;  %v5094_v2 = vrot.slane %v3226_v8, %v3177_v28 }
  0xea   :  { %v665_v9 = vmul.f32 %v3214_v63, %v3694_v39  ;;  %v666_v36 = vmul.f32 %v3214_v63, %v3697_v5  ;;  %v667_v4 = vmul.f32 %v3214_v63, %v3700_v31  ;;  %v668_v32 = vmul.f32 %v3214_v63, %v3703_v41 }
  0xeb   :  { %v609_v25 = vadd.f32 %v5091_v19, %v589_v29  ;;  %v610_v16 = vadd.f32 %v5092_v44, %v590_v49  ;;  %v611_v53 = vadd.f32 %v5093_v14, %v591_v35  ;;  %v612_v21 = vadd.f32 %v5094_v2, %v592_v52 }
  0xec   :  { %v5095_v8 = vrot.slane %v3257_v55, %v3125_v6  ;;  %v5096_v17 = vrot.slane %v3268_v59, %v3125_v6  ;;  %v5097_v46 = vrot.slane %v3270_v60, %v3125_v6  ;;  %v5098_v50 = vrot.slane %v3272_v61, %v3125_v6 }
  0xed   :  { %v613_v3 = vmax.f32 %v609_v25, 0.0  ;;  %v614_v45 = vmax.f32 %v610_v16, 0.0  ;;  %v615_v7 = vmax.f32 %v611_v53, 0.0  ;;  %v616_v30 = vmax.f32 %v612_v21, 0.0 }
  0xee   :  { %v685_v22 = vadd.f32 %v5095_v8, %v665_v9  ;;  %v686_v26 = vadd.f32 %v5096_v17, %v666_v36  ;;  %v687_v38 = vadd.f32 %v5097_v46, %v667_v4  ;;  %v688_v23 = vadd.f32 %v5098_v50, %v668_v32 }
  0xef   :  { %v695_v63 = vmul.f32 %v3253_v54, %v613_v3  ;;  %v696_v29 = vmul.f32 %v3253_v54, %v614_v45  ;;  %v697_v55 = vmul.f32 %v3253_v54, %v615_v7  ;;  %v698_v52 = vmul.f32 %v3253_v54, %v616_v30 }
  0xf0   :  { %v689_v49 = vmax.f32 %v685_v22, 0.0  ;;  %v690_v35 = vmax.f32 %v686_v26, 0.0  ;;  %v691_v59 = vmax.f32 %v687_v38, 0.0  ;;  %v692_v19 = vmax.f32 %v688_v23, 0.0 }
  0xf1   :  { %v699_v25 = vadd.f32 %v695_v63, %v483_v43  ;;  %v700_v44 = vadd.f32 %v696_v29, %v484_v18  ;;  %v701_v60 = vadd.f32 %v697_v55, %v485_v42  ;;  %v702_v16 = vadd.f32 %v698_v52, %v486_v15 }
  0xf2   :  { %v705_v14 = vmul.f32 %v3260_v56, %v689_v49  ;;  %v706_v61 = vmul.f32 %v3260_v56, %v690_v35  ;;  %v707_v53 = vmul.f32 %v3260_v56, %v691_v59  ;;  %v708_v2 = vmul.f32 %v3260_v56, %v692_v19 }
  0xf3   :  { %v715_v21 = vmul.f32 %v3263_v57, %v613_v3  ;;  %v716_v9 = vmul.f32 %v3263_v57, %v614_v45  ;;  %v717_v4 = vmul.f32 %v3263_v57, %v615_v7  ;;  %v718_v43 = vmul.f32 %v3263_v57, %v616_v30 }
  0xf4   :  { %v709_v36 = vadd.f32 %v705_v14, %v699_v25  ;;  %v710_v54 = vadd.f32 %v706_v61, %v700_v44  ;;  %v711_v18 = vadd.f32 %v707_v53, %v701_v60  ;;  %v712_v42 = vadd.f32 %v708_v2, %v702_v16  ;;  %v5103_v16 = vld [vmem:[#allocation18_spill] sm:$0xff]  ;;  %v5105_v53 = vld [vmem:[#allocation19_spill] sm:$0xff] }
  0xf5   :  { %v719_v15 = vadd.f32 %v715_v21, %v505_v33  ;;  %v720_v32 = vadd.f32 %v716_v9, %v506_v20  ;;  %v721_v8 = vadd.f32 %v717_v4, %v507_v37  ;;  %v722_v22 = vadd.f32 %v718_v43, %v508_v34 }
  0xf6   :  { %v725_v17 = vmul.f32 %v3266_v58, %v689_v49  ;;  %v726_v56 = vmul.f32 %v3266_v58, %v690_v35  ;;  %v727_v26 = vmul.f32 %v3266_v58, %v691_v59  ;;  %v728_v46 = vmul.f32 %v3266_v58, %v692_v19 }
  0xf7   :  { %v735_v38 = vmul.f32 %v3275_v62, %v613_v3  ;;  %v736_v50 = vmul.f32 %v3275_v62, %v614_v45  ;;  %v737_v63 = vmul.f32 %v3275_v62, %v615_v7  ;;  %v738_v33 = vmul.f32 %v3275_v62, %v616_v30 }
  0xf8   :  { %v729_v23 = vadd.f32 %v725_v17, %v719_v15  ;;  %v730_v57 = vadd.f32 %v726_v56, %v720_v32  ;;  %v731_v20 = vadd.f32 %v727_v26, %v721_v8  ;;  %v732_v37 = vadd.f32 %v728_v46, %v722_v22  ;;  %v5107_v56 = vld [vmem:[#allocation22_spill] sm:$0xff] }
  0xf9   :  { %v739_v34 = vadd.f32 %v735_v38, %v527_v51  ;;  %v740_v29 = vadd.f32 %v736_v50, %v528_v24  ;;  %v741_v55 = vadd.f32 %v737_v63, %v529_v47  ;;  %v742_v52 = vadd.f32 %v738_v33, %v530_v13  ;;  %v5109_v38 = vld [vmem:[#allocation23_spill] sm:$0xff]  ;;  %v5111_v33 = vld [vmem:[#allocation26_spill] sm:$0xff] }
  0xfa   :  { %v745_v25 = vmul.f32 %v3280_v1, %v689_v49  ;;  %v746_v58 = vmul.f32 %v3280_v1, %v690_v35  ;;  %v747_v3 = vmul.f32 %v3280_v1, %v691_v59  ;;  %v748_v45 = vmul.f32 %v3280_v1, %v692_v19  ;;  %v5099_v49 = vld [vmem:[#allocation16_spill] sm:$0xff]  ;;  %v5101_v59 = vld [vmem:[#allocation17_spill] sm:$0xff] }
  0xfb   :  { %v811_v44 = vmul.f32 %v3313_v0, %v3634_v40  ;;  %v812_v62 = vmul.f32 %v3313_v0, %v3637_v27  ;;  %v813_v51 = vmul.f32 %v3313_v0, %v3640_v11  ;;  %v814_v24 = vmul.f32 %v3313_v0, %v3643_v12 }
  0xfc   :  { %v749_v7 = vadd.f32 %v745_v25, %v739_v34  ;;  %v750_v30 = vadd.f32 %v746_v58, %v740_v29  ;;  %v751_v47 = vadd.f32 %v747_v3, %v741_v55  ;;  %v752_v13 = vadd.f32 %v748_v45, %v742_v52  ;;  %v5113_v55 = vld [vmem:[#allocation27_spill] sm:$0xff]  ;;  %v5115_v58 = vld [vmem:[#allocation20_spill] sm:$0xff] }
  0xfd   :  { %v5100_v35 = vrot.slane %v5099_v49, %v3177_v28  ;;  %v5102_v19 = vrot.slane %v5101_v59, %v3177_v28  ;;  %v5104_v14 = vrot.slane %v5103_v16, %v3177_v28  ;;  %v5106_v2 = vrot.slane %v5105_v53, %v3177_v28 }
  0xfe   :  { %v887_v9 = vmul.f32 %v3313_v0, %v3694_v39  ;;  %v888_v4 = vmul.f32 %v3313_v0, %v3697_v5  ;;  %v889_v32 = vmul.f32 %v3313_v0, %v3700_v31  ;;  %v890_v8 = vmul.f32 %v3313_v0, %v3703_v41 }
  0xff   :  { %v831_v1 = vadd.f32 %v5100_v35, %v811_v44  ;;  %v832_v60 = vadd.f32 %v5102_v19, %v812_v62  ;;  %v833_v61 = vadd.f32 %v5104_v14, %v813_v51  ;;  %v834_v21 = vadd.f32 %v5106_v2, %v814_v24  ;;  %v5117_v2 = vld [vmem:[#allocation24_spill] sm:$0xff] }
 0x100   :  { %v5108_v26 = vrot.slane %v5107_v56, %v3125_v6  ;;  %v5110_v50 = vrot.slane %v5109_v38, %v3125_v6  ;;  %v5112_v34 = vrot.slane %v5111_v33, %v3125_v6  ;;  %v5114_v52 = vrot.slane %v5113_v55, %v3125_v6  ;;  %v5118_v38 = vld [vmem:[#allocation25_spill] sm:$0xff] }
 0x101   :  { %v835_v43 = vmax.f32 %v831_v1, 0.0  ;;  %v836_v15 = vmax.f32 %v832_v60, 0.0  ;;  %v837_v22 = vmax.f32 %v833_v61, 0.0  ;;  %v838_v17 = vmax.f32 %v834_v21, 0.0  ;;  %v5116_v60 = vld [vmem:[#allocation21_spill] sm:$0xff] }
 0x102   :  { %v907_v46 = vadd.f32 %v5108_v26, %v887_v9  ;;  %v908_v63 = vadd.f32 %v5110_v50, %v888_v4  ;;  %v909_v29 = vadd.f32 %v5112_v34, %v889_v32  ;;  %v910_v25 = vadd.f32 %v5114_v52, %v890_v8 }
 0x103   :  { %v917_v0 = vmul.f32 %v5115_v58, %v835_v43  ;;  %v918_v3 = vmul.f32 %v5115_v58, %v836_v15  ;;  %v919_v62 = vmul.f32 %v5115_v58, %v837_v22  ;;  %v920_v51 = vmul.f32 %v5115_v58, %v838_v17 }
 0x104   :  { %v911_v45 = vmax.f32 %v907_v46, 0.0  ;;  %v912_v44 = vmax.f32 %v908_v63, 0.0  ;;  %v913_v24 = vmax.f32 %v909_v29, 0.0  ;;  %v914_v49 = vmax.f32 %v910_v25, 0.0  ;;  %v5119_v29 = vld [vmem:[#allocation28_spill] sm:$0xff] }
 0x105   :  { %v921_v35 = vadd.f32 %v917_v0, %v709_v36  ;;  %v922_v1 = vadd.f32 %v918_v3, %v710_v54  ;;  %v923_v59 = vadd.f32 %v919_v62, %v711_v18  ;;  %v924_v19 = vadd.f32 %v920_v51, %v712_v42 }
 0x106   :  { %v927_v16 = vmul.f32 %v5116_v60, %v911_v45  ;;  %v928_v14 = vmul.f32 %v5116_v60, %v912_v44  ;;  %v929_v61 = vmul.f32 %v5116_v60, %v913_v24  ;;  %v930_v53 = vmul.f32 %v5116_v60, %v914_v49 }
 0x107   :  { %v937_v21 = vmul.f32 %v5117_v2, %v835_v43  ;;  %v938_v9 = vmul.f32 %v5117_v2, %v836_v15  ;;  %v939_v8 = vmul.f32 %v5117_v2, %v837_v22  ;;  %v940_v36 = vmul.f32 %v5117_v2, %v838_v17 }
 0x108   :  { %v931_v4 = vadd.f32 %v927_v16, %v921_v35  ;;  %v932_v32 = vadd.f32 %v928_v14, %v922_v1  ;;  %v933_v54 = vadd.f32 %v929_v61, %v923_v59  ;;  %v934_v18 = vadd.f32 %v930_v53, %v924_v19  ;;  %v5120_v35 = vld [vmem:[#allocation29_spill] sm:$0xff]  ;;  %v5121_v19 = vld [vmem:[#allocation32_spill] sm:$0xff] }
 0x109   :  { %v941_v42 = vadd.f32 %v937_v21, %v729_v23  ;;  %v942_v56 = vadd.f32 %v938_v9, %v730_v57  ;;  %v943_v26 = vadd.f32 %v939_v8, %v731_v20  ;;  %v944_v46 = vadd.f32 %v940_v36, %v732_v37  ;;  %v5126_v53 = vld [vmem:[#allocation33_spill] sm:$0xff]  ;;  %v5128_v9 = vld [vmem:[#allocation34_spill] sm:$0xff] }
 0x10a   :  { %v947_v50 = vmul.f32 %v5118_v38, %v911_v45  ;;  %v948_v63 = vmul.f32 %v5118_v38, %v912_v44  ;;  %v949_v33 = vmul.f32 %v5118_v38, %v913_v24  ;;  %v950_v34 = vmul.f32 %v5118_v38, %v914_v49 }
 0x10b   :  { %v957_v55 = vmul.f32 %v5119_v29, %v835_v43  ;;  %v958_v52 = vmul.f32 %v5119_v29, %v836_v15  ;;  %v959_v0 = vmul.f32 %v5119_v29, %v837_v22  ;;  %v960_v23 = vmul.f32 %v5119_v29, %v838_v17 }
 0x10c   :  { %v951_v25 = vadd.f32 %v947_v50, %v941_v42  ;;  %v952_v58 = vadd.f32 %v948_v63, %v942_v56  ;;  %v953_v57 = vadd.f32 %v949_v33, %v943_v26  ;;  %v954_v20 = vadd.f32 %v950_v34, %v944_v46  ;;  %v5130_v34 = vld [vmem:[#allocation38_spill] sm:$0xff] }
 0x10d   :  { %v961_v37 = vadd.f32 %v957_v55, %v749_v7  ;;  %v962_v3 = vadd.f32 %v958_v52, %v750_v30  ;;  %v963_v62 = vadd.f32 %v959_v0, %v751_v47  ;;  %v964_v51 = vadd.f32 %v960_v23, %v752_v13  ;;  %v5132_v52 = vld [vmem:[#allocation39_spill] sm:$0xff] }
 0x10e   :  { %v967_v1 = vmul.f32 %v5120_v35, %v911_v45  ;;  %v968_v59 = vmul.f32 %v5120_v35, %v912_v44  ;;  %v969_v43 = vmul.f32 %v5120_v35, %v913_v24  ;;  %v970_v15 = vmul.f32 %v5120_v35, %v914_v49  ;;  %v5122_v45 = vld [vmem:[#allocation30_spill] sm:$0xff]  ;;  %v5124_v49 = vld [vmem:[#allocation31_spill] sm:$0xff] }
 0x10f   :  { %v1033_v60 = vmul.f32 %v5121_v19, %v3634_v40  ;;  %v1034_v22 = vmul.f32 %v5121_v19, %v3637_v27  ;;  %v1035_v7 = vmul.f32 %v5121_v19, %v3640_v11  ;;  %v1036_v30 = vmul.f32 %v5121_v19, %v3643_v12 }
 0x110   :  { %v971_v17 = vadd.f32 %v967_v1, %v961_v37  ;;  %v972_v16 = vadd.f32 %v968_v59, %v962_v3  ;;  %v973_v47 = vadd.f32 %v969_v43, %v963_v62  ;;  %v974_v13 = vadd.f32 %v970_v15, %v964_v51  ;;  %v5134_v37 = vld [vmem:[#allocation40_spill] sm:$0xff]  ;;  %v5136_v51 = vld [vmem:[#allocation42_spill] sm:$0xff]  ;;  %v5138_v59 = vld [vmem:[#allocation35_spill] sm:$0xff] }
 0x111   :  { %v5123_v44 = vrot.slane %v5122_v45, %v3177_v28  ;;  %v5125_v14 = vrot.slane %v5124_v49, %v3177_v28  ;;  %v5127_v2 = vrot.slane %v5126_v53, %v3177_v28  ;;  %v5129_v8 = vrot.slane %v5128_v9, %v3177_v28 }
 0x112   :  { %v1109_v42 = vmul.f32 %v5121_v19, %v3694_v39  ;;  %v1110_v56 = vmul.f32 %v5121_v19, %v3697_v5  ;;  %v1111_v38 = vmul.f32 %v5121_v19, %v3700_v31  ;;  %v1112_v50 = vmul.f32 %v5121_v19, %v3703_v41 }
 0x113   :  { %v1053_v24 = vadd.f32 %v5123_v44, %v1033_v60  ;;  %v1054_v61 = vadd.f32 %v5125_v14, %v1034_v22  ;;  %v1055_v21 = vadd.f32 %v5127_v2, %v1035_v7  ;;  %v1056_v36 = vadd.f32 %v5129_v8, %v1036_v30  ;;  %v5140_v8 = vld [vmem:[#allocation37_spill] sm:$0xff] }
 0x114   :  { %v5131_v29 = vrot.slane %v5130_v34, %v3125_v6  ;;  %v5133_v0 = vrot.slane %v5132_v52, %v3125_v6  ;;  %v5135_v3 = vrot.slane %v5134_v37, %v3125_v6  ;;  %v5137_v35 = vrot.slane %v5136_v51, %v3125_v6  ;;  %v5141_v52 = vld [vmem:[#allocation41_spill] sm:$0xff] }
 0x115   :  { %v1057_v26 = vmax.f32 %v1053_v24, 0.0  ;;  %v1058_v46 = vmax.f32 %v1054_v61, 0.0  ;;  %v1059_v63 = vmax.f32 %v1055_v21, 0.0  ;;  %v1060_v33 = vmax.f32 %v1056_v36, 0.0  ;;  %v5139_v61 = vld [vmem:[#allocation36_spill] sm:$0xff] }
 0x116   :  { %v1129_v55 = vadd.f32 %v5131_v29, %v1109_v42  ;;  %v1130_v23 = vadd.f32 %v5133_v0, %v1110_v56  ;;  %v1131_v62 = vadd.f32 %v5135_v3, %v1111_v38  ;;  %v1132_v1 = vadd.f32 %v5137_v35, %v1112_v50 }
 0x117   :  { %v1139_v43 = vmul.f32 %v5138_v59, %v1057_v26  ;;  %v1140_v15 = vmul.f32 %v5138_v59, %v1058_v46  ;;  %v1141_v22 = vmul.f32 %v5138_v59, %v1059_v63  ;;  %v1142_v7 = vmul.f32 %v5138_v59, %v1060_v33 }
 0x118   :  { %v1133_v19 = vmax.f32 %v1129_v55, 0.0  ;;  %v1134_v60 = vmax.f32 %v1130_v23, 0.0  ;;  %v1135_v30 = vmax.f32 %v1131_v62, 0.0  ;;  %v1136_v45 = vmax.f32 %v1132_v1, 0.0  ;;  %v5142_v62 = vld [vmem:[#allocation43_spill] sm:$0xff] }
 0x119   :  { %v1143_v44 = vadd.f32 %v1139_v43, %v931_v4  ;;  %v1144_v24 = vadd.f32 %v1140_v15, %v932_v32  ;;  %v1145_v49 = vadd.f32 %v1141_v22, %v933_v54  ;;  %v1146_v14 = vadd.f32 %v1142_v7, %v934_v18 }
 0x11a   :  { %v1149_v53 = vmul.f32 %v5139_v61, %v1133_v19  ;;  %v1150_v2 = vmul.f32 %v5139_v61, %v1134_v60  ;;  %v1151_v21 = vmul.f32 %v5139_v61, %v1135_v30  ;;  %v1152_v9 = vmul.f32 %v5139_v61, %v1136_v45 }
 0x11b   :  { %v1159_v36 = vmul.f32 %v5140_v8, %v1057_v26  ;;  %v1160_v42 = vmul.f32 %v5140_v8, %v1058_v46  ;;  %v1161_v4 = vmul.f32 %v5140_v8, %v1059_v63  ;;  %v1162_v32 = vmul.f32 %v5140_v8, %v1060_v33 }
 0x11c   :  { %v3933_v56 = vadd.f32 %v1149_v53, %v1143_v44  ;;  %v3935_v38 = vadd.f32 %v1150_v2, %v1144_v24  ;;  %v3939_v54 = vadd.f32 %v1151_v21, %v1145_v49  ;;  %v3941_v18 = vadd.f32 %v1152_v9, %v1146_v14  ;;  %v5143_v44 = vld [vmem:[#allocation44_spill] sm:$0xff]  ;;  %v5147_v53 = vld [vmem:[#allocation47_spill] sm:$0xff] }
 0x11d   :  { %v1163_v50 = vadd.f32 %v1159_v36, %v951_v25  ;;  %v1164_v34 = vadd.f32 %v1160_v42, %v952_v58  ;;  %v1165_v29 = vadd.f32 %v1161_v4, %v953_v57  ;;  %v1166_v55 = vadd.f32 %v1162_v32, %v954_v20  ;;  %v5149_v9 = vld [vmem:[#allocation48_spill] sm:$0xff]  ;;  %v5151_v42 = vld [vmem:[#allocation49_spill] sm:$0xff] }
 0x11e   :  { %v1169_v0 = vmul.f32 %v5141_v52, %v1133_v19  ;;  %v1170_v23 = vmul.f32 %v5141_v52, %v1134_v60  ;;  %v1171_v37 = vmul.f32 %v5141_v52, %v1135_v30  ;;  %v1172_v3 = vmul.f32 %v5141_v52, %v1136_v45 }
 0x11f   :  { %v1179_v51 = vmul.f32 %v5142_v62, %v1057_v26  ;;  %v1180_v35 = vmul.f32 %v5142_v62, %v1058_v46  ;;  %v1181_v25 = vmul.f32 %v5142_v62, %v1059_v63  ;;  %v1182_v58 = vmul.f32 %v5142_v62, %v1060_v33  ;;  %v5144_v63 = vld [vmem:[#allocation45_spill] sm:$0xff] }
 0x120   :  { %v3949_v1 = vadd.f32 %v1169_v0, %v1163_v50  ;;  %v3951_v59 = vadd.f32 %v1170_v23, %v1164_v34  ;;  %v3955_v57 = vadd.f32 %v1171_v37, %v1165_v29  ;;  %v3957_v20 = vadd.f32 %v1172_v3, %v1166_v55  ;;  %v5153_v50 = vld [vmem:[#allocation54_spill] sm:$0xff]  ;;  %v5154_v29 = vld [vmem:[#allocation55_spill] sm:$0xff]  ;;  %v5155_v23 = vld [vmem:[#allocation56_spill] sm:$0xff] }
 0x121   :  { %v1183_v43 = vadd.f32 %v1179_v51, %v971_v17  ;;  %v1184_v15 = vadd.f32 %v1180_v35, %v972_v16  ;;  %v1185_v22 = vadd.f32 %v1181_v25, %v973_v47  ;;  %v1186_v7 = vadd.f32 %v1182_v58, %v974_v13  ;;  %v5156_v3 = vld [vmem:[#allocation57_spill] sm:$0xff]  ;;  %v5157_v25 = vld [vmem:[#allocation50_spill] sm:$0xff] }
 0x122   :  { %v1189_v26 = vmul.f32 %v5143_v44, %v1133_v19  ;;  %v1190_v46 = vmul.f32 %v5143_v44, %v1134_v60  ;;  %v1191_v24 = vmul.f32 %v5143_v44, %v1135_v30  ;;  %v1192_v49 = vmul.f32 %v5143_v44, %v1136_v45  ;;  %v5145_v30 = vld [vmem:[#allocation46_spill] sm:$0xff]  ;;  %v5160_v44 = vld [vmem:[#allocation53_spill] sm:$0xff] }
 0x123   :  { %v1255_v14 = vmul.f32 %v5144_v63, %v3634_v40  ;;  %v1256_v33 = vmul.f32 %v5144_v63, %v3637_v27  ;;  %v1257_v47 = vmul.f32 %v5144_v63, %v3640_v11  ;;  %v1258_v13 = vmul.f32 %v5144_v63, %v3643_v12 }
 0x124   :  { %v3969_v17 = vadd.f32 %v1189_v26, %v1183_v43  ;;  %v3971_v16 = vadd.f32 %v1190_v46, %v1184_v15  ;;  %v3979_v19 = vadd.f32 %v1191_v24, %v1185_v22  ;;  %v3981_v60 = vadd.f32 %v1192_v49, %v1186_v7  ;;  %v5158_v43 = vld [vmem:[#allocation51_spill] sm:$0xff]  ;;  %v5159_v22 = vld [vmem:[#allocation52_spill] sm:$0xff] }
 0x125   :  { %v5146_v45 = vrot.slane %v5145_v30, %v3177_v28  ;;  %v5148_v2 = vrot.slane %v5147_v53, %v3177_v28  ;;  %v5150_v8 = vrot.slane %v5149_v9, %v3177_v28  ;;  %v5152_v4 = vrot.slane %v5151_v42, %v3177_v28  ;;  %v4016_v46 = vld [vmem:[%s4989_s0 + $0x20] sm:$0x7]  ;;  %v4023_v49 = vld [vmem:[%s4989_s0 + $0x28] sm:$0x7] }
 0x126   :  { %v1299_v34 = vrot.slane %v5153_v50, 1  ;;  %v1300_v55 = vrot.slane %v5154_v29, 1  ;;  %v1301_v37 = vrot.slane %v5155_v23, 1  ;;  %v1302_v62 = vrot.slane %v5156_v3, 1 }
 0x127   :  { %v1275_v61 = vadd.f32 %v5146_v45, %v1255_v14  ;;  %v1276_v21 = vadd.f32 %v5148_v2, %v1256_v33  ;;  %v1277_v36 = vadd.f32 %v5150_v8, %v1257_v47  ;;  %v1278_v32 = vadd.f32 %v5152_v4, %v1258_v13  ;;  %v5161_v33 = vld [vmem:[#allocation58_spill] sm:$0xff] }
 0x128   :  { %v1307_v58 = vadd.f32 %v1299_v34, %v5157_v25  ;;  %v1308_v15 = vadd.f32 %v1300_v55, %v5158_v43  ;;  %v1309_v7 = vadd.f32 %v1301_v37, %v5159_v22  ;;  %v1310_v26 = vadd.f32 %v1302_v62, %v5160_v44 }
 0x129   :  { %v3997_v52 = vmax.f32 %v1275_v61, 0.0  ;;  %v3999_v0 = vmax.f32 %v1276_v21, 0.0  ;;  %v4003_v51 = vmax.f32 %v1277_v36, 0.0  ;;  %v4005_v35 = vmax.f32 %v1278_v32, 0.0 }
 0x12a   :  { %v1313_v24 = vmul.f32 %v4016_v46, %v3504_v48  ;;  %v1314_v14 = vmul.f32 %v4023_v49, %v3504_v48  ;;  %v1319_v47 = vrot.slane %v5161_v33, 2  ;;  %v1320_v13 = vrot.slane %v3591_v10, 2 }
 0x12b   :  { %v1331_v30 = vmul.f32 %v5144_v63, %v3694_v39  ;;  %v1332_v45 = vmul.f32 %v5144_v63, %v3697_v5  ;;  %v1333_v2 = vmul.f32 %v5144_v63, %v3700_v31  ;;  %v1334_v48 = vmul.f32 %v5144_v63, %v3703_v41 }
 0x12c   :  { %v1321_v61 = vrot.slane %v1313_v24, 2  ;;  %v1322_v53 = vrot.slane %v1314_v14, 2  ;;  %v1327_v21 = vadd.f32 %v1319_v47, %v1307_v58  ;;  %v1328_v9 = vadd.f32 %v1320_v13, %v1308_v15 }
 0x12d   :  { %v1360_v8 = vstv %s3967_s27  ;;  %v1370_v36 = vstv %s3977_s28  ;;  %v1390_v44 = vstv %s4027_s8  ;;  %s4210_s27 = sld [smem:[#allocation7 + $0x84]]  ;;  %vm2807_vm2 = vcmask 1046528  }
 0x12e   :  { %v1329_v42 = vadd.f32 %v1321_v61, %v1309_v7  ;;  %v1330_v10 = vadd.f32 %v1322_v53, %v1310_v26  ;;  %v1361_v4 = vmul.f32 %v1360_v8, %v3997_v52  ;;  %v1362_v32 = vmul.f32 %v1360_v8, %v3999_v0  ;;  %s4221_s28 = sld [smem:[#allocation7 + $0x8c]] }
 0x12f   :  { %v1338_v50 = vrot.slane %v1327_v21, %v3125_v6  ;;  %v1342_v34 = vrot.slane %v1328_v9, %v3125_v6  ;;  %v1363_v29 = vmul.f32 %v1360_v8, %v4003_v51  ;;  %v1364_v63 = vmul.f32 %v1360_v8, %v4005_v35  ;;  %s4265_s8 = sld [smem:[#allocation2 + $0x282]] }
 0x130   :  { %v1346_v55 = vrot.slane %v1329_v42, %v3125_v6  ;;  %v1350_v23 = vrot.slane %v1330_v10, %v3125_v6  ;;  %v1365_v37 = vadd.f32 %v1361_v4, %v3933_v56  ;;  %v1366_v3 = vadd.f32 %v1362_v32, %v3935_v38 }
 0x131   :  { %v1351_v62 = vadd.f32 %v1338_v50, %v1331_v30  ;;  %v1352_v25 = vadd.f32 %v1342_v34, %v1332_v45  ;;  %v1367_v58 = vadd.f32 %v1363_v29, %v3939_v54  ;;  %v1368_v43 = vadd.f32 %v1364_v63, %v3941_v18 }
 0x132   :  { %v1353_v15 = vadd.f32 %v1346_v55, %v1333_v2  ;;  %v1354_v22 = vadd.f32 %v1350_v23, %v1334_v48  ;;  %v1380_v7 = vstv %s4009_s29  ;;  %v1410_v32 = vstv %s4055_s10  ;;  %s4227_s29 = sld [smem:[#allocation7 + $0x104]] }
 0x133   :  { %v1355_v26 = vmax.f32 %v1351_v62, 0.0  ;;  %v1356_v24 = vmax.f32 %v1352_v25, 0.0  ;;  %v1381_v56 = vmul.f32 %v1380_v7, %v3997_v52  ;;  %v1382_v38 = vmul.f32 %v1380_v7, %v3999_v0  ;;  %s4337_s10 = sld [smem:[#allocation7 + $0x5]] }
 0x134   :  { %v1357_v14 = vmax.f32 %v1353_v15, 0.0  ;;  %v1358_v33 = vmax.f32 %v1354_v22, 0.0  ;;  %v1383_v47 = vmul.f32 %v1380_v7, %v4003_v51  ;;  %v1384_v54 = vmul.f32 %v1380_v7, %v4005_v35 }
 0x135   :  { %v1371_v18 = vmul.f32 %v1370_v36, %v1355_v26  ;;  %v1372_v13 = vmul.f32 %v1370_v36, %v1356_v24  ;;  %v1385_v30 = vadd.f32 %v1381_v56, %v3949_v1  ;;  %v1386_v45 = vadd.f32 %v1382_v38, %v3951_v59  ;;  %v4136_v56 = vld [vmem:[%s4989_s0 + $0x28] sm:$0x38] }
 0x136   :  { %v1373_v61 = vmul.f32 %v1370_v36, %v1357_v14  ;;  %v1374_v53 = vmul.f32 %v1370_v36, %v1358_v33  ;;  %v1387_v2 = vadd.f32 %v1383_v47, %v3955_v57  ;;  %v1388_v48 = vadd.f32 %v1384_v54, %v3957_v20 }
 0x137   :  { %v4071_v21 = vadd.f32 %v1371_v18, %v1365_v37  ;;  %v4073_v9 = vadd.f32 %v1372_v13, %v1366_v3  ;;  %v1391_v8 = vmul.f32 %v1390_v44, %v1355_v26  ;;  %v1392_v42 = vmul.f32 %v1390_v44, %v1356_v24 }
 0x138   :  { %v4077_v1 = vadd.f32 %v1373_v61, %v1367_v58  ;;  %v4079_v59 = vadd.f32 %v1374_v53, %v1368_v43  ;;  %v1393_v10 = vmul.f32 %v1390_v44, %v1357_v14  ;;  %v1394_v4 = vmul.f32 %v1390_v44, %v1358_v33 }
 0x139   :  { %v4083_v36 = vadd.f32 %v1391_v8, %v1385_v30  ;;  %v4085_v57 = vadd.f32 %v1392_v42, %v1386_v45  ;;  %v1400_v20 = vstv %s4051_s9  ;;  %v1411_v37 = vmul.f32 %v1410_v32, %v1355_v26  ;;  %v4130_v26 = vld [vmem:[%s4989_s0 + $0x20] sm:$0x38]  ;;  %s4275_s9 = sld [smem:[#allocation2 + $0x283]] }
 0x13a   :  { %v4089_v50 = vadd.f32 %v1393_v10, %v1387_v2  ;;  %v4091_v34 = vadd.f32 %v1394_v4, %v1388_v48  ;;  %v1401_v29 = vmul.f32 %v1400_v20, %v3997_v52  ;;  %v1402_v63 = vmul.f32 %v1400_v20, %v3999_v0 }
 0x13b   :  { %v1403_v55 = vmul.f32 %v1400_v20, %v4003_v51  ;;  %v1404_v23 = vmul.f32 %v1400_v20, %v4005_v35  ;;  %v1412_v3 = vmul.f32 %v1410_v32, %v1356_v24  ;;  %v1413_v58 = vmul.f32 %v1410_v32, %v1357_v14 }
 0x13c   :  { %v1405_v62 = vadd.f32 %v1401_v29, %v3969_v17  ;;  %v1406_v25 = vadd.f32 %v1402_v63, %v3971_v16  ;;  %v1414_v43 = vmul.f32 %v1410_v32, %v1358_v33  ;;  %v1421_v7 = vstv %s4063_s11  ;;  %v4112_v17 = vld [vmem:[%s4989_s0] sm:$0x38]  ;;  %s4343_s11 = sld [smem:[#allocation7 + $0xd]] }
 0x13d   :  { %v1407_v15 = vadd.f32 %v1403_v55, %v3979_v19  ;;  %v1408_v22 = vadd.f32 %v1404_v23, %v3981_v60  ;;  %v4103_v52 = vstv %s4067_s12  ;;  %v1422_v16 = vmul.f32 %v4112_v17, %v1421_v7  ;;  %v4118_v19 = vld [vmem:[%s4989_s0 + $0x8] sm:$0x38]  ;;  %s4357_s12 = sld [smem:[#allocation7 + $0x85]] }
 0x13e   :  { %v4105_v0 = vadd.f32 %v1411_v37, %v1405_v62  ;;  %v4107_v51 = vadd.f32 %v1412_v3, %v1406_v25  ;;  %v1423_v60 = vmul.f32 %v4118_v19, %v1421_v7  ;;  %v1424_v24 = vmul.f32 %v4130_v26, %v1421_v7 }
 0x13f   :  { %v4123_v35 = vadd.f32 %v1413_v58, %v1407_v15  ;;  %v4125_v44 = vadd.f32 %v1414_v43, %v1408_v22  ;;  %v1425_v38 = vmul.f32 %v4136_v56, %v1421_v7  ;;  %v1427_v14 = vadd.f32 %v4103_v52, %v1422_v16  ;;  %v4163_v43 = vld [vmem:[%s4989_s0] sm:$0x7] }
 0x140   :  { %v1428_v33 = vadd.f32 %v4103_v52, %v1423_v60  ;;  %v1432_v47 = vstv %s4075_s13  ;;  %v4143_v54 = vstv %s4081_s4  ;;  %v1429_v18 = vadd.f32 %v4103_v52, %v1424_v24  ;;  %s4359_s13 = sld [smem:[#allocation7 + $0x8d]] }
 0x141   :  { %v1430_v13 = vadd.f32 %v4103_v52, %v1425_v38  ;;  %v1433_v30 = vmul.f32 %v4112_v17, %v1432_v47  ;;  %v1434_v45 = vmul.f32 %v4118_v19, %v1432_v47  ;;  %v1435_v61 = vmul.f32 %v4130_v26, %v1432_v47  ;;  %s4369_s4 = sld [smem:[#allocation7 + $0x105]] }
 0x142   :  { %v1436_v53 = vmul.f32 %v4136_v56, %v1432_v47  ;;  %v1455_v2 = vmul.f32 %v4112_v17, %v4143_v54  ;;  %v1456_v48 = vmul.f32 %v4118_v19, %v4143_v54  ;;  %v1457_v10 = vmul.f32 %v4130_v26, %v4143_v54 }
 0x143   :  { %v1441_v8 = vrot.slane %v1433_v30, 1  ;;  %v1442_v42 = vrot.slane %v1434_v45, 1  ;;  %v1458_v4 = vmul.f32 %v4136_v56, %v4143_v54  ;;  %v1443_v20 = vrot.slane %v1435_v61, 1  ;;  %v4175_v45 = vld [vmem:[%s4989_s0 + $0x8] sm:$0x7] }
 0x144   :  { %v1444_v32 = vrot.slane %v1436_v53, 1  ;;  %v1463_v29 = vrot.slane %v1455_v2, 2  ;;  %v1464_v63 = vrot.slane %v1456_v48, 2  ;;  %v1465_v37 = vrot.slane %v1457_v10, 2 }
 0x145   :  { %v1449_v55 = vadd.f32 %v1441_v8, %v1427_v14  ;;  %v1450_v23 = vadd.f32 %v1442_v42, %v1428_v33  ;;  %v1466_v3 = vrot.slane %v1458_v4, 2  ;;  %v1451_v62 = vadd.f32 %v1443_v20, %v1429_v18 }
 0x146   :  { %v1452_v25 = vadd.f32 %v1444_v32, %v1430_v13  ;;  %v1476_v58 = vstv %s4121_s16  ;;  %v1505_v15 = vmul.f32 %v4163_v43, %v1421_v7  ;;  %v1506_v61 = vmul.f32 %v4175_v45, %v1421_v7  ;;  %s4409_s16 = sld [smem:[#allocation2 + $0x302]] }
 0x147   :  { %v1471_v22 = vadd.f32 %v1463_v29, %v1449_v55  ;;  %v1472_v16 = vadd.f32 %v1464_v63, %v1450_v23  ;;  %v1477_v60 = vmul.f32 %v1476_v58, %v3634_v40  ;;  %v1478_v24 = vmul.f32 %v1476_v58, %v3637_v27 }
 0x148   :  { %v1473_v38 = vadd.f32 %v1465_v37, %v1451_v62  ;;  %v1474_v14 = vadd.f32 %v1466_v3, %v1452_v25  ;;  %v1479_v33 = vmul.f32 %v1476_v58, %v3640_v11  ;;  %v1480_v18 = vmul.f32 %v1476_v58, %v3643_v12 }
 0x149   :  { %v1484_v13 = vrot.slane %v1471_v22, %v3177_v28  ;;  %v1488_v30 = vrot.slane %v1472_v16, %v3177_v28  ;;  %v1507_v53 = vmul.f32 %v4016_v46, %v1421_v7  ;;  %v1508_v8 = vmul.f32 %v4023_v49, %v1421_v7 }
 0x14a   :  { %v1492_v2 = vrot.slane %v1473_v38, %v3177_v28  ;;  %v1496_v48 = vrot.slane %v1474_v14, %v3177_v28  ;;  %v1509_v42 = vadd.f32 %v1505_v15, %v4103_v52  ;;  %v1510_v20 = vadd.f32 %v1506_v61, %v4103_v52 }
 0x14b   :  { %v1497_v10 = vadd.f32 %v1484_v13, %v1477_v60  ;;  %v1498_v4 = vadd.f32 %v1488_v30, %v1478_v24  ;;  %v1511_v32 = vadd.f32 %v1507_v53, %v4103_v52  ;;  %v1512_v55 = vadd.f32 %v1508_v8, %v4103_v52 }
 0x14c   :  { %v1499_v29 = vadd.f32 %v1492_v2, %v1479_v33  ;;  %v1500_v63 = vadd.f32 %v1496_v48, %v1480_v18  ;;  %v1513_v23 = vmul.f32 %v4163_v43, %v1432_v47  ;;  %v1514_v7 = vmul.f32 %v4175_v45, %v1432_v47 }
 0x14d   :  { %v4189_v37 = vmax.f32 %v1497_v10, 0.0  ;;  %v4191_v3 = vmax.f32 %v1498_v4, 0.0  ;;  %v1515_v62 = vmul.f32 %v4016_v46, %v1432_v47  ;;  %v1516_v22 = vmul.f32 %v4023_v49, %v1432_v47 }
 0x14e   :  { %v4195_v25 = vmax.f32 %v1499_v29, 0.0  ;;  %v4197_v15 = vmax.f32 %v1500_v63, 0.0  ;;  %v1521_v16 = vrot.slane %v1513_v23, 1  ;;  %v1522_v52 = vrot.slane %v1514_v7, 1 }
 0x14f   :  { %v1523_v60 = vrot.slane %v1515_v62, 1  ;;  %v1533_v24 = vmul.f32 %v4163_v43, %v4143_v54  ;;  %v1534_v38 = vmul.f32 %v4175_v45, %v4143_v54  ;;  %v1524_v14 = vrot.slane %v1516_v22, 1 }
 0x150   :  { %v1529_v33 = vadd.f32 %v1521_v16, %v1509_v42  ;;  %v1535_v18 = vmul.f32 %v4016_v46, %v4143_v54  ;;  %v1536_v13 = vmul.f32 %v4023_v49, %v4143_v54  ;;  %v1530_v47 = vadd.f32 %v1522_v52, %v1510_v20 }
 0x151   :  { %v1531_v30 = vadd.f32 %v1523_v60, %v1511_v32  ;;  %v1541_v61 = vrot.slane %v1533_v24, 2  ;;  %v1542_v53 = vrot.slane %v1534_v38, 2  ;;  %v1532_v2 = vadd.f32 %v1524_v14, %v1512_v55 }
 0x152   :  { %v1543_v48 = vrot.slane %v1535_v18, 2  ;;  %v1544_v8 = vrot.slane %v1536_v13, 2  ;;  %v1553_v42 = vmul.f32 %v1476_v58, %v3694_v39  ;;  %v1554_v29 = vmul.f32 %v1476_v58, %v3697_v5 }
 0x153   :  { %v1549_v10 = vadd.f32 %v1541_v61, %v1529_v33  ;;  %v1550_v4 = vadd.f32 %v1542_v53, %v1530_v47  ;;  %v1555_v54 = vmul.f32 %v1476_v58, %v3700_v31  ;;  %v1556_v20 = vmul.f32 %v1476_v58, %v3703_v41 }
 0x154   :  { %v1551_v63 = vadd.f32 %v1543_v48, %v1531_v30  ;;  %v1552_v23 = vadd.f32 %v1544_v8, %v1532_v2  ;;  %v1582_v32 = vstv %s4187_s25  ;;  %v1592_v2 = vstv %s4208_s26  ;;  %s4549_s25 = sld [smem:[#allocation5 + $0x7]] }
 0x155   :  { %v1560_v7 = vrot.slane %v1549_v10, %v3125_v6  ;;  %v1564_v62 = vrot.slane %v1550_v4, %v3125_v6  ;;  %v1583_v55 = vmul.f32 %v1582_v32, %v4189_v37  ;;  %v1584_v22 = vmul.f32 %v1582_v32, %v4191_v3  ;;  %s4554_s26 = sld [smem:[#allocation2 + $0x381]] }
 0x156   :  { %v1568_v16 = vrot.slane %v1551_v63, %v3125_v6  ;;  %v1572_v52 = vrot.slane %v1552_v23, %v3125_v6  ;;  %v1585_v60 = vmul.f32 %v1582_v32, %v4195_v25  ;;  %v1586_v58 = vmul.f32 %v1582_v32, %v4197_v15 }
 0x157   :  { %v1573_v24 = vadd.f32 %v1560_v7, %v1553_v42  ;;  %v1574_v38 = vadd.f32 %v1564_v62, %v1554_v29  ;;  %v1587_v14 = vadd.f32 %v1583_v55, %v4071_v21  ;;  %v1588_v33 = vadd.f32 %v1584_v22, %v4073_v9 }
 0x158   :  { %v1575_v18 = vadd.f32 %v1568_v16, %v1555_v54  ;;  %v1576_v13 = vadd.f32 %v1572_v52, %v1556_v20  ;;  %v1589_v47 = vadd.f32 %v1585_v60, %v4077_v1  ;;  %v1590_v30 = vadd.f32 %v1586_v58, %v4079_v59 }
 0x159   :  { %v1577_v61 = vmax.f32 %v1573_v24, 0.0  ;;  %v1578_v53 = vmax.f32 %v1574_v38, 0.0  ;;  %v1602_v48 = vstv %s4210_s27  ;;  %v1612_v16 = vstv %s4221_s28  ;;  %s4563_s27 = sld [smem:[#allocation2 + $0x382]] }
 0x15a   :  { %v1579_v8 = vmax.f32 %v1575_v18, 0.0  ;;  %v1580_v42 = vmax.f32 %v1576_v13, 0.0  ;;  %v1603_v21 = vmul.f32 %v1602_v48, %v4189_v37  ;;  %v1604_v9 = vmul.f32 %v1602_v48, %v4191_v3  ;;  %s4567_s28 = sld [smem:[#allocation2 + $0x383]] }
 0x15b   :  { %v1593_v1 = vmul.f32 %v1592_v2, %v1577_v61  ;;  %v1594_v59 = vmul.f32 %v1592_v2, %v1578_v53  ;;  %v1605_v10 = vmul.f32 %v1602_v48, %v4195_v25  ;;  %v1606_v4 = vmul.f32 %v1602_v48, %v4197_v15 }
 0x15c   :  { %v1595_v29 = vmul.f32 %v1592_v2, %v1579_v8  ;;  %v1596_v54 = vmul.f32 %v1592_v2, %v1580_v42  ;;  %v1607_v63 = vadd.f32 %v1603_v21, %v4083_v36  ;;  %v1608_v23 = vadd.f32 %v1604_v9, %v4085_v57 }
 0x15d   :  { %v4249_v20 = vadd.f32 %v1593_v1, %v1587_v14  ;;  %v4251_v32 = vadd.f32 %v1594_v59, %v1588_v33  ;;  %v1609_v7 = vadd.f32 %v1605_v10, %v4089_v50  ;;  %v1610_v62 = vadd.f32 %v1606_v4, %v4091_v34 }
 0x15e   :  { %v4255_v55 = vadd.f32 %v1595_v29, %v1589_v47  ;;  %v4257_v22 = vadd.f32 %v1596_v54, %v1590_v30  ;;  %v1622_v52 = vstv %s4227_s29  ;;  %v1613_v60 = vmul.f32 %v1612_v16, %v1577_v61 }
 0x15f   :  { %v1614_v58 = vmul.f32 %v1612_v16, %v1578_v53  ;;  %v1615_v24 = vmul.f32 %v1612_v16, %v1579_v8  ;;  %v1616_v36 = vmul.f32 %v1612_v16, %v1580_v42  ;;  %v1623_v57 = vmul.f32 %v1622_v52, %v4189_v37 }
 0x160   :  { %v1624_v38 = vmul.f32 %v1622_v52, %v4191_v3  ;;  %v1625_v50 = vmul.f32 %v1622_v52, %v4195_v25  ;;  %v1626_v34 = vmul.f32 %v1622_v52, %v4197_v15  ;;  %v4267_v14 = vadd.f32 %v1613_v60, %v1607_v63 }
 0x161   :  { %v4269_v33 = vadd.f32 %v1614_v58, %v1608_v23  ;;  %v4271_v18 = vadd.f32 %v1615_v24, %v1609_v7  ;;  %v4273_v13 = vadd.f32 %v1616_v36, %v1610_v62  ;;  %v1627_v37 = vadd.f32 %v1623_v57, %v4105_v0 }
 0x162   :  { %v1628_v3 = vadd.f32 %v1624_v38, %v4107_v51  ;;  %v1629_v25 = vadd.f32 %v1625_v50, %v4123_v35  ;;  %v1630_v15 = vadd.f32 %v1626_v34, %v4125_v44  ;;  %v1632_v47 = vstv %s4241_s30 }
 0x163   :  { %v1643_v30 = vstv %s4233_s3  ;;  %v1648_v2 = vstv %s4237_s2  ;;  %v4285_v48 = vstv %s4245_s7  ;;  %v1633_v21 = vmul.f32 %v1632_v47, %v1577_v61 }
 0x164   :  { %v1634_v9 = vmul.f32 %v1632_v47, %v1578_v53  ;;  %v1635_v1 = vmul.f32 %v1632_v47, %v1579_v8  ;;  %v1636_v59 = vmul.f32 %v1632_v47, %v1580_v42  ;;  %v1644_v10 = vmul.f32 %v4112_v17, %v1643_v30 }
 0x165   :  { %v1645_v0 = vmul.f32 %v4118_v19, %v1643_v30  ;;  %v1646_v51 = vmul.f32 %v4130_v26, %v1643_v30  ;;  %v1647_v35 = vmul.f32 %v4136_v56, %v1643_v30  ;;  %v4291_v44 = vadd.f32 %v1633_v21, %v1627_v37 }
 0x166   :  { %v4293_v4 = vadd.f32 %v1634_v9, %v1628_v3  ;;  %v4295_v29 = vadd.f32 %v1635_v1, %v1629_v25  ;;  %v4297_v61 = vadd.f32 %v1636_v59, %v1630_v15  ;;  %v1649_v53 = vadd.f32 %v1648_v2, %v1644_v10 }
 0x167   :  { %v1650_v8 = vadd.f32 %v1648_v2, %v1645_v0  ;;  %v1651_v42 = vadd.f32 %v1648_v2, %v1646_v51  ;;  %v1652_v54 = vadd.f32 %v1648_v2, %v1647_v35  ;;  %v1655_v63 = vmul.f32 %v4112_v17, %v4285_v48 }
 0x168   :  { %v1656_v23 = vmul.f32 %v4118_v19, %v4285_v48  ;;  %v1657_v7 = vmul.f32 %v4130_v26, %v4285_v48  ;;  %v1658_v62 = vmul.f32 %v4136_v56, %v4285_v48  ;;  %v4308_v16 = vstv %s4265_s8 }
 0x169   :  { %v4311_v52 = vstv %s4275_s9  ;;  %v1727_v60 = vmul.f32 %v4163_v43, %v1643_v30  ;;  %v1728_v58 = vmul.f32 %v4175_v45, %v1643_v30  ;;  %v1663_v24 = vrot.slane %v1655_v63, 1 }
 0x16a   :  { %v1664_v36 = vrot.slane %v1656_v23, 1  ;;  %v1665_v57 = vrot.slane %v1657_v7, 1  ;;  %v1666_v38 = vrot.slane %v1658_v62, 1  ;;  %v1677_v50 = vmul.f32 %v4112_v17, %v4308_v16 }
 0x16b   :  { %v1678_v34 = vmul.f32 %v4118_v19, %v4308_v16  ;;  %v1679_v37 = vmul.f32 %v4130_v26, %v4308_v16  ;;  %v1680_v3 = vmul.f32 %v4136_v56, %v4308_v16  ;;  %v1671_v25 = vadd.f32 %v1663_v24, %v1649_v53 }
 0x16c   :  { %v1672_v15 = vadd.f32 %v1664_v36, %v1650_v8  ;;  %v1673_v47 = vadd.f32 %v1665_v57, %v1651_v42  ;;  %v1674_v21 = vadd.f32 %v1666_v38, %v1652_v54  ;;  %v1685_v9 = vrot.slane %v1677_v50, 2 }
 0x16d   :  { %v1686_v1 = vrot.slane %v1678_v34, 2  ;;  %v1687_v59 = vrot.slane %v1679_v37, 2  ;;  %v1688_v10 = vrot.slane %v1680_v3, 2  ;;  %v1699_v0 = vmul.f32 %v4311_v52, %v3634_v40 }
 0x16e   :  { %v1700_v51 = vmul.f32 %v4311_v52, %v3637_v27  ;;  %v1701_v35 = vmul.f32 %v4311_v52, %v3640_v11  ;;  %v1702_v63 = vmul.f32 %v4311_v52, %v3643_v12  ;;  %v1693_v53 = vadd.f32 %v1685_v9, %v1671_v25 }
 0x16f   :  { %v1694_v8 = vadd.f32 %v1686_v1, %v1672_v15  ;;  %v1695_v42 = vadd.f32 %v1687_v59, %v1673_v47  ;;  %v1696_v54 = vadd.f32 %v1688_v10, %v1674_v21  ;;  %v1729_v23 = vmul.f32 %v4016_v46, %v1643_v30 }
 0x170   :  { %v1730_v7 = vmul.f32 %v4023_v49, %v1643_v30  ;;  %v1731_v62 = vadd.f32 %v1727_v60, %v1648_v2  ;;  %v1732_v24 = vadd.f32 %v1728_v58, %v1648_v2  ;;  %v1706_v36 = vrot.slane %v1693_v53, %v3177_v28 }
 0x171   :  { %v1710_v57 = vrot.slane %v1694_v8, %v3177_v28  ;;  %v1714_v38 = vrot.slane %v1695_v42, %v3177_v28  ;;  %v1718_v50 = vrot.slane %v1696_v54, %v3177_v28  ;;  %v1733_v34 = vadd.f32 %v1729_v23, %v1648_v2 }
 0x172   :  { %v1734_v37 = vadd.f32 %v1730_v7, %v1648_v2  ;;  %v1735_v3 = vmul.f32 %v4163_v43, %v4285_v48  ;;  %v1736_v30 = vmul.f32 %v4175_v45, %v4285_v48  ;;  %v1719_v60 = vadd.f32 %v1706_v36, %v1699_v0 }
 0x173   :  { %v1720_v58 = vadd.f32 %v1710_v57, %v1700_v51  ;;  %v1721_v25 = vadd.f32 %v1714_v38, %v1701_v35  ;;  %v1722_v15 = vadd.f32 %v1718_v50, %v1702_v63  ;;  %v1737_v47 = vmul.f32 %v4016_v46, %v4285_v48 }
 0x174   :  { %v1738_v21 = vmul.f32 %v4023_v49, %v4285_v48  ;;  %v1743_v9 = vrot.slane %v1735_v3, 1  ;;  %v1744_v2 = vrot.slane %v1736_v30, 1  ;;  %v4349_v1 = vmax.f32 %v1719_v60, 0.0 }
 0x175   :  { %v4351_v59 = vmax.f32 %v1720_v58, 0.0  ;;  %v4353_v10 = vmax.f32 %v1721_v25, 0.0  ;;  %v4355_v53 = vmax.f32 %v1722_v15, 0.0  ;;  %v1745_v0 = vrot.slane %v1737_v47, 1 }
 0x176   :  { %v1746_v51 = vrot.slane %v1738_v21, 1  ;;  %v1751_v35 = vadd.f32 %v1743_v9, %v1731_v62  ;;  %v1752_v63 = vadd.f32 %v1744_v2, %v1732_v24  ;;  %v1755_v48 = vmul.f32 %v4163_v43, %v4308_v16 }
 0x177   :  { %v1756_v8 = vmul.f32 %v4175_v45, %v4308_v16  ;;  %v1757_v42 = vmul.f32 %v4016_v46, %v4308_v16  ;;  %v1758_v54 = vmul.f32 %v4023_v49, %v4308_v16  ;;  %v1753_v23 = vadd.f32 %v1745_v0, %v1733_v34 }
 0x178   :  { %v1754_v7 = vadd.f32 %v1746_v51, %v1734_v37  ;;  %v1775_v62 = vmul.f32 %v4311_v52, %v3694_v39  ;;  %v1776_v24 = vmul.f32 %v4311_v52, %v3697_v5  ;;  %v1763_v36 = vrot.slane %v1755_v48, 2 }
 0x179   :  { %v1764_v57 = vrot.slane %v1756_v8, 2  ;;  %v1765_v38 = vrot.slane %v1757_v42, 2  ;;  %v1766_v50 = vrot.slane %v1758_v54, 2  ;;  %v1777_v3 = vmul.f32 %v4311_v52, %v3700_v31 }
 0x17a   :  { %v1778_v16 = vmul.f32 %v4311_v52, %v3703_v41  ;;  %v1804_v34 = vstv %s4337_s10  ;;  %v1814_v37 = vstv %s4343_s11  ;;  %v1771_v30 = vadd.f32 %v1763_v36, %v1751_v35 }
 0x17b   :  { %v1772_v60 = vadd.f32 %v1764_v57, %v1752_v63  ;;  %v1773_v58 = vadd.f32 %v1765_v38, %v1753_v23  ;;  %v1774_v25 = vadd.f32 %v1766_v50, %v1754_v7  ;;  %v1805_v15 = vmul.f32 %v1804_v34, %v4349_v1 }
 0x17c   :  { %v1806_v47 = vmul.f32 %v1804_v34, %v4351_v59  ;;  %v1807_v21 = vmul.f32 %v1804_v34, %v4353_v10  ;;  %v1808_v9 = vmul.f32 %v1804_v34, %v4355_v53  ;;  %v1782_v52 = vrot.slane %v1771_v30, %v3125_v6 }
 0x17d   :  { %v1786_v2 = vrot.slane %v1772_v60, %v3125_v6  ;;  %v1790_v0 = vrot.slane %v1773_v58, %v3125_v6  ;;  %v1794_v51 = vrot.slane %v1774_v25, %v3125_v6  ;;  %v1809_v35 = vadd.f32 %v1805_v15, %v4249_v20 }
 0x17e   :  { %v1810_v63 = vadd.f32 %v1806_v47, %v4251_v32  ;;  %v1811_v48 = vadd.f32 %v1807_v21, %v4255_v55  ;;  %v1812_v8 = vadd.f32 %v1808_v9, %v4257_v22  ;;  %v1795_v42 = vadd.f32 %v1782_v52, %v1775_v62 }
 0x17f   :  { %v1796_v54 = vadd.f32 %v1786_v2, %v1776_v24  ;;  %v1797_v23 = vadd.f32 %v1790_v0, %v1777_v3  ;;  %v1798_v7 = vadd.f32 %v1794_v51, %v1778_v16  ;;  %v1824_v36 = vstv %s4357_s12 }
 0x180   :  { %v1834_v57 = vstv %s4359_s13  ;;  %v1844_v38 = vstv %s4369_s4  ;;  %v1854_v50 = vstv %s4375_s5  ;;  %v1799_v34 = vmax.f32 %v1795_v42, 0.0  ;;  %s4676_s5 = sld [smem:[#allocation7 + $0x7]] }
 0x181   :  { %v1800_v30 = vmax.f32 %v1796_v54, 0.0  ;;  %v1801_v60 = vmax.f32 %v1797_v23, 0.0  ;;  %v1802_v20 = vmax.f32 %v1798_v7, 0.0  ;;  %v1825_v32 = vmul.f32 %v1824_v36, %v4349_v1 }
 0x182   :  { %v1826_v55 = vmul.f32 %v1824_v36, %v4351_v59  ;;  %v1827_v22 = vmul.f32 %v1824_v36, %v4353_v10  ;;  %v1828_v62 = vmul.f32 %v1824_v36, %v4355_v53  ;;  %v1815_v24 = vmul.f32 %v1814_v37, %v1799_v34 }
 0x183   :  { %v1816_v3 = vmul.f32 %v1814_v37, %v1800_v30  ;;  %v1817_v16 = vmul.f32 %v1814_v37, %v1801_v60  ;;  %v1818_v58 = vmul.f32 %v1814_v37, %v1802_v20  ;;  %v1829_v25 = vadd.f32 %v1825_v32, %v4267_v14 }
 0x184   :  { %v1830_v15 = vadd.f32 %v1826_v55, %v4269_v33  ;;  %v1831_v47 = vadd.f32 %v1827_v22, %v4271_v18  ;;  %v1832_v21 = vadd.f32 %v1828_v62, %v4273_v13  ;;  %v4415_v9 = vadd.f32 %v1815_v24, %v1809_v35 }
 0x185   :  { %v4417_v52 = vadd.f32 %v1816_v3, %v1810_v63  ;;  %v4419_v2 = vadd.f32 %v1817_v16, %v1811_v48  ;;  %v4421_v0 = vadd.f32 %v1818_v58, %v1812_v8  ;;  %v1835_v51 = vmul.f32 %v1834_v57, %v1799_v34 }
 0x186   :  { %v1836_v37 = vmul.f32 %v1834_v57, %v1800_v30  ;;  %v1837_v42 = vmul.f32 %v1834_v57, %v1801_v60  ;;  %v1838_v54 = vmul.f32 %v1834_v57, %v1802_v20  ;;  %v1845_v14 = vmul.f32 %v1844_v38, %v4349_v1 }
 0x187   :  { %v1846_v33 = vmul.f32 %v1844_v38, %v4351_v59  ;;  %v1847_v18 = vmul.f32 %v1844_v38, %v4353_v10  ;;  %v1848_v13 = vmul.f32 %v1844_v38, %v4355_v53  ;;  %v4427_v35 = vadd.f32 %v1835_v51, %v1829_v25 }
 0x188   :  { %v4429_v63 = vadd.f32 %v1836_v37, %v1830_v15  ;;  %v4431_v48 = vadd.f32 %v1837_v42, %v1831_v47  ;;  %v4433_v8 = vadd.f32 %v1838_v54, %v1832_v21  ;;  %v1849_v1 = vadd.f32 %v1845_v14, %v4291_v44 }
 0x189   :  { %v1850_v23 = vadd.f32 %v1846_v33, %v4293_v4  ;;  %v1851_v59 = vadd.f32 %v1847_v18, %v4295_v29  ;;  %v1852_v10 = vadd.f32 %v1848_v13, %v4297_v61  ;;  %v1855_v7 = vmul.f32 %v1854_v50, %v1799_v34 }
 0x18a   :  { %v1856_v36 = vmul.f32 %v1854_v50, %v1800_v30  ;;  %v1857_v53 = vmul.f32 %v1854_v50, %v1801_v60  ;;  %v1858_v57 = vmul.f32 %v1854_v50, %v1802_v20  ;;  %v1865_v38 = vstv %s4399_s14  ;;  %s4678_s14 = sld [smem:[#allocation7 + $0xf]] }
 0x18b   :  { %v1870_v32 = vstv %s4401_s1  ;;  %v4442_v55 = vstv %s4407_s15  ;;  %v4445_v22 = vstv %s4409_s16  ;;  %v4447_v62 = vadd.f32 %v1855_v7, %v1849_v1  ;;  %s4680_s1 = sld [smem:[#allocation7 + $0x87]] }
 0x18c   :  { %v4449_v24 = vadd.f32 %v1856_v36, %v1850_v23  ;;  %v4451_v44 = vadd.f32 %v1857_v53, %v1851_v59  ;;  %v4453_v4 = vadd.f32 %v1858_v57, %v1852_v10  ;;  %v1866_v29 = vmul.f32 %v4112_v17, %v1865_v38 }
 0x18d   :  { %v1867_v61 = vmul.f32 %v4118_v19, %v1865_v38  ;;  %v1868_v50 = vmul.f32 %v4130_v26, %v1865_v38  ;;  %v1869_v34 = vmul.f32 %v4136_v56, %v1865_v38  ;;  %v1877_v30 = vmul.f32 %v4112_v17, %v4442_v55 }
 0x18e   :  { %v1878_v60 = vmul.f32 %v4118_v19, %v4442_v55  ;;  %v1879_v20 = vmul.f32 %v4130_v26, %v4442_v55  ;;  %v1880_v3 = vmul.f32 %v4136_v56, %v4442_v55  ;;  %v1871_v16 = vadd.f32 %v1870_v32, %v1866_v29 }
 0x18f   :  { %v1872_v58 = vadd.f32 %v1870_v32, %v1867_v61  ;;  %v1873_v25 = vadd.f32 %v1870_v32, %v1868_v50  ;;  %v1874_v15 = vadd.f32 %v1870_v32, %v1869_v34  ;;  %v1885_v47 = vrot.slane %v1877_v30, 1 }
 0x190   :  { %v1886_v21 = vrot.slane %v1878_v60, 1  ;;  %v1887_v51 = vrot.slane %v1879_v20, 1  ;;  %v1888_v37 = vrot.slane %v1880_v3, 1  ;;  %v1899_v42 = vmul.f32 %v4112_v17, %v4445_v22 }
 0x191   :  { %v1900_v54 = vmul.f32 %v4118_v19, %v4445_v22  ;;  %v1901_v14 = vmul.f32 %v4130_v26, %v4445_v22  ;;  %v1902_v33 = vmul.f32 %v4136_v56, %v4445_v22  ;;  %v1893_v18 = vadd.f32 %v1885_v47, %v1871_v16 }
 0x192   :  { %v1894_v13 = vadd.f32 %v1886_v21, %v1872_v58  ;;  %v1895_v1 = vadd.f32 %v1887_v51, %v1873_v25  ;;  %v1896_v23 = vadd.f32 %v1888_v37, %v1874_v15  ;;  %v1907_v59 = vrot.slane %v1899_v42, 2 }
 0x193   :  { %v1908_v10 = vrot.slane %v1900_v54, 2  ;;  %v1909_v7 = vrot.slane %v1901_v14, 2  ;;  %v1910_v36 = vrot.slane %v1902_v33, 2  ;;  %v1920_v53 = vstv %s2930_s17 }
 0x194   :  { %v1949_v57 = vmul.f32 %v4163_v43, %v1865_v38  ;;  %v1950_v29 = vmul.f32 %v4175_v45, %v1865_v38  ;;  %v1951_v61 = vmul.f32 %v4016_v46, %v1865_v38  ;;  %v1915_v50 = vadd.f32 %v1907_v59, %v1893_v18 }
 0x195   :  { %v1916_v34 = vadd.f32 %v1908_v10, %v1894_v13  ;;  %v1917_v30 = vadd.f32 %v1909_v7, %v1895_v1  ;;  %v1918_v60 = vadd.f32 %v1910_v36, %v1896_v23  ;;  %v1921_v20 = vmul.f32 %v1920_v53, %v3634_v40 }
 0x196   :  { %v1922_v3 = vmul.f32 %v1920_v53, %v3637_v27  ;;  %v1923_v16 = vmul.f32 %v1920_v53, %v3640_v11  ;;  %v1924_v58 = vmul.f32 %v1920_v53, %v3643_v12  ;;  %v1928_v25 = vrot.slane %v1915_v50, %v3177_v28 }
 0x197   :  { %v1932_v15 = vrot.slane %v1916_v34, %v3177_v28  ;;  %v1936_v47 = vrot.slane %v1917_v30, %v3177_v28  ;;  %v1940_v21 = vrot.slane %v1918_v60, %v3177_v28  ;;  %v1952_v51 = vmul.f32 %v4023_v49, %v1865_v38 }
 0x198   :  { %v1953_v37 = vadd.f32 %v1949_v57, %v1870_v32  ;;  %v1954_v42 = vadd.f32 %v1950_v29, %v1870_v32  ;;  %v1955_v54 = vadd.f32 %v1951_v61, %v1870_v32  ;;  %v1941_v14 = vadd.f32 %v1928_v25, %v1921_v20 }
 0x199   :  { %v1942_v33 = vadd.f32 %v1932_v15, %v1922_v3  ;;  %v1943_v18 = vadd.f32 %v1936_v47, %v1923_v16  ;;  %v1944_v13 = vadd.f32 %v1940_v21, %v1924_v58  ;;  %v1956_v1 = vadd.f32 %v1952_v51, %v1870_v32 }
 0x19a   :  { %v1957_v23 = vmul.f32 %v4163_v43, %v4442_v55  ;;  %v1958_v59 = vmul.f32 %v4175_v45, %v4442_v55  ;;  %v1959_v38 = vmul.f32 %v4016_v46, %v4442_v55  ;;  %v4499_v10 = vmax.f32 %v1941_v14, 0.0 }
 0x19b   :  { %v4501_v7 = vmax.f32 %v1942_v33, 0.0  ;;  %v4503_v36 = vmax.f32 %v1943_v18, 0.0  ;;  %v4505_v57 = vmax.f32 %v1944_v13, 0.0  ;;  %v1960_v32 = vmul.f32 %v4023_v49, %v4442_v55 }
 0x19c   :  { %v1965_v29 = vrot.slane %v1957_v23, 1  ;;  %v1966_v61 = vrot.slane %v1958_v59, 1  ;;  %v1967_v50 = vrot.slane %v1959_v38, 1  ;;  %v1977_v34 = vmul.f32 %v4163_v43, %v4445_v22 }
 0x19d   :  { %v1978_v30 = vmul.f32 %v4175_v45, %v4445_v22  ;;  %v1979_v60 = vmul.f32 %v4016_v46, %v4445_v22  ;;  %v1980_v20 = vmul.f32 %v4023_v49, %v4445_v22  ;;  %v1968_v3 = vrot.slane %v1960_v32, 1 }
 0x19e   :  { %v1973_v16 = vadd.f32 %v1965_v29, %v1953_v37  ;;  %v1974_v58 = vadd.f32 %v1966_v61, %v1954_v42  ;;  %v1975_v55 = vadd.f32 %v1967_v50, %v1955_v54  ;;  %v1985_v25 = vrot.slane %v1977_v34, 2 }
 0x19f   :  { %v1986_v15 = vrot.slane %v1978_v30, 2  ;;  %v1987_v47 = vrot.slane %v1979_v60, 2  ;;  %v1988_v21 = vrot.slane %v1980_v20, 2  ;;  %v1976_v51 = vadd.f32 %v1968_v3, %v1956_v1 }
 0x1a0   :  { %v1997_v14 = vmul.f32 %v1920_v53, %v3694_v39  ;;  %v1998_v33 = vmul.f32 %v1920_v53, %v3697_v5  ;;  %v1999_v46 = vmul.f32 %v1920_v53, %v3700_v31  ;;  %v1993_v18 = vadd.f32 %v1985_v25, %v1973_v16 }
 0x1a1   :  { %v1994_v49 = vadd.f32 %v1986_v15, %v1974_v58  ;;  %v1995_v22 = vadd.f32 %v1987_v47, %v1975_v55  ;;  %v2000_v37 = vmul.f32 %v1920_v53, %v3703_v41  ;;  %v1996_v42 = vadd.f32 %v1988_v21, %v1976_v51 }
 0x1a2   :  { %v2026_v13 = vstv %s4487_s18  ;;  %v2036_v54 = vstv %s4489_s19  ;;  %v2046_v23 = vstv %s4497_s20  ;;  %v2004_v59 = vrot.slane %v1993_v18, %v3125_v6  ;;  %s4692_s19 = sld [smem:[#allocation7 + $0x8f]] }
 0x1a3   :  { %v2008_v1 = vrot.slane %v1994_v49, %v3125_v6  ;;  %v2012_v38 = vrot.slane %v1995_v22, %v3125_v6  ;;  %v2027_v32 = vmul.f32 %v2026_v13, %v4499_v10  ;;  %v2016_v29 = vrot.slane %v1996_v42, %v3125_v6  ;;  %s4726_s20 = sld [smem:[#allocation7 + $0x107]] }
 0x1a4   :  { %v2028_v53 = vmul.f32 %v2026_v13, %v4501_v7  ;;  %v2029_v61 = vmul.f32 %v2026_v13, %v4503_v36  ;;  %v2030_v50 = vmul.f32 %v2026_v13, %v4505_v57  ;;  %v2017_v34 = vadd.f32 %v2004_v59, %v1997_v14 }
 0x1a5   :  { %v2018_v30 = vadd.f32 %v2008_v1, %v1998_v33  ;;  %v2019_v60 = vadd.f32 %v2012_v38, %v1999_v46  ;;  %v2031_v20 = vadd.f32 %v2027_v32, %v4415_v9  ;;  %v2020_v3 = vadd.f32 %v2016_v29, %v2000_v37 }
 0x1a6   :  { %v2032_v16 = vadd.f32 %v2028_v53, %v4417_v52  ;;  %v2033_v58 = vadd.f32 %v2029_v61, %v4419_v2  ;;  %v2034_v55 = vadd.f32 %v2030_v50, %v4421_v0  ;;  %v2021_v25 = vmax.f32 %v2017_v34, 0.0 }
 0x1a7   :  { %v2022_v15 = vmax.f32 %v2018_v30, 0.0  ;;  %v2023_v47 = vmax.f32 %v2019_v60, 0.0  ;;  %v2047_v21 = vmul.f32 %v2046_v23, %v4499_v10  ;;  %v2024_v51 = vmax.f32 %v2020_v3, 0.0 }
 0x1a8   :  { %v2048_v14 = vmul.f32 %v2046_v23, %v4501_v7  ;;  %v2049_v9 = vmul.f32 %v2046_v23, %v4503_v36  ;;  %v2050_v33 = vmul.f32 %v2046_v23, %v4505_v57  ;;  %v2037_v46 = vmul.f32 %v2036_v54, %v2021_v25 }
 0x1a9   :  { %v2038_v18 = vmul.f32 %v2036_v54, %v2022_v15  ;;  %v2039_v52 = vmul.f32 %v2036_v54, %v2023_v47  ;;  %v2051_v2 = vadd.f32 %v2047_v21, %v4427_v35  ;;  %v2040_v0 = vmul.f32 %v2036_v54, %v2024_v51 }
 0x1aa   :  { %v2052_v49 = vadd.f32 %v2048_v14, %v4429_v63  ;;  %v2053_v22 = vadd.f32 %v2049_v9, %v4431_v48  ;;  %v2054_v37 = vadd.f32 %v2050_v33, %v4433_v8  ;;  %v4556_v42 = vadd.f32 %v2037_v46, %v2031_v20 }
 0x1ab   :  { %v4558_v13 = vadd.f32 %v2038_v18, %v2032_v16  ;;  %v4560_v23 = vadd.f32 %v2039_v52, %v2033_v58  ;;  %v2056_v35 = vstv %s4530_s22  ;;  %v4565_v54 = vadd.f32 %v2040_v0, %v2034_v55  ;;  %v4619_v52 = vld [vmem:[%s4989_s0] sm:$0x38]  ;;  %v4626_v0 = vld [vmem:[%s4989_s0 + $0x8] sm:$0x38] }
 0x1ac   :  { %v2057_v63 = vmul.f32 %v2056_v35, %v2021_v25  ;;  %v2058_v59 = vmul.f32 %v2056_v35, %v2022_v15  ;;  %v2059_v1 = vmul.f32 %v2056_v35, %v2023_v47  ;;  %v2060_v48 = vmul.f32 %v2056_v35, %v2024_v51  ;;  %5162 = vst [vmem:[#allocation16_spill] sm:$0xff] %v4619_v52 }
 0x1ad   :  { %v2066_v8 = vstv %s4536_s23  ;;  %v2076_v38 = vstv %s4539_s24  ;;  %v4572_v32 = vstv %s4524_s21  ;;  %5163 = vst [vmem:[#allocation17_spill] sm:$0xff] %v4626_v0  ;;  %s4728_s21 = sld [smem:[#allocation7 + $0x10f]] }
 0x1ae   :  { %v4574_v29 = vadd.f32 %v2057_v63, %v2051_v2  ;;  %v4576_v53 = vadd.f32 %v2058_v59, %v2052_v49  ;;  %v4578_v61 = vadd.f32 %v2059_v1, %v2053_v22  ;;  %v2067_v50 = vmul.f32 %v2066_v8, %v4499_v10  ;;  %v4641_v59 = vld [vmem:[%s4989_s0 + $0x20] sm:$0x38] }
 0x1af   :  { %v4581_v34 = vadd.f32 %v2060_v48, %v2054_v37  ;;  %v2068_v30 = vmul.f32 %v2066_v8, %v4501_v7  ;;  %v2069_v60 = vmul.f32 %v2066_v8, %v4503_v36  ;;  %v2070_v20 = vmul.f32 %v2066_v8, %v4505_v57  ;;  %5164 = vst [vmem:[#allocation18_spill] sm:$0xff] %v4641_v59 }
 0x1b0   :  { %v2071_v3 = vadd.f32 %v2067_v50, %v4447_v62  ;;  %v2077_v16 = vmul.f32 %v2076_v38, %v2021_v25  ;;  %v2078_v58 = vmul.f32 %v2076_v38, %v2022_v15  ;;  %v2079_v55 = vmul.f32 %v2076_v38, %v2023_v47 }
 0x1b1   :  { %v2072_v21 = vadd.f32 %v2068_v30, %v4449_v24  ;;  %v2073_v10 = vadd.f32 %v2069_v60, %v4451_v44  ;;  %v2074_v14 = vadd.f32 %v2070_v20, %v4453_v4  ;;  %v2080_v7 = vmul.f32 %v2076_v38, %v2024_v51 }
 0x1b2   :  { %v4590_v9 = vadd.f32 %v2077_v16, %v2071_v3  ;;  %v2088_v36 = vmul.f32 %v4112_v17, %v4572_v32  ;;  %v2089_v62 = vmul.f32 %v4118_v19, %v4572_v32  ;;  %v2090_v57 = vmul.f32 %v4130_v26, %v4572_v32 }
 0x1b3   :  { %v4598_v25 = vadd.f32 %v2078_v58, %v2072_v21  ;;  %v4600_v15 = vadd.f32 %v2079_v55, %v2073_v10  ;;  %v4602_v24 = vadd.f32 %v2080_v7, %v2074_v14  ;;  %v2091_v44 = vmul.f32 %v4136_v56, %v4572_v32 }
 0x1b4   :  { %v2092_v4 = vstv %s4549_s25  ;;  %v4608_v47 = vstv %s4554_s26  ;;  %v4611_v51 = vstv %s4563_s27  ;;  %v4614_v17 = vstv %s4567_s28 }
 0x1b5   :  { %v2093_v19 = vadd.f32 %v2092_v4, %v2088_v36  ;;  %v2094_v33 = vadd.f32 %v2092_v4, %v2089_v62  ;;  %v2095_v46 = vadd.f32 %v2092_v4, %v2090_v57  ;;  %v2096_v18 = vadd.f32 %v2092_v4, %v2091_v44 }
 0x1b6   :  { %v2099_v2 = vmul.f32 %v4619_v52, %v4608_v47  ;;  %v2100_v49 = vmul.f32 %v4626_v0, %v4608_v47  ;;  %v2101_v22 = vmul.f32 %v4130_v26, %v4608_v47  ;;  %v2102_v37 = vmul.f32 %v4136_v56, %v4608_v47  ;;  %v4648_v26 = vld [vmem:[%s4989_s0 + $0x28] sm:$0x38] }
 0x1b7   :  { %v2121_v35 = vmul.f32 %v4619_v52, %v4611_v51  ;;  %v2122_v63 = vmul.f32 %v4626_v0, %v4611_v51  ;;  %v2123_v1 = vmul.f32 %v4641_v59, %v4611_v51  ;;  %5165 = vst [vmem:[#allocation19_spill] sm:$0xff] %v4648_v26  ;;  %v2124_v56 = vmul.f32 %v4648_v26, %v4611_v51 }
 0x1b8   :  { %v2107_v48 = vrot.slane %v2099_v2, 1  ;;  %v2108_v8 = vrot.slane %v2100_v49, 1  ;;  %v2109_v38 = vrot.slane %v2101_v22, 1  ;;  %v2110_v50 = vrot.slane %v2102_v37, 1  ;;  %v2982_v49 = vld [vmem:[%s4989_s0 + $0x28] sm:$0x7] }
 0x1b9   :  { %v2129_v30 = vrot.slane %v2121_v35, 2  ;;  %v2130_v60 = vrot.slane %v2122_v63, 2  ;;  %v2131_v20 = vrot.slane %v2123_v1, 2  ;;  %v2132_v3 = vrot.slane %v2124_v56, 2 }
 0x1ba   :  { %v2115_v16 = vadd.f32 %v2107_v48, %v2093_v19  ;;  %v2116_v58 = vadd.f32 %v2108_v8, %v2094_v33  ;;  %v2117_v55 = vadd.f32 %v2109_v38, %v2095_v46  ;;  %v2118_v21 = vadd.f32 %v2110_v50, %v2096_v18  ;;  %v2981_v46 = vld [vmem:[%s4989_s0 + $0x20] sm:$0x7] }
 0x1bb   :  { %v2143_v10 = vmul.f32 %v4614_v17, %v3634_v40  ;;  %v2144_v14 = vmul.f32 %v4614_v17, %v3637_v27  ;;  %v2145_v7 = vmul.f32 %v4614_v17, %v3640_v11  ;;  %v2146_v36 = vmul.f32 %v4614_v17, %v3643_v12 }
 0x1bc   :  { %v2137_v62 = vadd.f32 %v2129_v30, %v2115_v16  ;;  %v2138_v57 = vadd.f32 %v2130_v60, %v2116_v58  ;;  %v2139_v44 = vadd.f32 %v2131_v20, %v2117_v55  ;;  %v2140_v2 = vadd.f32 %v2132_v3, %v2118_v21  ;;  %v2983_v30 = vld [vmem:[%s4989_s0] sm:$0x7]  ;;  %v2984_v60 = vld [vmem:[%s4989_s0 + $0x8] sm:$0x7] }
 0x1bd   :  { %v2171_v19 = vmul.f32 %v4163_v43, %v4572_v32  ;;  %v2172_v33 = vmul.f32 %v4175_v45, %v4572_v32  ;;  %v2173_v18 = vmul.f32 %v2981_v46, %v4572_v32  ;;  %v2174_v22 = vmul.f32 %v2982_v49, %v4572_v32 }
 0x1be   :  { %v2150_v37 = vrot.slane %v2137_v62, %v3177_v28  ;;  %v2154_v35 = vrot.slane %v2138_v57, %v3177_v28  ;;  %v2158_v43 = vrot.slane %v2139_v44, %v3177_v28  ;;  %v2162_v45 = vrot.slane %v2140_v2, %v3177_v28 }
 0x1bf   :  { %v2175_v63 = vadd.f32 %v2171_v19, %v2092_v4  ;;  %v2176_v1 = vadd.f32 %v2172_v33, %v2092_v4  ;;  %v2177_v56 = vadd.f32 %v2173_v18, %v2092_v4  ;;  %v2178_v48 = vadd.f32 %v2174_v22, %v2092_v4 }
 0x1c0   :  { %v2163_v8 = vadd.f32 %v2150_v37, %v2143_v10  ;;  %v2164_v38 = vadd.f32 %v2154_v35, %v2144_v14  ;;  %v2165_v50 = vadd.f32 %v2158_v43, %v2145_v7  ;;  %v2166_v32 = vadd.f32 %v2162_v45, %v2146_v36 }
 0x1c1   :  { %v2179_v28 = vmul.f32 %v2983_v30, %v4608_v47  ;;  %v2180_v4 = vmul.f32 %v2984_v60, %v4608_v47  ;;  %v2181_v20 = vmul.f32 %v2981_v46, %v4608_v47  ;;  %v2182_v3 = vmul.f32 %v2982_v49, %v4608_v47 }
 0x1c2   :  { %v4694_v16 = vmax.f32 %v2163_v8, 0.0  ;;  %v4696_v58 = vmax.f32 %v2164_v38, 0.0  ;;  %v4698_v55 = vmax.f32 %v2165_v50, 0.0  ;;  %v4700_v21 = vmax.f32 %v2166_v32, 0.0 }
 0x1c3   :  { %v2187_v10 = vrot.slane %v2179_v28, 1  ;;  %v2188_v14 = vrot.slane %v2180_v4, 1  ;;  %v2189_v7 = vrot.slane %v2181_v20, 1  ;;  %v2190_v36 = vrot.slane %v2182_v3, 1 }
 0x1c4   :  { %v2199_v62 = vmul.f32 %v2983_v30, %v4611_v51  ;;  %v2200_v57 = vmul.f32 %v2984_v60, %v4611_v51  ;;  %v2201_v47 = vmul.f32 %v2981_v46, %v4611_v51  ;;  %v2202_v44 = vmul.f32 %v2982_v49, %v4611_v51 }
 0x1c5   :  { %v2195_v2 = vadd.f32 %v2187_v10, %v2175_v63  ;;  %v2196_v19 = vadd.f32 %v2188_v14, %v2176_v1  ;;  %v2197_v33 = vadd.f32 %v2189_v7, %v2177_v56  ;;  %v2198_v18 = vadd.f32 %v2190_v36, %v2178_v48 }
 0x1c6   :  { %v2207_v22 = vrot.slane %v2199_v62, 2  ;;  %v2208_v37 = vrot.slane %v2200_v57, 2  ;;  %v2209_v35 = vrot.slane %v2201_v47, 2  ;;  %v2210_v43 = vrot.slane %v2202_v44, 2 }
 0x1c7   :  { %v2219_v45 = vmul.f32 %v4614_v17, %v3694_v39  ;;  %v2220_v46 = vmul.f32 %v4614_v17, %v3697_v5  ;;  %v2221_v51 = vmul.f32 %v4614_v17, %v3700_v31  ;;  %v2222_v49 = vmul.f32 %v4614_v17, %v3703_v41 }
 0x1c8   :  { %v2215_v63 = vadd.f32 %v2207_v22, %v2195_v2  ;;  %v2216_v1 = vadd.f32 %v2208_v37, %v2196_v19  ;;  %v2217_v56 = vadd.f32 %v2209_v35, %v2197_v33  ;;  %v2218_v48 = vadd.f32 %v2210_v43, %v2198_v18 }
 0x1c9   :  { %v2248_v8 = vstv %s4676_s5  ;;  %v2258_v38 = vstv %s4678_s14  ;;  %v2268_v50 = vstv %s4680_s1  ;;  %v2278_v32 = vstv %s4692_s19 }
 0x1ca   :  { %v2226_v30 = vrot.slane %v2215_v63, %v3125_v6  ;;  %v2230_v39 = vrot.slane %v2216_v1, %v3125_v6  ;;  %v2234_v5 = vrot.slane %v2217_v56, %v3125_v6  ;;  %v2238_v28 = vrot.slane %v2218_v48, %v3125_v6 }
 0x1cb   :  { %v2249_v31 = vmul.f32 %v2248_v8, %v4694_v16  ;;  %v2250_v41 = vmul.f32 %v2248_v8, %v4696_v58  ;;  %v2251_v17 = vmul.f32 %v2248_v8, %v4698_v55  ;;  %v2252_v60 = vmul.f32 %v2248_v8, %v4700_v21 }
 0x1cc   :  { %v2239_v4 = vadd.f32 %v2226_v30, %v2219_v45  ;;  %v2240_v20 = vadd.f32 %v2230_v39, %v2220_v46  ;;  %v2241_v3 = vadd.f32 %v2234_v5, %v2221_v51  ;;  %v2242_v10 = vadd.f32 %v2238_v28, %v2222_v49 }
 0x1cd   :  { %v2253_v14 = vadd.f32 %v2249_v31, %v4556_v42  ;;  %v2254_v7 = vadd.f32 %v2250_v41, %v4558_v13  ;;  %v2255_v36 = vadd.f32 %v2251_v17, %v4560_v23  ;;  %v2256_v62 = vadd.f32 %v2252_v60, %v4565_v54 }
 0x1ce   :  { %v2243_v57 = vmax.f32 %v2239_v4, 0.0  ;;  %v2244_v47 = vmax.f32 %v2240_v20, 0.0  ;;  %v2245_v44 = vmax.f32 %v2241_v3, 0.0  ;;  %v2246_v2 = vmax.f32 %v2242_v10, 0.0 }
 0x1cf   :  { %v2269_v19 = vmul.f32 %v2268_v50, %v4694_v16  ;;  %v2270_v33 = vmul.f32 %v2268_v50, %v4696_v58  ;;  %v2271_v18 = vmul.f32 %v2268_v50, %v4698_v55  ;;  %v2272_v22 = vmul.f32 %v2268_v50, %v4700_v21 }
 0x1d0   :  { %v2259_v37 = vmul.f32 %v2258_v38, %v2243_v57  ;;  %v2260_v42 = vmul.f32 %v2258_v38, %v2244_v47  ;;  %v2261_v13 = vmul.f32 %v2258_v38, %v2245_v44  ;;  %v2262_v23 = vmul.f32 %v2258_v38, %v2246_v2 }
 0x1d1   :  { %v2273_v54 = vadd.f32 %v2269_v19, %v4574_v29  ;;  %v2274_v35 = vadd.f32 %v2270_v33, %v4576_v53  ;;  %v2275_v43 = vadd.f32 %v2271_v18, %v4578_v61  ;;  %v2276_v45 = vadd.f32 %v2272_v22, %v4581_v34 }
 0x1d2   :  { %v2263_v46 = vadd.f32 %v2259_v37, %v2253_v14  ;;  %v2264_v51 = vadd.f32 %v2260_v42, %v2254_v7  ;;  %v2265_v49 = vadd.f32 %v2261_v13, %v2255_v36  ;;  %v2266_v63 = vadd.f32 %v2262_v23, %v2256_v62  ;;  %v2320_v62 = vpop.permute.xlu0 %2319 }
 0x1d3   :  { %v2279_v1 = vmul.f32 %v2278_v32, %v2243_v57  ;;  %v2280_v56 = vmul.f32 %v2278_v32, %v2244_v47  ;;  %v2281_v48 = vmul.f32 %v2278_v32, %v2245_v44  ;;  %v2282_v8 = vmul.f32 %v2278_v32, %v2246_v2 }
 0x1d4   :  { %v2288_v50 = vstv %s4726_s20  ;;  %v2298_v30 = vstv %s4728_s21  ;;  %v4745_v38 = vmul.f32 %v2263_v46, %v3634_v40  ;;  %v4748_v29 = vmul.f32 %v2264_v51, %v3637_v27 }
 0x1d5   :  { %v2283_v53 = vadd.f32 %v2279_v1, %v2273_v54  ;;  %v2284_v61 = vadd.f32 %v2280_v56, %v2274_v35  ;;  %v2285_v39 = vadd.f32 %v2281_v48, %v2275_v43  ;;  %v2286_v34 = vadd.f32 %v2282_v8, %v2276_v45 }
 0x1d6   :  { %v2289_v5 = vmul.f32 %v2288_v50, %v4694_v16  ;;  %v2290_v28 = vmul.f32 %v2288_v50, %v4696_v58  ;;  %v2291_v31 = vmul.f32 %v2288_v50, %v4698_v55  ;;  %v2292_v32 = vmul.f32 %v2288_v50, %v4700_v21 }
 0x1d7   :  { %v2299_v41 = vmul.f32 %v2298_v30, %v2243_v57  ;;  %v2300_v17 = vmul.f32 %v2298_v30, %v2244_v47  ;;  %v2301_v60 = vmul.f32 %v2298_v30, %v2245_v44  ;;  %v2302_v4 = vmul.f32 %v2298_v30, %v2246_v2 }
 0x1d8   :  { %v2293_v20 = vadd.f32 %v2289_v5, %v4590_v9  ;;  %v2294_v3 = vadd.f32 %v2290_v28, %v4598_v25  ;;  %v2295_v10 = vadd.f32 %v2291_v31, %v4600_v15  ;;  %v2296_v14 = vadd.f32 %v2292_v32, %v4602_v24  ;;  %v2313_v15 = vpop.permute.xlu1 %2312 }
 0x1d9   :  { %v4759_v16 = vmul.f32 %v2265_v49, %v3640_v11  ;;  %v4762_v58 = vmul.f32 %v2266_v63, %v3643_v12  ;;  %v4765_v55 = vmul.f32 %v2283_v53, %v3634_v40  ;;  %v4768_v21 = vmul.f32 %v2284_v61, %v3637_v27 }
 0x1da   :  { %v2303_v7 = vadd.f32 %v2299_v41, %v2293_v20  ;;  %v2304_v9 = vadd.f32 %v2300_v17, %v2294_v3  ;;  %v2305_v36 = vadd.f32 %v2301_v60, %v2295_v10  ;;  %v2306_v25 = vadd.f32 %v2302_v4, %v2296_v14 }
 0x1db   :  { %v4771_v24 = vmul.f32 %v2285_v39, %v3640_v11  ;;  %v4774_v57 = vmul.f32 %v2286_v34, %v3643_v12  ;;  %v2341_v47 = vmul.f32 %v4745_v38, %v3634_v40  ;;  %v2342_v44 = vmul.f32 %v4748_v29, %v3637_v27 }
 0x1dc   :  { %v2948_v2 = vadd.f32 -1.0, %v2303_v7  ;;  %v2949_v19 = vadd.f32 -1.0, %v2304_v9  ;;  %v2950_v33 = vadd.f32 -1.0, %v2305_v36  ;;  %v2951_v18 = vadd.f32 -1.0, %v2306_v25 }
 0x1dd   :  { %v2343_v22 = vmul.f32 %v4759_v16, %v3640_v11  ;;  %v2344_v37 = vmul.f32 %v4762_v58, %v3643_v12  ;;  %v2349_v42 = vmul.f32 %v4765_v55, %v3634_v40  ;;  %v2350_v13 = vmul.f32 %v4768_v21, %v3637_v27 }
 0x1de   :  { %v2333_v23 = vmul.f32 %v2948_v2, %v2313_v15  ;;  %v2334_v54 = vmul.f32 %v2949_v19, %v2313_v15  ;;  %v2335_v35 = vmul.f32 %v2950_v33, %v2320_v62  ;;  %v2336_v43 = vmul.f32 %v2951_v18, %v2320_v62 }
 0x1df   :  { %v2351_v45 = vmul.f32 %v4771_v24, %v3640_v11  ;;  %v2352_v46 = vmul.f32 %v4774_v57, %v3643_v12  ;;  %v4793_v51 = vsub.f32 1.0, %v3634_v40  ;;  %v4796_v49 = vsub.f32 1.0, %v3637_v27 }
 0x1e0   :  { %v4799_v63 = vmul.f32 %v2333_v23, %v3634_v40  ;;  %v4802_v1 = vmul.f32 %v2334_v54, %v3637_v27  ;;  %v4805_v56 = vmul.f32 %v2335_v35, %v3640_v11  ;;  %v4808_v48 = vmul.f32 %v2336_v43, %v3643_v12 }
 0x1e1   :  { %5166 = vst [vmem:[#allocation22_spill] sm:$0xff] %v4793_v51  ;;  %5167 = vst [vmem:[#allocation23_spill] sm:$0xff] %v4796_v49  ;;  %v4811_v8 = vsub.f32 1.0, %v3640_v11  ;;  %v4814_v50 = vsub.f32 1.0, %v3643_v12  ;;  %v2373_v30 = vrot.slane %v4793_v51, 7  ;;  %v2374_v53 = vrot.slane %v4796_v49, 7 }
 0x1e2   :  { %5168 = vst [vmem:[#allocation26_spill] sm:$0xff] %v4799_v63  ;;  %5169 = vst [vmem:[#allocation27_spill] sm:$0xff] %v4802_v1  ;;  %v2357_v61 = vmul.f32 %v4799_v63, %v3634_v40  ;;  %v2358_v39 = vmul.f32 %v4802_v1, %v3637_v27  ;;  %v2359_v34 = vmul.f32 %v4805_v56, %v3640_v11  ;;  %v2445_v17 = vrot.slane %v4793_v51, 1 }
 0x1e3   :  { %5170 = vst [vmem:[#allocation20_spill] sm:$0xff] %v4811_v8  ;;  %5171 = vst [vmem:[#allocation21_spill] sm:$0xff] %v4814_v50  ;;  %v2360_v5 = vmul.f32 %v4808_v48, %v3643_v12  ;;  %v2375_v28 = vrot.slane %v4811_v8, 7  ;;  %v2376_v31 = vrot.slane %v4814_v50, 7  ;;  %v2381_v32 = vmul.f32 %v2373_v30, %v3634_v40 }
 0x1e4   :  { %v2382_v41 = vmul.f32 %v2374_v53, %v3637_v27  ;;  %v2446_v60 = vrot.slane %v4796_v49, 1  ;;  %v2447_v4 = vrot.slane %v4811_v8, 1  ;;  %v2448_v20 = vrot.slane %v4814_v50, 1 }
 0x1e5   :  { %v2383_v3 = vmul.f32 %v2375_v28, %v3640_v11  ;;  %v2384_v10 = vmul.f32 %v2376_v31, %v3643_v12  ;;  %v2385_v14 = vmul.f32 %v2381_v32, %v4745_v38  ;;  %v2405_v9 = vmul.f32 %v2381_v32, %v4765_v55 }
 0x1e6   :  { %v2386_v7 = vmul.f32 %v2382_v41, %v4748_v29  ;;  %v2406_v36 = vmul.f32 %v2382_v41, %v4768_v21  ;;  %v2425_v25 = vmul.f32 %v2381_v32, %v4799_v63  ;;  %v2426_v62 = vmul.f32 %v2382_v41, %v4802_v1 }
 0x1e7   :  { %v2387_v15 = vmul.f32 %v2383_v3, %v4759_v16  ;;  %v2388_v2 = vmul.f32 %v2384_v10, %v4762_v58  ;;  %v2393_v19 = vrot.slane %v2385_v14, 1  ;;  %v2407_v18 = vmul.f32 %v2383_v3, %v4771_v24 }
 0x1e8   :  { %v2394_v33 = vrot.slane %v2386_v7, 1  ;;  %v2408_v23 = vmul.f32 %v2384_v10, %v4774_v57  ;;  %v2413_v54 = vrot.slane %v2405_v9, 1  ;;  %v2414_v35 = vrot.slane %v2406_v36, 1 }
 0x1e9   :  { %v2395_v43 = vrot.slane %v2387_v15, 1  ;;  %v2396_v30 = vrot.slane %v2388_v2, 1  ;;  %v2401_v53 = vadd.f32 %v2393_v19, %v2341_v47  ;;  %v2415_v31 = vrot.slane %v2407_v18, 1 }
 0x1ea   :  { %v2402_v28 = vadd.f32 %v2394_v33, %v2342_v44  ;;  %v2416_v32 = vrot.slane %v2408_v23, 1  ;;  %v2421_v26 = vadd.f32 %v2413_v54, %v2349_v42  ;;  %v2422_v41 = vadd.f32 %v2414_v35, %v2350_v13 }
 0x1eb   :  { %v2403_v59 = vadd.f32 %v2395_v43, %v2343_v22  ;;  %v2404_v0 = vadd.f32 %v2396_v30, %v2344_v37  ;;  %v2427_v52 = vmul.f32 %v2383_v3, %v4805_v56  ;;  %v2428_v14 = vmul.f32 %v2384_v10, %v4808_v48 }
 0x1ec   :  { %v2423_v7 = vadd.f32 %v2415_v31, %v2351_v45  ;;  %v2424_v6 = vadd.f32 %v2416_v32, %v2352_v46  ;;  %v2433_v1 = vrot.slane %v2425_v25, 1  ;;  %v2434_v63 = vrot.slane %v2426_v62, 1 }
 0x1ed   :  { %v2435_v9 = vrot.slane %v2427_v52, 1  ;;  %v2436_v36 = vrot.slane %v2428_v14, 1  ;;  %v2453_v15 = vmul.f32 %v2445_v17, %v4793_v51  ;;  %v2454_v47 = vmul.f32 %v2446_v60, %v4796_v49 }
 0x1ee   :  { %v2441_v44 = vadd.f32 %v2433_v1, %v2357_v61  ;;  %v2442_v2 = vadd.f32 %v2434_v63, %v2358_v39  ;;  %v2455_v42 = vmul.f32 %v2447_v4, %v4811_v8  ;;  %v2456_v22 = vmul.f32 %v2448_v20, %v4814_v50 }
 0x1ef   :  { %v2443_v37 = vadd.f32 %v2435_v9, %v2359_v34  ;;  %v2444_v13 = vadd.f32 %v2436_v36, %v2360_v5  ;;  %v2461_v3 = vrot.slane %v2453_v15, 6  ;;  %v2462_v10 = vrot.slane %v2454_v47, 6 }
 0x1f0   :  { %v2463_v45 = vrot.slane %v2455_v42, 6  ;;  %v2464_v46 = vrot.slane %v2456_v22, 6  ;;  %v2533_v25 = vrot.slane %v4793_v51, 2  ;;  %v2534_v52 = vrot.slane %v4796_v49, 2  ;;  %v5173_v49 = vld [vmem:[#allocation27_spill] sm:$0xff] }
 0x1f1   :  { %v2469_v17 = vmul.f32 %v2461_v3, %v3634_v40  ;;  %v2470_v60 = vmul.f32 %v2462_v10, %v3637_v27  ;;  %v2535_v63 = vrot.slane %v4811_v8, 2  ;;  %v2536_v1 = vrot.slane %v4814_v50, 2  ;;  %v5172_v50 = vld [vmem:[#allocation26_spill] sm:$0xff] }
 0x1f2   :  { %v2471_v61 = vmul.f32 %v2463_v45, %v3640_v11  ;;  %v2472_v39 = vmul.f32 %v2464_v46, %v3643_v12  ;;  %v4860_v34 = vmul.f32 %v2533_v25, %v2453_v15  ;;  %v4862_v5 = vmul.f32 %v2534_v52, %v2454_v47 }
 0x1f3   :  { %v2473_v4 = vmul.f32 %v2469_v17, %v4745_v38  ;;  %v2474_v20 = vmul.f32 %v2470_v60, %v4748_v29  ;;  %v2493_v62 = vmul.f32 %v2469_v17, %v4765_v55  ;;  %v2494_v19 = vmul.f32 %v2470_v60, %v4768_v21 }
 0x1f4   :  { %v2475_v33 = vmul.f32 %v2471_v61, %v4759_v16  ;;  %v2476_v18 = vmul.f32 %v2472_v39, %v4762_v58  ;;  %v2495_v23 = vmul.f32 %v2471_v61, %v4771_v24  ;;  %v2496_v54 = vmul.f32 %v2472_v39, %v4774_v57 }
 0x1f5   :  { %v2481_v35 = vrot.slane %v2473_v4, 2  ;;  %v2482_v43 = vrot.slane %v2474_v20, 2  ;;  %v2501_v30 = vrot.slane %v2493_v62, 2  ;;  %v2502_v31 = vrot.slane %v2494_v19, 2 }
 0x1f6   :  { %v2483_v32 = vrot.slane %v2475_v33, 2  ;;  %v2484_v14 = vrot.slane %v2476_v18, 2  ;;  %v2503_v9 = vrot.slane %v2495_v23, 2  ;;  %v2504_v36 = vrot.slane %v2496_v54, 2 }
 0x1f7   :  { %v2489_v15 = vadd.f32 %v2481_v35, %v2401_v53  ;;  %v2490_v47 = vadd.f32 %v2482_v43, %v2402_v28  ;;  %v2509_v3 = vadd.f32 %v2501_v30, %v2421_v26  ;;  %v2510_v10 = vadd.f32 %v2502_v31, %v2422_v41 }
 0x1f8   :  { %v2491_v45 = vadd.f32 %v2483_v32, %v2403_v59  ;;  %v2492_v46 = vadd.f32 %v2484_v14, %v2404_v0  ;;  %v2511_v25 = vadd.f32 %v2503_v9, %v2423_v7  ;;  %v2512_v52 = vadd.f32 %v2504_v36, %v2424_v6 }
 0x1f9   :  { %v2513_v8 = vmul.f32 %v2469_v17, %v5172_v50  ;;  %v2514_v51 = vmul.f32 %v2470_v60, %v5173_v49  ;;  %v2515_v4 = vmul.f32 %v2471_v61, %v4805_v56  ;;  %v2516_v20 = vmul.f32 %v2472_v39, %v4808_v48 }
 0x1fa   :  { %v2543_v62 = vmul.f32 %v2535_v63, %v2455_v42  ;;  %v2544_v19 = vmul.f32 %v2536_v1, %v2456_v22  ;;  %v2549_v33 = vrot.slane %v4860_v34, 5  ;;  %v2550_v53 = vrot.slane %v4862_v5, 5 }
 0x1fb   :  { %v2521_v26 = vrot.slane %v2513_v8, 2  ;;  %v2522_v28 = vrot.slane %v2514_v51, 2  ;;  %v2523_v59 = vrot.slane %v2515_v4, 2  ;;  %v2524_v0 = vrot.slane %v2516_v20, 2  ;;  %v5174_v4 = vld [vmem:[#allocation22_spill] sm:$0xff] }
 0x1fc   :  { %v2551_v41 = vrot.slane %v2543_v62, 5  ;;  %v2552_v6 = vrot.slane %v2544_v19, 5  ;;  %v2557_v7 = vmul.f32 %v2549_v33, %v3634_v40  ;;  %v2558_v17 = vmul.f32 %v2550_v53, %v3637_v27 }
 0x1fd   :  { %v2529_v60 = vadd.f32 %v2521_v26, %v2441_v44  ;;  %v2530_v61 = vadd.f32 %v2522_v28, %v2442_v2  ;;  %v2531_v18 = vadd.f32 %v2523_v59, %v2443_v37  ;;  %v2532_v39 = vadd.f32 %v2524_v0, %v2444_v13 }
 0x1fe   :  { %v2559_v42 = vmul.f32 %v2551_v41, %v3640_v11  ;;  %v2560_v22 = vmul.f32 %v2552_v6, %v3643_v12  ;;  %v2561_v63 = vmul.f32 %v2557_v7, %v4745_v38  ;;  %v2562_v51 = vmul.f32 %v2558_v17, %v4748_v29 }
 0x1ff   :  { %v2581_v8 = vmul.f32 %v2557_v7, %v4765_v55  ;;  %v2582_v1 = vmul.f32 %v2558_v17, %v4768_v21  ;;  %v2601_v40 = vmul.f32 %v2557_v7, %v5172_v50  ;;  %v2602_v27 = vmul.f32 %v2558_v17, %v5173_v49 }
 0x200   :  { %v2563_v44 = vmul.f32 %v2559_v42, %v4759_v16  ;;  %v2564_v2 = vmul.f32 %v2560_v22, %v4762_v58  ;;  %v2569_v37 = vrot.slane %v2561_v63, 3  ;;  %v2570_v11 = vrot.slane %v2562_v51, 3 }
 0x201   :  { %v2583_v12 = vmul.f32 %v2559_v42, %v4771_v24  ;;  %v2584_v38 = vmul.f32 %v2560_v22, %v4774_v57  ;;  %v2589_v13 = vrot.slane %v2581_v8, 3  ;;  %v2590_v29 = vrot.slane %v2582_v1, 3 }
 0x202   :  { %v2571_v23 = vrot.slane %v2563_v44, 3  ;;  %v2572_v55 = vrot.slane %v2564_v2, 3  ;;  %v2577_v54 = vadd.f32 %v2569_v37, %v2489_v15  ;;  %v2578_v21 = vadd.f32 %v2570_v11, %v2490_v47  ;;  %v5175_v15 = vld [vmem:[#allocation23_spill] sm:$0xff] }
 0x203   :  { %v2591_v35 = vrot.slane %v2583_v12, 3  ;;  %v2592_v50 = vrot.slane %v2584_v38, 3  ;;  %v2597_v43 = vadd.f32 %v2589_v13, %v2509_v3  ;;  %v2598_v49 = vadd.f32 %v2590_v29, %v2510_v10  ;;  %v5176_v3 = vld [vmem:[#allocation20_spill] sm:$0xff] }
 0x204   :  { %v2579_v30 = vadd.f32 %v2571_v23, %v2491_v45  ;;  %v2580_v16 = vadd.f32 %v2572_v55, %v2492_v46  ;;  %v2603_v58 = vmul.f32 %v2559_v42, %v4805_v56  ;;  %v2604_v31 = vmul.f32 %v2560_v22, %v4808_v48  ;;  %v5177_v45 = vld [vmem:[#allocation21_spill] sm:$0xff] }
 0x205   :  { %v2599_v32 = vadd.f32 %v2591_v35, %v2511_v25  ;;  %v2600_v24 = vadd.f32 %v2592_v50, %v2512_v52  ;;  %v2609_v14 = vrot.slane %v2601_v40, 3  ;;  %v2610_v57 = vrot.slane %v2602_v27, 3 }
 0x206   :  { %v2611_v9 = vrot.slane %v2603_v58, 3  ;;  %v2612_v36 = vrot.slane %v2604_v31, 3  ;;  %v2621_v20 = vrot.slane %v5174_v4, 3  ;;  %v2622_v47 = vrot.slane %v5175_v15, 3 }
 0x207   :  { %v2617_v33 = vadd.f32 %v2609_v14, %v2529_v60  ;;  %v2618_v53 = vadd.f32 %v2610_v57, %v2530_v61  ;;  %v2623_v10 = vrot.slane %v5176_v3, 3  ;;  %v2624_v46 = vrot.slane %v5177_v45, 3  ;;  %v82_v14 = vld [vmem:[%s4989_s0 + $0x10] sm:$0x1]  ;;  %v83_v57 = vld [vmem:[%s4989_s0 + $0x18] sm:$0x1] }
 0x208   :  { %v2619_v26 = vadd.f32 %v2611_v9, %v2531_v18  ;;  %v2620_v56 = vadd.f32 %v2612_v36, %v2532_v39  ;;  %v2629_v48 = vmul.f32 %v2621_v20, %v4860_v34  ;;  %v2630_v25 = vmul.f32 %v2622_v47, %v4862_v5  ;;  %v84_v9 = vld [vmem:[%s4989_s0 + $0x20] sm:$0xc0]  ;;  %v5179_v36 = vld [vmem:[#allocation16_spill] sm:$0xff]  ;;  %v5180_v20 = vld [vmem:[#allocation17_spill] sm:$0xff] }
 0x209   :  { %v2631_v52 = vmul.f32 %v2623_v10, %v2543_v62  ;;  %v2632_v28 = vmul.f32 %v2624_v46, %v2544_v19  ;;  %v2633_v59 = vmul.f32 -1.0, %v2577_v54  ;;  %v2634_v0 = vmul.f32 -1.0, %v2578_v21  ;;  %v5178_v21 = vld [vmem:[#allocation15_spill] sm:$0xff]  ;;  %v86_v3 = vld [vmem:[%s4989_s0 + $0x30] sm:$0x1]  ;;  %v5181_v45 = vld [vmem:[#allocation18_spill] sm:$0xff] }
 0x20a   :  { %v2635_v41 = vmul.f32 -1.0, %v2579_v30  ;;  %v2636_v6 = vmul.f32 -1.0, %v2580_v16  ;;  %v2637_v7 = vmul.f32 -1.0, %v2597_v43  ;;  %v2638_v17 = vmul.f32 -1.0, %v2598_v49  ;;  %v80_v30 = vld [vmem:[%s4989_s0] sm:$0xc0] }
 0x20b   :  { %v2639_v60 = vmul.f32 -1.0, %v2599_v32  ;;  %v2640_v61 = vmul.f32 -1.0, %v2600_v24  ;;  %v2641_v42 = vmul.f32 -1.0, %v2617_v33  ;;  %v2642_v22 = vmul.f32 -1.0, %v2618_v53  ;;  %v81_v16 = vld [vmem:[%s4989_s0 + $0x8] sm:$0xc0] }
 0x20c   :  { %v2643_v63 = vmul.f32 -1.0, %v2619_v26  ;;  %v2644_v51 = vmul.f32 -1.0, %v2620_v56  ;;  %v2649_v18 = vrot.slane %v2637_v7, 7  ;;  %v2650_v39 = vrot.slane %v2638_v17, 7  ;;  %v85_v53 = vld [vmem:[%s4989_s0 + $0x28] sm:$0xc0] }
 0x20d   :  { %v2651_v8 = vrot.slane %v2639_v60, 7  ;;  %v2652_v34 = vrot.slane %v2640_v61, 7  ;;  %v2661_v1 = vrot.slane %v2641_v42, 6  ;;  %v2662_v5 = vrot.slane %v2642_v22, 6  ;;  %v87_v10 = vld [vmem:[%s4989_s0 + $0x38] sm:$0x1] }
 0x20e   :  { %v2663_v62 = vrot.slane %v2643_v63, 6  ;;  %v2664_v19 = vrot.slane %v2644_v51, 6  ;;  %v2669_v40 = vsel %vm294_vm6, %v2633_v59, %v2649_v18  ;;  %v2670_v27 = vsel %vm294_vm6, %v2634_v0, %v2650_v39  ;;  %v5182_v26 = vld [vmem:[#allocation19_spill] sm:$0xff]  ;;  %s3070_s0 = smov [#allocation10]  }
 0x20f   :  { %v2671_v44 = vsel %vm294_vm6, %v2635_v41, %v2651_v8  ;;  %v2672_v2 = vsel %vm294_vm6, %v2636_v6, %v2652_v34  ;;  %v4905_v37 = vsel %vm299_vm9, %v2669_v40, %v2661_v1  ;;  %v4908_v11 = vsel %vm299_vm9, %v2670_v27, %v2662_v5  ;;  %s2821_s12 = sshll.u32 %s3070_s0, 4  ;;  %s2822_s12 = int_to_ptr.vmem [resolvable:$true] %s2821_s12 }
 0x210   :  { %v4911_v12 = vsel %vm299_vm9, %v2671_v44, %v2663_v62  ;;  %v4914_v38 = vsel %vm299_vm9, %v2672_v2, %v2664_v19  ;;  %v4916_v13 = vsub.f32 1.0, %v2629_v48  ;;  %v4918_v29 = vsub.f32 1.0, %v2630_v25  ;;  %s3033_s13 = scalar_lea.vmem %s2822_s12, 512  ;;  %p3038_p7 = scmp.lt.s32.totalorder %s2822_s12, %s2822_s12 }
 0x211   :  { %v4920_v23 = vsub.f32 1.0, %v2631_v52  ;;  %v4922_v55 = vsub.f32 1.0, %v2632_v28  ;;  %vm2741_vm6 = vcmask 1044480   ;;  %v2790_v54 = vrot.slane %v4905_v37, 4  ;;  %p3034_p6 = scmp.ne.s32.totalorder %s2822_s12, %s3033_s13  ;;  %p3039_p8 = scmp.lt.s32.totalorder %s3033_s13, %s3033_s13 }
 0x212   :  { %v2684_v35 = vrot.slane %v4916_v13, %v5178_v21  ;;  %v2688_v50 = vrot.slane %v4918_v29, %v5178_v21  ;;  %v2705_v43 = vsub.f32 1.0, %v4916_v13  ;;  %v2706_v49 = vsub.f32 1.0, %v4918_v29 }
 0x213   :  { %v2692_v58 = vrot.slane %v4920_v23, %v5178_v21  ;;  %v2696_v31 = vrot.slane %v4922_v55, %v5178_v21  ;;  %v2707_v32 = vsub.f32 1.0, %v4920_v23  ;;  %v2708_v24 = vsub.f32 1.0, %v4922_v55  ;;  %p3040_p9 = por %p3039_p8, %p3038_p7 }
 0x214   :  { %v2697_v4 = vmul.f32 %v5179_v36, %v2684_v35  ;;  %v2698_v15 = vmul.f32 %v5180_v20, %v2688_v50  ;;  %v2712_v47 = vrot.slane %v2705_v43, %v5178_v21  ;;  %v2716_v33 = vrot.slane %v2706_v49, %v5178_v21 }
 0x215   :  { %v2699_v46 = vmul.f32 %v5181_v45, %v2692_v58  ;;  %v2700_v56 = vmul.f32 %v5182_v26, %v2696_v31  ;;  %v2720_v48 = vrot.slane %v2707_v32, %v5178_v21  ;;  %v2724_v25 = vrot.slane %v2708_v24, %v5178_v21  ;;  %p3041_p10 = pnand %p3040_p9, %p3034_p6 }
 0x216   :  { %v2701_v52 = vmul.f32 %v2697_v4, %v2684_v35  ;;  %v2702_v28 = vmul.f32 %v2698_v15, %v2688_v50  ;;  %v2725_v59 = vmul.f32 %v2712_v47, %v80_v30  ;;  %v2726_v0 = vmul.f32 %v2716_v33, %v81_v16 }
 0x217   :  { %v2703_v41 = vmul.f32 %v2699_v46, %v2692_v58  ;;  %v2704_v6 = vmul.f32 %v2700_v56, %v2696_v31  ;;  %v2727_v7 = vmul.f32 %v2712_v47, %v82_v14  ;;  %v2728_v17 = vmul.f32 %v2716_v33, %v83_v57 }
 0x218   :  { %v2729_v60 = vmul.f32 %v2720_v48, %v84_v9  ;;  %v2730_v61 = vmul.f32 %v2724_v25, %v85_v53  ;;  %v2731_v42 = vmul.f32 %v2720_v48, %v86_v3  ;;  %v2732_v22 = vmul.f32 %v2724_v25, %v87_v10 }
 0x219   :  { %v2742_v63 = vrot.slane %v2725_v59, 3  ;;  %v2743_v51 = vrot.slane %v2727_v7, 3  ;;  %v2745_v18 = vrot.slane %v2726_v0, 3  ;;  %v2746_v39 = vrot.slane %v2728_v17, 3 }
 0x21a   :  { %v2748_v8 = vrot.slane %v2729_v60, 3  ;;  %v2749_v34 = vrot.slane %v2731_v42, 3  ;;  %v2751_v1 = vrot.slane %v2730_v61, 3  ;;  %v2752_v5 = vrot.slane %v2732_v22, 3 }
 0x21b   :  { %v2744_v62 = vsel %vm2741_vm6, %v2742_v63, %v2743_v51  ;;  %v2747_v19 = vsel %vm2741_vm6, %v2745_v18, %v2746_v39  ;;  %v2778_v40 = vrot.slane %v4916_v13, 5  ;;  %v2779_v27 = vrot.slane %v4918_v29, 5 }
 0x21c   :  { %v2750_v44 = vsel %vm2741_vm6, %v2748_v8, %v2749_v34  ;;  %v2753_v2 = vsel %vm2741_vm6, %v2751_v1, %v2752_v5  ;;  %v2758_v21 = vadd.f32 %v2744_v62, %v2701_v52  ;;  %v2759_v35 = vadd.f32 %v2747_v19, %v2702_v28 }
 0x21d   :  { %v2760_v50 = vadd.f32 %v2750_v44, %v2703_v41  ;;  %v2761_v43 = vadd.f32 %v2753_v2, %v2704_v6  ;;  %v2780_v49 = vrot.slane %v4920_v23, 5  ;;  %v2781_v30 = vrot.slane %v4922_v55, 5 }
 0x21e   :  { %v2766_v16 = vrot.slane %v2758_v21, 3  ;;  %v2767_v58 = vrot.slane %v2759_v35, 3  ;;  %v2791_v31 = vrot.slane %v4908_v11, 4  ;;  %v2792_v13 = vrot.slane %v4911_v12, 4 }
 0x21f   :  { %v2768_v32 = vrot.slane %v2760_v50, 3  ;;  %v2769_v29 = vrot.slane %v2761_v43, 3  ;;  %v2793_v24 = vrot.slane %v4914_v38, 4  ;;  %vm2802_vm9 = vcmask 1043456  }
 0x220   :  { %v2798_v14 = vsel %vm304_vm10, %v2766_v16, %v2778_v40  ;;  %v2799_v57 = vsel %vm304_vm10, %v2767_v58, %v2779_v27 }
 0x221   :  { %v2800_v23 = vsel %vm304_vm10, %v2768_v32, %v2780_v49  ;;  %v2801_v55 = vsel %vm304_vm10, %v2769_v29, %v2781_v30  ;;  %v2803_v11 = vsel %vm2802_vm9, %v2798_v14, %v2790_v54  ;;  %v2804_v12 = vsel %vm2802_vm9, %v2799_v57, %v2791_v31 }
 0x222   :  { %v2805_v9 = vsel %vm2802_vm9, %v2800_v23, %v2792_v13  ;;  %v2806_v36 = vsel %vm2802_vm9, %v2801_v55, %v2793_v24  ;;  %v2808_v4 = vsel %vm2807_vm2, %v2803_v11, 0.0  ;;  %v2809_v38 = vsel %vm2807_vm2, %v2804_v12, 0.0 }
 0x223   :  { %v2810_v20 = vsel %vm2807_vm2, %v2805_v9, 0.0  ;;  %v2811_v15 = vsel %vm2807_vm2, %v2806_v36, 0.0  ;;  %2812 = vst [vmem:[#allocation10] sm:$0xff] %v2808_v4  ;;  %2813 = vst [vmem:[#allocation10 + $0x8] sm:$0xff] %v2809_v38 }
 0x224   :  { %2814 = vst [vmem:[#allocation10 + $0x10] sm:$0xff] %v2810_v20  ;;  %2815 = vst [vmem:[#allocation10 + $0x18] sm:$0xff] %v2811_v15 }
 0x225   :  { %3044 = shalt.err (!%p3041_p10)
}
 0x226   :  { %s3071_s4 = smov 256   ;;  %s3072_s5 = smov 16  }
 0x227   :  { %2827 = dma.vmem_to_hbm [thread:$0]  %s2822_s12, 512, %s4995_s6, [#allocation3], %s3071_s4, %s3071_s4, %s3072_s5  }
 0x228   :  { %3059 = dma.done.wait [#allocation3], 512  }
 0x229   :  { %3060 = vsyncadd [#allocation3], 4294966784 }
 0x22a   :  { %2831 = vsyncpa [#allocation3], 1 }
 0x22b   :  { %2832 = vsyncpa [#allocation4], 1 }
 0x22c   :  { %2833 = vsyncpa [#allocation6], 1 }
 0x22d   :  { %2834 = vsyncpa [#allocation9], 1 }

</bundles_post_ra>
